<compile_context>
chip_gen: v6e
topology: v6e:2x2x1
jax: 0.10.0
libtpu: 0.0.40
codegen_flags: <defaults>
</compile_context>

<pallas_src>
import functools

import jax
import jax.numpy as jnp
from jax.experimental import pallas as pl
from jax.experimental.pallas import tpu as pltpu


def _largest_divisor_leq(n, cap):
    cap = max(1, min(cap, n))
    for d in range(cap, 0, -1):
        if n % d == 0:
            return d
    return 1


# ============================================================================
# Conv (no bias) + fused BN partial statistics [+ fused 1x1 projection conv]
# ============================================================================
def _conv_kernel(x_ref, w_ref, *rest, K, stride, pad, H, W, Wo, rows, Cin,
                 with_proj):
    # Refs (in order): inputs [x, w, (w_proj)], outputs [y, ssum, ssq,
    # (y_proj, psum, psq)], scratch [xpad].
    if with_proj:
        (wp_ref, y_ref, ssum_ref, ssq_ref,
         yp_ref, psum_ref, psq_ref, xpad_ref) = rest
    else:
        wp_ref = yp_ref = psum_ref = psq_ref = None
        (y_ref, ssum_ref, ssq_ref, xpad_ref) = rest

    t = pl.program_id(1)
    Hp, Wp = H + 2 * pad, W + 2 * pad
    Cout = w_ref.shape[-1]

    # ---- once-per-image prologue (t axis is "arbitrary" -> sequential per
    #      core, so the scratch / stat accumulators persist across row tiles).
    @pl.when(t == 0)
    def _prologue():
        if pad:
            # Zero only the halo border; the interior is fully overwritten.
            xpad_ref[pl.ds(0, pad), :, :] = jnp.zeros((pad, Wp, Cin), jnp.float32)
            xpad_ref[pl.ds(H + pad, pad), :, :] = jnp.zeros((pad, Wp, Cin), jnp.float32)
            xpad_ref[pl.ds(pad, H), pl.ds(0, pad), :] = jnp.zeros((H, pad, Cin), jnp.float32)
            xpad_ref[pl.ds(pad, H), pl.ds(W + pad, pad), :] = jnp.zeros((H, pad, Cin), jnp.float32)
        xpad_ref[pl.ds(pad, H), pl.ds(pad, W), :] = x_ref[0].astype(jnp.float32)
        # Zero the per-image BN-statistic accumulators (revisited outputs).
        ssum_ref[...] = jnp.zeros_like(ssum_ref)
        ssq_ref[...] = jnp.zeros_like(ssq_ref)
        if with_proj:
            psum_ref[...] = jnp.zeros_like(psum_ref)
            psq_ref[...] = jnp.zeros_like(psq_ref)

    r0 = pl.multiple_of(t * (rows * stride), rows * stride)

    def tap_slice(row_start, col_start):
        if stride == 1:
            return xpad_ref[pl.ds(row_start, rows), pl.ds(col_start, Wo), :]
        return xpad_ref[pl.ds(row_start, rows, stride),
                        pl.ds(col_start, Wo, stride), :]

    # ---- KxK conv: per-tap MXU matmuls accumulated in f32 (Cin < 128), or a
    #      single deep im2col contraction when the lane concat is dense.
    if Cin >= 128:
        pieces = []
        for dy in range(K):
            for dx in range(K):
                p = tap_slice(r0 + dy, dx)
                pieces.append(p.reshape(rows * Wo, Cin).astype(jnp.bfloat16))
        patch = pieces[0] if len(pieces) == 1 else jnp.concatenate(pieces, axis=1)
        acc = jnp.dot(patch, w_ref[...], preferred_element_type=jnp.float32)
    else:
        acc = jnp.zeros((rows * Wo, Cout), jnp.float32)
        ti = 0
        for dy in range(K):
            for dx in range(K):
                p = tap_slice(r0 + dy, dx).reshape(rows * Wo, Cin)
                w_tap = w_ref[pl.ds(ti * Cin, Cin), :]
                acc = acc + jnp.dot(p.astype(jnp.bfloat16), w_tap,
                                    preferred_element_type=jnp.float32)
                ti += 1

    # TODO(synk): Cout < 128 makes this a lane-masked store; for real nets pad
    # Cout to a lane multiple (or store packed (rows, Wo*Cout)) for full vst.
    y_ref[0] = acc.astype(y_ref.dtype)
    ssum_ref[0] = ssum_ref[0] + jnp.sum(acc, axis=0, keepdims=True)
    ssq_ref[0] = ssq_ref[0] + jnp.sum(acc * acc, axis=0, keepdims=True)

    # ---- fused 1x1 projection-shortcut conv (shares the resident image).
    if with_proj:
        xp = tap_slice(r0 + pad, pad).reshape(rows * Wo, Cin)
        accp = jnp.dot(xp.astype(jnp.bfloat16), wp_ref[...],
                       preferred_element_type=jnp.float32)
        yp_ref[0] = accp.astype(yp_ref.dtype)
        psum_ref[0] = psum_ref[0] + jnp.sum(accp, axis=0, keepdims=True)
        psq_ref[0] = psq_ref[0] + jnp.sum(accp * accp, axis=0, keepdims=True)


def conv_bn_stats(x, w, *, stride=1, padding=0, w_proj=None, rows_cap=8):
    """KxK conv (no bias), NHWC bf16 input, HWIO weights.

    Emits the conv output in bf16 plus per-image (sum, sum-of-squares) f32
    partials so the following BatchNorm never re-reads its input just for
    statistics.  If ``w_proj`` (a 1x1 HWIO weight, stride = `stride`, pad 0)
    is given, the projection-shortcut conv is fused into the same pass.

    Returns (y, ssum, ssq) or (y, ssum, ssq, y_proj, psum, psq) with
      y    : (N, Ho*Wo, Cout) bf16
      ssum : (N, 1, Cout)     f32  per-image sums
      ssq  : (N, 1, Cout)     f32  per-image sums of squares
    """
    N, H, W, Cin = x.shape
    K = w.shape[0]
    Cout = w.shape[-1]
    Hp, Wp = H + 2 * padding, W + 2 * padding
    Ho = (Hp - K) // stride + 1
    Wo = (Wp - K) // stride + 1
    rows = _largest_divisor_leq(Ho, rows_cap)
    T = Ho // rows
    with_proj = w_proj is not None

    w2 = w.reshape(K * K * Cin, Cout).astype(jnp.bfloat16)   # im2col weights

    kernel = functools.partial(_conv_kernel, K=K, stride=stride, pad=padding,
                               H=H, W=W, Wo=Wo, rows=rows, Cin=Cin,
                               with_proj=with_proj)

    # Constant-in-t index maps -> the image / weights are DMA'd once per image
    # (Pallas skips the copy when the block index does not change).
    in_specs = [
        pl.BlockSpec((1, H, W, Cin), lambda n, t: (n, 0, 0, 0)),
        pl.BlockSpec((K * K * Cin, Cout), lambda n, t: (0, 0)),
    ]
    args = [x, w2]
    out_shape = [
        jax.ShapeDtypeStruct((N, Ho * Wo, Cout), jnp.bfloat16),
        jax.ShapeDtypeStruct((N, 1, Cout), jnp.float32),
        jax.ShapeDtypeStruct((N, 1, Cout), jnp.float32),
    ]
    out_specs = [
        pl.BlockSpec((1, rows * Wo, Cout), lambda n, t: (n, t, 0)),
        pl.BlockSpec((1, 1, Cout), lambda n, t: (n, 0, 0)),   # revisited acc
        pl.BlockSpec((1, 1, Cout), lambda n, t: (n, 0, 0)),   # revisited acc
    ]
    if with_proj:
        Cp = w_proj.shape[-1]
        wp2 = w_proj.reshape(Cin, Cp).astype(jnp.bfloat16)
        in_specs.append(pl.BlockSpec((Cin, Cp), lambda n, t: (0, 0)))
        args.append(wp2)
        out_shape += [
            jax.ShapeDtypeStruct((N, Ho * Wo, Cp), jnp.bfloat16),
            jax.ShapeDtypeStruct((N, 1, Cp), jnp.float32),
            jax.ShapeDtypeStruct((N, 1, Cp), jnp.float32),
        ]
        out_specs += [
            pl.BlockSpec((1, rows * Wo, Cp), lambda n, t: (n, t, 0)),
            pl.BlockSpec((1, 1, Cp), lambda n, t: (n, 0, 0)),
            pl.BlockSpec((1, 1, Cp), lambda n, t: (n, 0, 0)),
        ]

    # TODO(synk): for large feature maps (or v7x's 64 MiB VMEM) switch the
    # whole-image-resident input block to a row-tile-with-halo BlockSpec.
    return pl.pallas_call(
        kernel,
        out_shape=tuple(out_shape),
        grid=(N, T),
        in_specs=in_specs,
        out_specs=tuple(out_specs),
        scratch_shapes=[pltpu.VMEM((Hp, Wp, Cin), jnp.float32)],
        compiler_params=pltpu.CompilerParams(
            # t MUST be "arbitrary": the pad scratch and the stat accumulators
            # persist across row tiles of one image; n still shards across
            # TensorCores on v7x.
            dimension_semantics=("parallel", "arbitrary"),
            vmem_limit_bytes=32 * 1024 * 1024),
    )(*args)


# ============================================================================
# BatchNorm: hoisted finalize + lane-dense normalize [+ residual] [+ ReLU]
# ============================================================================
def _bn_kernel(scale_ref, shift_ref, y_ref, *rest, relu, has_res):
    if has_res:
        r_ref, o_ref = rest
    else:
        (o_ref,) = rest
    out = y_ref[0].astype(jnp.float32) * scale_ref[...] + shift_ref[...]
    if has_res:
        out = out + r_ref[0].astype(jnp.float32)
    if relu:
        out = jnp.maximum(out, 0.0)
    o_ref[0] = out.astype(o_ref.dtype)


def batchnorm_apply(y_flat, ssum, ssq, gamma, beta, *, Wo, relu, count,
                    residual=None, eps=1e-5, out_dtype=jnp.bfloat16):
    """Training-mode BatchNorm over a conv output, fused with the optional
    residual add and ReLU.  The finalize (mean/var/rsqrt) and the per-lane
    spread of scale/shift over the packed Wo*C layout are tiny plain-JAX ops
    done once per BN; the Pallas pass is a pure lane-dense FMA on large
    (rows, Wo*C) tiles.  Returns the packed (N, Ho, Wo*C) result."""
    N, HW, C = y_flat.shape
    Ho = HW // Wo
    WC = Wo * C

    # ---- hoisted finalize from the conv kernel's per-image partials
    s1 = jnp.sum(ssum, axis=(0, 1))                       # (C,)
    s2 = jnp.sum(ssq, axis=(0, 1))                        # (C,)
    inv_count = 1.0 / float(count)
    mean = s1 * inv_count
    var = s2 * inv_count - mean * mean                    # biased variance
    scale = gamma.astype(jnp.float32) * jax.lax.rsqrt(var + eps)
    shift = beta.astype(jnp.float32) - mean * scale
    scale_l = jnp.tile(scale, Wo).reshape(1, WC)          # lane j -> channel j%C
    shift_l = jnp.tile(shift, Wo).reshape(1, WC)

    y_p = y_flat.reshape(N, Ho, WC)                       # free view (same bytes)
    rows = _largest_divisor_leq(Ho, max(8, (2 << 20) // (WC * 4)))
    TB = Ho // rows

    kernel = functools.partial(_bn_kernel, relu=relu,
                               has_res=residual is not None)
    in_specs = [
        pl.BlockSpec((1, WC), lambda n, t: (0, 0)),
        pl.BlockSpec((1, WC), lambda n, t: (0, 0)),
        pl.BlockSpec((1, rows, WC), lambda n, t: (n, t, 0)),
    ]
    args = [scale_l, shift_l, y_p]
    if residual is not None:
        in_specs.append(pl.BlockSpec((1, rows, WC), lambda n, t: (n, t, 0)))
        args.append(residual)

    return pl.pallas_call(
        kernel,
        out_shape=jax.ShapeDtypeStruct((N, Ho, WC), out_dtype),
        grid=(N, TB),
        in_specs=in_specs,
        out_specs=pl.BlockSpec((1, rows, WC), lambda n, t: (n, t, 0)),
        compiler_params=pltpu.CompilerParams(
            dimension_semantics=("parallel", "parallel"),
            vmem_limit_bytes=32 * 1024 * 1024),
    )(*args)


# ============================================================================
# BasicBlock forward (NHWC in / NHWC out)
# ============================================================================
def basic_block_forward(x_nhwc, params, *, stride=1):
    N, H, W, Cin = x_nhwc.shape
    planes = params["w1"].shape[-1]
    Ho = (H + 2 - 3) // stride + 1
    Wo = (W + 2 - 3) // stride + 1
    count = N * Ho * Wo

    x_bf = x_nhwc.astype(jnp.bfloat16)       # bf16 HBM reads from here on
    has_proj = "ws" in params

    # conv1 (3x3, stride, pad 1) [+ fused 1x1 projection-shortcut conv]
    if has_proj:
        c1, s1, q1, cs, ss, qs = conv_bn_stats(
            x_bf, params["w1"], stride=stride, padding=1, w_proj=params["ws"])
    else:
        c1, s1, q1 = conv_bn_stats(x_bf, params["w1"], stride=stride, padding=1)

    # bn1 + relu (packed bf16 output feeds conv2 via a free view reshape)
    a1 = batchnorm_apply(c1, s1, q1, params["g1"], params["b1"], Wo=Wo,
                         relu=True, count=count, out_dtype=jnp.bfloat16)

    # conv2 (3x3, stride 1, pad 1)
    c2, s2, q2 = conv_bn_stats(a1.reshape(N, Ho, Wo, planes), params["w2"],
                               stride=1, padding=1)

    # shortcut: projection (1x1 conv + bn) or identity
    if has_proj:
        sc = batchnorm_apply(cs, ss, qs, params["gs"], params["bs"], Wo=Wo,
                             relu=False, count=count, out_dtype=jnp.bfloat16)
    else:
        sc = x_bf.reshape(N, H, W * Cin)     # identity: stride==1, Cin==planes

    # bn2 + residual add + relu, fused in one lane-dense pass (f32 output)
    out = batchnorm_apply(c2, s2, q2, params["g2"], params["b2"], Wo=Wo,
                          relu=True, count=count, residual=sc,
                          out_dtype=jnp.float32)
    return out.reshape(N, Ho, Wo, planes)


def init_params(key, in_planes, planes, stride):
    k1, k2, k3 = jax.random.split(key, 3)
    p = {
        "w1": 0.1 * jax.random.normal(k1, (3, 3, in_planes, planes), jnp.float32),
        "g1": jnp.ones((planes,), jnp.float32),
        "b1": jnp.zeros((planes,), jnp.float32),
        "w2": 0.1 * jax.random.normal(k2, (3, 3, planes, planes), jnp.float32),
        "g2": jnp.ones((planes,), jnp.float32),
        "b2": jnp.zeros((planes,), jnp.float32),
    }
    if stride != 1 or in_planes != planes:
        p["ws"] = 0.1 * jax.random.normal(k3, (1, 1, in_planes, planes), jnp.float32)
        p["gs"] = jnp.ones((planes,), jnp.float32)
        p["bs"] = jnp.zeros((planes,), jnp.float32)
    return p


# ============================================================================
# Pure-JAX references for sanity-checking the Pallas lowering.
# ============================================================================
def _ref_conv(x, w, stride, padding, dtype):
    return jax.lax.conv_general_dilated(
        x.astype(dtype), w.astype(dtype), (stride, stride),
        [(padding, padding)] * 2,
        dimension_numbers=("NHWC", "HWIO", "NHWC"),
        preferred_element_type=jnp.float32)


def _ref_bn(x, g, b, eps=1e-5):
    mean = x.mean(axis=(0, 1, 2), keepdims=True)
    var = ((x - mean) ** 2).mean(axis=(0, 1, 2), keepdims=True)
    return (x - mean) * jax.lax.rsqrt(var + eps) * g + b


def _ref_forward(x, p, stride):
    """Full-f32 reference (PyTorch semantics)."""
    out = jax.nn.relu(_ref_bn(_ref_conv(x, p["w1"], stride, 1, jnp.float32),
                              p["g1"], p["b1"]))
    out = _ref_bn(_ref_conv(out, p["w2"], 1, 1, jnp.float32), p["g2"], p["b2"])
    if "ws" in p:
        sc = _ref_bn(_ref_conv(x, p["ws"], stride, 0, jnp.float32),
                     p["gs"], p["bs"])
    else:
        sc = x
    return jax.nn.relu(out + sc)


def _bn_matched(v_f32, g, b, eps=1e-5):
    # Stats from the f32 conv output, normalization applied to its bf16-stored
    # values -> mirrors the Pallas pipeline exactly.
    m = v_f32.mean(axis=(0, 1, 2))
    var = (v_f32 * v_f32).mean(axis=(0, 1, 2)) - m * m
    scale = g * jax.lax.rsqrt(var + eps)
    shift = b - m * scale
    return v_f32.astype(jnp.bfloat16).astype(jnp.float32) * scale + shift


def _ref_forward_matched(x, p, stride):
    """Reference matched to the kernel's bf16 matmul / bf16-intermediate path."""
    xb = x.astype(jnp.bfloat16)
    c1 = _ref_conv(xb, p["w1"], stride, 1, jnp.bfloat16)
    a1 = jax.nn.relu(_bn_matched(c1, p["g1"], p["b1"])).astype(jnp.bfloat16)
    c2 = _ref_conv(a1, p["w2"], 1, 1, jnp.bfloat16)
    if "ws" in p:
        cs = _ref_conv(xb, p["ws"], stride, 0, jnp.bfloat16)
        sc = _bn_matched(cs, p["gs"], p["bs"]).astype(jnp.bfloat16).astype(jnp.float32)
    else:
        sc = xb.astype(jnp.float32)
    return jax.nn.relu(_bn_matched(c2, p["g2"], p["b2"]) + sc)


if __name__ == "__main__":
    key = jax.random.PRNGKey(0)
    kx, kp = jax.random.split(key)

    # PyTorch-shaped input (NCHW): batch=2, in_planes=4, spatial=16x16
    N, in_planes, H, W = 2, 4, 16, 16
    planes, stride = 8, 1   # in_planes != planes -> projection shortcut path

    x_nchw = jax.random.normal(kx, (N, in_planes, H, W), jnp.float32)
    x_nhwc = jnp.transpose(x_nchw, (0, 2, 3, 1))   # glue: NCHW -> NHWC

    params = init_params(kp, in_planes, planes, stride)

    fwd = jax.jit(functools.partial(basic_block_forward, stride=stride))
    out = jax.block_until_ready(fwd(x_nhwc, params))
    assert out.shape == (N, H // stride, W // stride, planes)

    # Matched reference (same bf16 matmul + bf16 intermediate quantization):
    # tight check of the Pallas lowering.
    ref_m = _ref_forward_matched(x_nhwc, params, stride)
    assert jnp.allclose(out, ref_m, atol=2e-2, rtol=2e-2), \
        "mismatch vs bf16-matched JAX reference"

    # Full-f32 reference (PyTorch semantics): loose check covering bf16
    # matmul + bf16 intermediate-storage rounding.
    ref_f = _ref_forward(x_nhwc, params, stride)
    assert jnp.allclose(out, ref_f, atol=8e-2, rtol=8e-2), \
        "mismatch vs f32 JAX reference"

    print("KERNEL_OK")
</pallas_src>

<mosaic_0001>
module attributes {stable_mosaic.version = 11 : i64} {
  func.func @_bn_kernel(%arg0: i32, %arg1: i32, %arg2: memref<1x128xf32, #tpu.memory_space<vmem>>, %arg3: memref<1x128xf32, #tpu.memory_space<vmem>>, %arg4: memref<1x16x128xbf16, #tpu.memory_space<vmem>>, %arg5: memref<1x16x128xbf16, #tpu.memory_space<vmem>>) attributes {dimension_semantics = [#tpu.dimension_semantics<parallel>, #tpu.dimension_semantics<parallel>], iteration_bounds = array<i64: 2, 1>, scalar_prefetch = 0 : i64, scratch_operands = 0 : i64, tpu.core_type = #tpu.core_type<tc>, window_params = [{pipeline_mode = #tpu.pipeline_mode<synchronous>, transform_indices = @transform_0, window_bounds = array<i64: 1, 128>}, {pipeline_mode = #tpu.pipeline_mode<synchronous>, transform_indices = @transform_1, window_bounds = array<i64: 1, 128>}, {transform_indices = @transform_2, window_bounds = array<i64: 1, 16, 128>}, {transform_indices = @transform_3, window_bounds = array<i64: 1, 16, 128>}]} {
    %c0 = arith.constant 0 : index
    %c0_0 = arith.constant 0 : index
    %c0_1 = arith.constant 0 : index
    %0 = vector.load %arg4[%c0, %c0_0, %c0_1] : memref<1x16x128xbf16, #tpu.memory_space<vmem>>, vector<1x16x128xbf16>
    %1 = vector.shape_cast %0 : vector<1x16x128xbf16> to vector<16x128xbf16>
    %2 = arith.extf %1 : vector<16x128xbf16> to vector<16x128xf32>
    %c0_2 = arith.constant 0 : index
    %c0_3 = arith.constant 0 : index
    %3 = vector.load %arg2[%c0_2, %c0_3] : memref<1x128xf32, #tpu.memory_space<vmem>>, vector<1x128xf32>
    %4 = vector.broadcast %3 : vector<1x128xf32> to vector<16x128xf32>
    %5 = arith.mulf %2, %4 : vector<16x128xf32>
    %c0_4 = arith.constant 0 : index
    %c0_5 = arith.constant 0 : index
    %6 = vector.load %arg3[%c0_4, %c0_5] : memref<1x128xf32, #tpu.memory_space<vmem>>, vector<1x128xf32>
    %7 = vector.broadcast %6 : vector<1x128xf32> to vector<16x128xf32>
    %8 = arith.addf %5, %7 : vector<16x128xf32>
    %cst = arith.constant 0.000000e+00 : f32
    %9 = vector.broadcast %cst : f32 to vector<16x128xf32>
    %10 = arith.maximumf %8, %9 : vector<16x128xf32>
    %11 = arith.truncf %10 : vector<16x128xf32> to vector<16x128xbf16>
    %c0_6 = arith.constant 0 : index
    %c0_7 = arith.constant 0 : index
    %c0_8 = arith.constant 0 : index
    %12 = vector.load %arg5[%c0_6, %c0_7, %c0_8] : memref<1x16x128xbf16, #tpu.memory_space<vmem>>, vector<1x16x128xbf16>
    %13 = vector.shape_cast %12 : vector<1x16x128xbf16> to vector<16x128xbf16>
    %14 = vector.shape_cast %11 : vector<16x128xbf16> to vector<1x16x128xbf16>
    tpu.vector_store %arg5[%c0_6, %c0_7, %c0_8], %14 {strides = array<i32>} : memref<1x16x128xbf16, #tpu.memory_space<vmem>>, vector<1x16x128xbf16>,
    return
  }
  func.func @transform_0(%arg0: i32, %arg1: i32) -> (i32, i32) {
    %c0_i32 = arith.constant 0 : i32
    %c0_i32_0 = arith.constant 0 : i32
    %c0_i32_1 = arith.constant 0 : i32
    return %c0_i32, %c0_i32_0 : i32, i32
  }
  func.func @transform_1(%arg0: i32, %arg1: i32) -> (i32, i32) {
    %c0_i32 = arith.constant 0 : i32
    %c0_i32_0 = arith.constant 0 : i32
    %c0_i32_1 = arith.constant 0 : i32
    return %c0_i32, %c0_i32_0 : i32, i32
  }
  func.func @transform_2(%arg0: i32, %arg1: i32) -> (i32, i32, i32) {
    %c0_i32 = arith.constant 0 : i32
    %c0_i32_0 = arith.constant 0 : i32
    return %arg0, %arg1, %c0_i32 : i32, i32, i32
  }
  func.func @transform_3(%arg0: i32, %arg1: i32) -> (i32, i32, i32) {
    %c0_i32 = arith.constant 0 : i32
    %c0_i32_0 = arith.constant 0 : i32
    return %arg0, %arg1, %c0_i32 : i32, i32, i32
  }
}

module attributes {stable_mosaic.version = 11 : i64} {
  func.func @_conv_kernel(%arg0: i32, %arg1: i32, %arg2: memref<1x16x16x4xbf16, #tpu.memory_space<vmem>>, %arg3: memref<36x8xbf16, #tpu.memory_space<vmem>>, %arg4: memref<4x8xbf16, #tpu.memory_space<vmem>>, %arg5: memref<1x128x8xbf16, #tpu.memory_space<vmem>>, %arg6: memref<1x1x8xf32, #tpu.memory_space<vmem>>, %arg7: memref<1x1x8xf32, #tpu.memory_space<vmem>>, %arg8: memref<1x128x8xbf16, #tpu.memory_space<vmem>>, %arg9: memref<1x1x8xf32, #tpu.memory_space<vmem>>, %arg10: memref<1x1x8xf32, #tpu.memory_space<vmem>>, %arg11: memref<18x18x4xf32, #tpu.memory_space<vmem>>) attributes {dimension_semantics = [#tpu.dimension_semantics<parallel>, #tpu.dimension_semantics<arbitrary>], iteration_bounds = array<i64: 2, 2>, scalar_prefetch = 0 : i64, scratch_operands = 1 : i64, tpu.core_type = #tpu.core_type<tc>, window_params = [{transform_indices = @transform_0, window_bounds = array<i64: 1, 16, 16, 4>}, {pipeline_mode = #tpu.pipeline_mode<synchronous>, transform_indices = @transform_1, window_bounds = array<i64: 36, 8>}, {pipeline_mode = #tpu.pipeline_mode<synchronous>, transform_indices = @transform_2, window_bounds = array<i64: 4, 8>}, {transform_indices = @transform_3, window_bounds = array<i64: 1, 128, 8>}, {transform_indices = @transform_4, window_bounds = array<i64: 1, 1, 8>}, {transform_indices = @transform_5, window_bounds = array<i64: 1, 1, 8>}, {transform_indices = @transform_6, window_bounds = array<i64: 1, 128, 8>}, {transform_indices = @transform_7, window_bounds = array<i64: 1, 1, 8>}, {transform_indices = @transform_8, window_bounds = array<i64: 1, 1, 8>}]} {
    %c0_i32 = arith.constant 0 : i32
    %0 = arith.cmpi eq, %arg1, %c0_i32 : i32
    %1 = arith.extui %0 : i1 to i32
    %c0_i32_0 = arith.constant 0 : i32
    %2 = arith.cmpi ne, %1, %c0_i32_0 : i32
    scf.if %2 {
      %cst_82 = arith.constant 0.000000e+00 : f32
      %127 = vector.broadcast %cst_82 : f32 to vector<1x18x4xf32>
      %c0_83 = arith.constant 0 : index
      %c0_84 = arith.constant 0 : index
      %c0_85 = arith.constant 0 : index
      %128 = vector.load %arg11[%c0_83, %c0_84, %c0_85] : memref<18x18x4xf32, #tpu.memory_space<vmem>>, vector<1x18x4xf32>
      tpu.vector_store %arg11[%c0_83, %c0_84, %c0_85], %127 {strides = array<i32>} : memref<18x18x4xf32, #tpu.memory_space<vmem>>, vector<1x18x4xf32>,
      %cst_86 = arith.constant 0.000000e+00 : f32
      %129 = vector.broadcast %cst_86 : f32 to vector<1x18x4xf32>
      %c17 = arith.constant 17 : index
      %c0_87 = arith.constant 0 : index
      %c0_88 = arith.constant 0 : index
      %130 = vector.load %arg11[%c17, %c0_87, %c0_88] : memref<18x18x4xf32, #tpu.memory_space<vmem>>, vector<1x18x4xf32>
      tpu.vector_store %arg11[%c17, %c0_87, %c0_88], %129 {strides = array<i32>} : memref<18x18x4xf32, #tpu.memory_space<vmem>>, vector<1x18x4xf32>,
      %cst_89 = arith.constant 0.000000e+00 : f32
      %131 = vector.broadcast %cst_89 : f32 to vector<16x1x4xf32>
      %c1_90 = arith.constant 1 : index
      %c0_91 = arith.constant 0 : index
      %c0_92 = arith.constant 0 : index
      %132 = vector.load %arg11[%c1_90, %c0_91, %c0_92] : memref<18x18x4xf32, #tpu.memory_space<vmem>>, vector<16x1x4xf32>
      tpu.vector_store %arg11[%c1_90, %c0_91, %c0_92], %131 {strides = array<i32>} : memref<18x18x4xf32, #tpu.memory_space<vmem>>, vector<16x1x4xf32>,
      %cst_93 = arith.constant 0.000000e+00 : f32
      %133 = vector.broadcast %cst_93 : f32 to vector<16x1x4xf32>
      %c1_94 = arith.constant 1 : index
      %c17_95 = arith.constant 17 : index
      %c0_96 = arith.constant 0 : index
      %134 = vector.load %arg11[%c1_94, %c17_95, %c0_96] : memref<18x18x4xf32, #tpu.memory_space<vmem>>, vector<16x1x4xf32>
      tpu.vector_store %arg11[%c1_94, %c17_95, %c0_96], %133 {strides = array<i32>} : memref<18x18x4xf32, #tpu.memory_space<vmem>>, vector<16x1x4xf32>,
      %c0_97 = arith.constant 0 : index
      %c0_98 = arith.constant 0 : index
      %c0_99 = arith.constant 0 : index
      %c0_100 = arith.constant 0 : index
      %135 = vector.load %arg2[%c0_97, %c0_98, %c0_99, %c0_100] : memref<1x16x16x4xbf16, #tpu.memory_space<vmem>>, vector<1x16x16x4xbf16>
      %136 = vector.shape_cast %135 : vector<1x16x16x4xbf16> to vector<16x16x4xbf16>
      %137 = arith.extf %136 : vector<16x16x4xbf16> to vector<16x16x4xf32>
      %c1_101 = arith.constant 1 : index
      %c1_102 = arith.constant 1 : index
      %c0_103 = arith.constant 0 : index
      %138 = vector.load %arg11[%c1_101, %c1_102, %c0_103] : memref<18x18x4xf32, #tpu.memory_space<vmem>>, vector<16x16x4xf32>
      tpu.vector_store %arg11[%c1_101, %c1_102, %c0_103], %137 {strides = array<i32>} : memref<18x18x4xf32, #tpu.memory_space<vmem>>, vector<16x16x4xf32>,
      %cst_104 = arith.constant 0.000000e+00 : f32
      %139 = vector.broadcast %cst_104 : f32 to vector<1x1x8xf32>
      %c0_105 = arith.constant 0 : index
      %c0_106 = arith.constant 0 : index
      %c0_107 = arith.constant 0 : index
      %140 = vector.load %arg6[%c0_105, %c0_106, %c0_107] : memref<1x1x8xf32, #tpu.memory_space<vmem>>, vector<1x1x8xf32>
      tpu.vector_store %arg6[%c0_105, %c0_106, %c0_107], %139 {strides = array<i32>} : memref<1x1x8xf32, #tpu.memory_space<vmem>>, vector<1x1x8xf32>,
      %cst_108 = arith.constant 0.000000e+00 : f32
      %141 = vector.broadcast %cst_108 : f32 to vector<1x1x8xf32>
      %c0_109 = arith.constant 0 : index
      %c0_110 = arith.constant 0 : index
      %c0_111 = arith.constant 0 : index
      %142 = vector.load %arg7[%c0_109, %c0_110, %c0_111] : memref<1x1x8xf32, #tpu.memory_space<vmem>>, vector<1x1x8xf32>
      tpu.vector_store %arg7[%c0_109, %c0_110, %c0_111], %141 {strides = array<i32>} : memref<1x1x8xf32, #tpu.memory_space<vmem>>, vector<1x1x8xf32>,
      %cst_112 = arith.constant 0.000000e+00 : f32
      %143 = vector.broadcast %cst_112 : f32 to vector<1x1x8xf32>
      %c0_113 = arith.constant 0 : index
      %c0_114 = arith.constant 0 : index
      %c0_115 = arith.constant 0 : index
      %144 = vector.load %arg9[%c0_113, %c0_114, %c0_115] : memref<1x1x8xf32, #tpu.memory_space<vmem>>, vector<1x1x8xf32>
      tpu.vector_store %arg9[%c0_113, %c0_114, %c0_115], %143 {strides = array<i32>} : memref<1x1x8xf32, #tpu.memory_space<vmem>>, vector<1x1x8xf32>,
      %cst_116 = arith.constant 0.000000e+00 : f32
      %145 = vector.broadcast %cst_116 : f32 to vector<1x1x8xf32>
      %c0_117 = arith.constant 0 : index
      %c0_118 = arith.constant 0 : index
      %c0_119 = arith.constant 0 : index
      %146 = vector.load %arg10[%c0_117, %c0_118, %c0_119] : memref<1x1x8xf32, #tpu.memory_space<vmem>>, vector<1x1x8xf32>
      tpu.vector_store %arg10[%c0_117, %c0_118, %c0_119], %145 {strides = array<i32>} : memref<1x1x8xf32, #tpu.memory_space<vmem>>, vector<1x1x8xf32>,
    } else {
    }
    %c8_i32 = arith.constant 8 : i32
    %3 = arith.muli %arg1, %c8_i32 : i32
    %4 = tpu.assume_multiple %3, 8 : i32
    %cst = arith.constant 0.000000e+00 : f32
    %5 = vector.broadcast %cst : f32 to vector<128x8xf32>
    %c0_i32_1 = arith.constant 0 : i32
    %6 = arith.addi %4, %c0_i32_1 : i32
    %7 = arith.index_cast %6 : i32 to index
    %c0 = arith.constant 0 : index
    %c0_2 = arith.constant 0 : index
    %8 = vector.load %arg11[%7, %c0, %c0_2] : memref<18x18x4xf32, #tpu.memory_space<vmem>>, vector<8x16x4xf32>
    %9 = vector.shape_cast %8 : vector<8x16x4xf32> to vector<128x4xf32>
    %c0_3 = arith.constant 0 : index
    %c0_4 = arith.constant 0 : index
    %10 = vector.load %arg3[%c0_3, %c0_4] : memref<36x8xbf16, #tpu.memory_space<vmem>>, vector<4x8xbf16>
    %11 = arith.truncf %9 : vector<128x4xf32> to vector<128x4xbf16>
    %cst_5 = arith.constant dense<0.000000e+00> : vector<128x8xf32>
    %12 = tpu.matmul %11, %10, %cst_5 {dimension_numbers = #tpu.dot_dimension_numbers<[1], [0], [0], [1], [0, 0, 1, 1], [], []>} : vector<128x4xbf16>, vector<4x8xbf16>, vector<128x8xf32> -> vector<128x8xf32>
    %13 = arith.addf %5, %12 : vector<128x8xf32>
    %c0_i32_6 = arith.constant 0 : i32
    %14 = arith.addi %4, %c0_i32_6 : i32
    %15 = arith.index_cast %14 : i32 to index
    %c1 = arith.constant 1 : index
    %c0_7 = arith.constant 0 : index
    %16 = vector.load %arg11[%15, %c1, %c0_7] : memref<18x18x4xf32, #tpu.memory_space<vmem>>, vector<8x16x4xf32>
    %17 = vector.shape_cast %16 : vector<8x16x4xf32> to vector<128x4xf32>
    %c4 = arith.constant 4 : index
    %c0_8 = arith.constant 0 : index
    %18 = vector.load %arg3[%c4, %c0_8] : memref<36x8xbf16, #tpu.memory_space<vmem>>, vector<4x8xbf16>
    %19 = arith.truncf %17 : vector<128x4xf32> to vector<128x4xbf16>
    %cst_9 = arith.constant dense<0.000000e+00> : vector<128x8xf32>
    %20 = tpu.matmul %19, %18, %cst_9 {dimension_numbers = #tpu.dot_dimension_numbers<[1], [0], [0], [1], [0, 0, 1, 1], [], []>} : vector<128x4xbf16>, vector<4x8xbf16>, vector<128x8xf32> -> vector<128x8xf32>
    %21 = arith.addf %13, %20 : vector<128x8xf32>
    %c0_i32_10 = arith.constant 0 : i32
    %22 = arith.addi %4, %c0_i32_10 : i32
    %23 = arith.index_cast %22 : i32 to index
    %c2 = arith.constant 2 : index
    %c0_11 = arith.constant 0 : index
    %24 = vector.load %arg11[%23, %c2, %c0_11] : memref<18x18x4xf32, #tpu.memory_space<vmem>>, vector<8x16x4xf32>
    %25 = vector.shape_cast %24 : vector<8x16x4xf32> to vector<128x4xf32>
    %c8 = arith.constant 8 : index
    %c0_12 = arith.constant 0 : index
    %26 = vector.load %arg3[%c8, %c0_12] : memref<36x8xbf16, #tpu.memory_space<vmem>>, vector<4x8xbf16>
    %27 = arith.truncf %25 : vector<128x4xf32> to vector<128x4xbf16>
    %cst_13 = arith.constant dense<0.000000e+00> : vector<128x8xf32>
    %28 = tpu.matmul %27, %26, %cst_13 {dimension_numbers = #tpu.dot_dimension_numbers<[1], [0], [0], [1], [0, 0, 1, 1], [], []>} : vector<128x4xbf16>, vector<4x8xbf16>, vector<128x8xf32> -> vector<128x8xf32>
    %29 = arith.addf %21, %28 : vector<128x8xf32>
    %c1_i32 = arith.constant 1 : i32
    %30 = arith.addi %4, %c1_i32 : i32
    %31 = arith.index_cast %30 : i32 to index
    %c0_14 = arith.constant 0 : index
    %c0_15 = arith.constant 0 : index
    %32 = vector.load %arg11[%31, %c0_14, %c0_15] : memref<18x18x4xf32, #tpu.memory_space<vmem>>, vector<8x16x4xf32>
    %33 = vector.shape_cast %32 : vector<8x16x4xf32> to vector<128x4xf32>
    %c12 = arith.constant 12 : index
    %c0_16 = arith.constant 0 : index
    %34 = vector.load %arg3[%c12, %c0_16] : memref<36x8xbf16, #tpu.memory_space<vmem>>, vector<4x8xbf16>
    %35 = arith.truncf %33 : vector<128x4xf32> to vector<128x4xbf16>
    %cst_17 = arith.constant dense<0.000000e+00> : vector<128x8xf32>
    %36 = tpu.matmul %35, %34, %cst_17 {dimension_numbers = #tpu.dot_dimension_numbers<[1], [0], [0], [1], [0, 0, 1, 1], [], []>} : vector<128x4xbf16>, vector<4x8xbf16>, vector<128x8xf32> -> vector<128x8xf32>
    %37 = arith.addf %29, %36 : vector<128x8xf32>
    %c1_i32_18 = arith.constant 1 : i32
    %38 = arith.addi %4, %c1_i32_18 : i32
    %39 = arith.index_cast %38 : i32 to index
    %c1_19 = arith.constant 1 : index
    %c0_20 = arith.constant 0 : index
    %40 = vector.load %arg11[%39, %c1_19, %c0_20] : memref<18x18x4xf32, #tpu.memory_space<vmem>>, vector<8x16x4xf32>
    %41 = vector.shape_cast %40 : vector<8x16x4xf32> to vector<128x4xf32>
    %c16 = arith.constant 16 : index
    %c0_21 = arith.constant 0 : index
    %42 = vector.load %arg3[%c16, %c0_21] : memref<36x8xbf16, #tpu.memory_space<vmem>>, vector<4x8xbf16>
    %43 = arith.truncf %41 : vector<128x4xf32> to vector<128x4xbf16>
    %cst_22 = arith.constant dense<0.000000e+00> : vector<128x8xf32>
    %44 = tpu.matmul %43, %42, %cst_22 {dimension_numbers = #tpu.dot_dimension_numbers<[1], [0], [0], [1], [0, 0, 1, 1], [], []>} : vector<128x4xbf16>, vector<4x8xbf16>, vector<128x8xf32> -> vector<128x8xf32>
    %45 = arith.addf %37, %44 : vector<128x8xf32>
    %c1_i32_23 = arith.constant 1 : i32
    %46 = arith.addi %4, %c1_i32_23 : i32
    %47 = arith.index_cast %46 : i32 to index
    %c2_24 = arith.constant 2 : index
    %c0_25 = arith.constant 0 : index
    %48 = vector.load %arg11[%47, %c2_24, %c0_25] : memref<18x18x4xf32, #tpu.memory_space<vmem>>, vector<8x16x4xf32>
    %49 = vector.shape_cast %48 : vector<8x16x4xf32> to vector<128x4xf32>
    %c20 = arith.constant 20 : index
    %c0_26 = arith.constant 0 : index
    %50 = vector.load %arg3[%c20, %c0_26] : memref<36x8xbf16, #tpu.memory_space<vmem>>, vector<4x8xbf16>
    %51 = arith.truncf %49 : vector<128x4xf32> to vector<128x4xbf16>
    %cst_27 = arith.constant dense<0.000000e+00> : vector<128x8xf32>
    %52 = tpu.matmul %51, %50, %cst_27 {dimension_numbers = #tpu.dot_dimension_numbers<[1], [0], [0], [1], [0, 0, 1, 1], [], []>} : vector<128x4xbf16>, vector<4x8xbf16>, vector<128x8xf32> -> vector<128x8xf32>
    %53 = arith.addf %45, %52 : vector<128x8xf32>
    %c2_i32 = arith.constant 2 : i32
    %54 = arith.addi %4, %c2_i32 : i32
    %55 = arith.index_cast %54 : i32 to index
    %c0_28 = arith.constant 0 : index
    %c0_29 = arith.constant 0 : index
    %56 = vector.load %arg11[%55, %c0_28, %c0_29] : memref<18x18x4xf32, #tpu.memory_space<vmem>>, vector<8x16x4xf32>
    %57 = vector.shape_cast %56 : vector<8x16x4xf32> to vector<128x4xf32>
    %c24 = arith.constant 24 : index
    %c0_30 = arith.constant 0 : index
    %58 = vector.load %arg3[%c24, %c0_30] : memref<36x8xbf16, #tpu.memory_space<vmem>>, vector<4x8xbf16>
    %59 = arith.truncf %57 : vector<128x4xf32> to vector<128x4xbf16>
    %cst_31 = arith.constant dense<0.000000e+00> : vector<128x8xf32>
    %60 = tpu.matmul %59, %58, %cst_31 {dimension_numbers = #tpu.dot_dimension_numbers<[1], [0], [0], [1], [0, 0, 1, 1], [], []>} : vector<128x4xbf16>, vector<4x8xbf16>, vector<128x8xf32> -> vector<128x8xf32>
    %61 = arith.addf %53, %60 : vector<128x8xf32>
    %c2_i32_32 = arith.constant 2 : i32
    %62 = arith.addi %4, %c2_i32_32 : i32
    %63 = arith.index_cast %62 : i32 to index
    %c1_33 = arith.constant 1 : index
    %c0_34 = arith.constant 0 : index
    %64 = vector.load %arg11[%63, %c1_33, %c0_34] : memref<18x18x4xf32, #tpu.memory_space<vmem>>, vector<8x16x4xf32>
    %65 = vector.shape_cast %64 : vector<8x16x4xf32> to vector<128x4xf32>
    %c28 = arith.constant 28 : index
    %c0_35 = arith.constant 0 : index
    %66 = vector.load %arg3[%c28, %c0_35] : memref<36x8xbf16, #tpu.memory_space<vmem>>, vector<4x8xbf16>
    %67 = arith.truncf %65 : vector<128x4xf32> to vector<128x4xbf16>
    %cst_36 = arith.constant dense<0.000000e+00> : vector<128x8xf32>
    %68 = tpu.matmul %67, %66, %cst_36 {dimension_numbers = #tpu.dot_dimension_numbers<[1], [0], [0], [1], [0, 0, 1, 1], [], []>} : vector<128x4xbf16>, vector<4x8xbf16>, vector<128x8xf32> -> vector<128x8xf32>
    %69 = arith.addf %61, %68 : vector<128x8xf32>
    %c2_i32_37 = arith.constant 2 : i32
    %70 = arith.addi %4, %c2_i32_37 : i32
    %71 = arith.index_cast %70 : i32 to index
    %c2_38 = arith.constant 2 : index
    %c0_39 = arith.constant 0 : index
    %72 = vector.load %arg11[%71, %c2_38, %c0_39] : memref<18x18x4xf32, #tpu.memory_space<vmem>>, vector<8x16x4xf32>
    %73 = vector.shape_cast %72 : vector<8x16x4xf32> to vector<128x4xf32>
    %c32 = arith.constant 32 : index
    %c0_40 = arith.constant 0 : index
    %74 = vector.load %arg3[%c32, %c0_40] : memref<36x8xbf16, #tpu.memory_space<vmem>>, vector<4x8xbf16>
    %75 = arith.truncf %73 : vector<128x4xf32> to vector<128x4xbf16>
    %cst_41 = arith.constant dense<0.000000e+00> : vector<128x8xf32>
    %76 = tpu.matmul %75, %74, %cst_41 {dimension_numbers = #tpu.dot_dimension_numbers<[1], [0], [0], [1], [0, 0, 1, 1], [], []>} : vector<128x4xbf16>, vector<4x8xbf16>, vector<128x8xf32> -> vector<128x8xf32>
    %77 = arith.addf %69, %76 : vector<128x8xf32>
    %78 = arith.truncf %77 : vector<128x8xf32> to vector<128x8xbf16>
    %c0_42 = arith.constant 0 : index
    %c0_43 = arith.constant 0 : index
    %c0_44 = arith.constant 0 : index
    %79 = vector.load %arg5[%c0_42, %c0_43, %c0_44] : memref<1x128x8xbf16, #tpu.memory_space<vmem>>, vector<1x128x8xbf16>
    %80 = vector.shape_cast %79 : vector<1x128x8xbf16> to vector<128x8xbf16>
    %81 = vector.shape_cast %78 : vector<128x8xbf16> to vector<1x128x8xbf16>
    tpu.vector_store %arg5[%c0_42, %c0_43, %c0_44], %81 {strides = array<i32>} : memref<1x128x8xbf16, #tpu.memory_space<vmem>>, vector<1x128x8xbf16>,
    %c0_45 = arith.constant 0 : index
    %c0_46 = arith.constant 0 : index
    %c0_47 = arith.constant 0 : index
    %82 = vector.load %arg6[%c0_45, %c0_46, %c0_47] : memref<1x1x8xf32, #tpu.memory_space<vmem>>, vector<1x1x8xf32>
    %83 = vector.shape_cast %82 : vector<1x1x8xf32> to vector<1x8xf32>
    %cst_48 = arith.constant dense<0.000000e+00> : vector<8xf32>
    %84 = vector.multi_reduction <add>, %77, %cst_48 [0] : vector<128x8xf32> to vector<8xf32>
    %85 = vector.shape_cast %84 : vector<8xf32> to vector<1x8xf32>
    %86 = arith.addf %83, %85 : vector<1x8xf32>
    %c0_49 = arith.constant 0 : index
    %c0_50 = arith.constant 0 : index
    %c0_51 = arith.constant 0 : index
    %87 = vector.load %arg6[%c0_49, %c0_50, %c0_51] : memref<1x1x8xf32, #tpu.memory_space<vmem>>, vector<1x1x8xf32>
    %88 = vector.shape_cast %87 : vector<1x1x8xf32> to vector<1x8xf32>
    %89 = vector.shape_cast %86 : vector<1x8xf32> to vector<1x1x8xf32>
    tpu.vector_store %arg6[%c0_49, %c0_50, %c0_51], %89 {strides = array<i32>} : memref<1x1x8xf32, #tpu.memory_space<vmem>>, vector<1x1x8xf32>,
    %c0_52 = arith.constant 0 : index
    %c0_53 = arith.constant 0 : index
    %c0_54 = arith.constant 0 : index
    %90 = vector.load %arg7[%c0_52, %c0_53, %c0_54] : memref<1x1x8xf32, #tpu.memory_space<vmem>>, vector<1x1x8xf32>
    %91 = vector.shape_cast %90 : vector<1x1x8xf32> to vector<1x8xf32>
    %92 = arith.mulf %77, %77 : vector<128x8xf32>
    %cst_55 = arith.constant dense<0.000000e+00> : vector<8xf32>
    %93 = vector.multi_reduction <add>, %92, %cst_55 [0] : vector<128x8xf32> to vector<8xf32>
    %94 = vector.shape_cast %93 : vector<8xf32> to vector<1x8xf32>
    %95 = arith.addf %91, %94 : vector<1x8xf32>
    %c0_56 = arith.constant 0 : index
    %c0_57 = arith.constant 0 : index
    %c0_58 = arith.constant 0 : index
    %96 = vector.load %arg7[%c0_56, %c0_57, %c0_58] : memref<1x1x8xf32, #tpu.memory_space<vmem>>, vector<1x1x8xf32>
    %97 = vector.shape_cast %96 : vector<1x1x8xf32> to vector<1x8xf32>
    %98 = vector.shape_cast %95 : vector<1x8xf32> to vector<1x1x8xf32>
    tpu.vector_store %arg7[%c0_56, %c0_57, %c0_58], %98 {strides = array<i32>} : memref<1x1x8xf32, #tpu.memory_space<vmem>>, vector<1x1x8xf32>,
    %c1_i32_59 = arith.constant 1 : i32
    %99 = arith.addi %4, %c1_i32_59 : i32
    %100 = arith.index_cast %99 : i32 to index
    %c1_60 = arith.constant 1 : index
    %c0_61 = arith.constant 0 : index
    %101 = vector.load %arg11[%100, %c1_60, %c0_61] : memref<18x18x4xf32, #tpu.memory_space<vmem>>, vector<8x16x4xf32>
    %102 = vector.shape_cast %101 : vector<8x16x4xf32> to vector<128x4xf32>
    %103 = arith.truncf %102 : vector<128x4xf32> to vector<128x4xbf16>
    %c0_62 = arith.constant 0 : index
    %c0_63 = arith.constant 0 : index
    %104 = vector.load %arg4[%c0_62, %c0_63] : memref<4x8xbf16, #tpu.memory_space<vmem>>, vector<4x8xbf16>
    %cst_64 = arith.constant dense<0.000000e+00> : vector<128x8xf32>
    %105 = tpu.matmul %103, %104, %cst_64 {dimension_numbers = #tpu.dot_dimension_numbers<[1], [0], [0], [1], [0, 0, 1, 1], [], []>} : vector<128x4xbf16>, vector<4x8xbf16>, vector<128x8xf32> -> vector<128x8xf32>
    %106 = arith.truncf %105 : vector<128x8xf32> to vector<128x8xbf16>
    %c0_65 = arith.constant 0 : index
    %c0_66 = arith.constant 0 : index
    %c0_67 = arith.constant 0 : index
    %107 = vector.load %arg8[%c0_65, %c0_66, %c0_67] : memref<1x128x8xbf16, #tpu.memory_space<vmem>>, vector<1x128x8xbf16>
    %108 = vector.shape_cast %107 : vector<1x128x8xbf16> to vector<128x8xbf16>
    %109 = vector.shape_cast %106 : vector<128x8xbf16> to vector<1x128x8xbf16>
    tpu.vector_store %arg8[%c0_65, %c0_66, %c0_67], %109 {strides = array<i32>} : memref<1x128x8xbf16, #tpu.memory_space<vmem>>, vector<1x128x8xbf16>,
    %c0_68 = arith.constant 0 : index
    %c0_69 = arith.constant 0 : index
    %c0_70 = arith.constant 0 : index
    %110 = vector.load %arg9[%c0_68, %c0_69, %c0_70] : memref<1x1x8xf32, #tpu.memory_space<vmem>>, vector<1x1x8xf32>
    %111 = vector.shape_cast %110 : vector<1x1x8xf32> to vector<1x8xf32>
    %cst_71 = arith.constant dense<0.000000e+00> : vector<8xf32>
    %112 = vector.multi_reduction <add>, %105, %cst_71 [0] : vector<128x8xf32> to vector<8xf32>
    %113 = vector.shape_cast %112 : vector<8xf32> to vector<1x8xf32>
    %114 = arith.addf %111, %113 : vector<1x8xf32>
    %c0_72 = arith.constant 0 : index
    %c0_73 = arith.constant 0 : index
    %c0_74 = arith.constant 0 : index
    %115 = vector.load %arg9[%c0_72, %c0_73, %c0_74] : memref<1x1x8xf32, #tpu.memory_space<vmem>>, vector<1x1x8xf32>
    %116 = vector.shape_cast %115 : vector<1x1x8xf32> to vector<1x8xf32>
    %117 = vector.shape_cast %114 : vector<1x8xf32> to vector<1x1x8xf32>
    tpu.vector_store %arg9[%c0_72, %c0_73, %c0_74], %117 {strides = array<i32>} : memref<1x1x8xf32, #tpu.memory_space<vmem>>, vector<1x1x8xf32>,
    %c0_75 = arith.constant 0 : index
    %c0_76 = arith.constant 0 : index
    %c0_77 = arith.constant 0 : index
    %118 = vector.load %arg10[%c0_75, %c0_76, %c0_77] : memref<1x1x8xf32, #tpu.memory_space<vmem>>, vector<1x1x8xf32>
    %119 = vector.shape_cast %118 : vector<1x1x8xf32> to vector<1x8xf32>
    %120 = arith.mulf %105, %105 : vector<128x8xf32>
    %cst_78 = arith.constant dense<0.000000e+00> : vector<8xf32>
    %121 = vector.multi_reduction <add>, %120, %cst_78 [0] : vector<128x8xf32> to vector<8xf32>
    %122 = vector.shape_cast %121 : vector<8xf32> to vector<1x8xf32>
    %123 = arith.addf %119, %122 : vector<1x8xf32>
    %c0_79 = arith.constant 0 : index
    %c0_80 = arith.constant 0 : index
    %c0_81 = arith.constant 0 : index
    %124 = vector.load %arg10[%c0_79, %c0_80, %c0_81] : memref<1x1x8xf32, #tpu.memory_space<vmem>>, vector<1x1x8xf32>
    %125 = vector.shape_cast %124 : vector<1x1x8xf32> to vector<1x8xf32>
    %126 = vector.shape_cast %123 : vector<1x8xf32> to vector<1x1x8xf32>
    tpu.vector_store %arg10[%c0_79, %c0_80, %c0_81], %126 {strides = array<i32>} : memref<1x1x8xf32, #tpu.memory_space<vmem>>, vector<1x1x8xf32>,
    return
  }
  func.func @transform_0(%arg0: i32, %arg1: i32) -> (i32, i32, i32, i32) {
    %c0_i32 = arith.constant 0 : i32
    %c0_i32_0 = arith.constant 0 : i32
    %c0_i32_1 = arith.constant 0 : i32
    %c0_i32_2 = arith.constant 0 : i32
    return %arg0, %c0_i32, %c0_i32_0, %c0_i32_1 : i32, i32, i32, i32
  }
  func.func @transform_1(%arg0: i32, %arg1: i32) -> (i32, i32) {
    %c0_i32 = arith.constant 0 : i32
    %c0_i32_0 = arith.constant 0 : i32
    %c0_i32_1 = arith.constant 0 : i32
    return %c0_i32, %c0_i32_0 : i32, i32
  }
  func.func @transform_2(%arg0: i32, %arg1: i32) -> (i32, i32) {
    %c0_i32 = arith.constant 0 : i32
    %c0_i32_0 = arith.constant 0 : i32
    %c0_i32_1 = arith.constant 0 : i32
    return %c0_i32, %c0_i32_0 : i32, i32
  }
  func.func @transform_3(%arg0: i32, %arg1: i32) -> (i32, i32, i32) {
    %c0_i32 = arith.constant 0 : i32
    %c0_i32_0 = arith.constant 0 : i32
    return %arg0, %arg1, %c0_i32 : i32, i32, i32
  }
  func.func @transform_4(%arg0: i32, %arg1: i32) -> (i32, i32, i32) {
    %c0_i32 = arith.constant 0 : i32
    %c0_i32_0 = arith.constant 0 : i32
    %c0_i32_1 = arith.constant 0 : i32
    return %arg0, %c0_i32, %c0_i32_0 : i32, i32, i32
  }
  func.func @transform_5(%arg0: i32, %arg1: i32) -> (i32, i32, i32) {
    %c0_i32 = arith.constant 0 : i32
    %c0_i32_0 = arith.constant 0 : i32
    %c0_i32_1 = arith.constant 0 : i32
    return %arg0, %c0_i32, %c0_i32_0 : i32, i32, i32
  }
  func.func @transform_6(%arg0: i32, %arg1: i32) -> (i32, i32, i32) {
    %c0_i32 = arith.constant 0 : i32
    %c0_i32_0 = arith.constant 0 : i32
    return %arg0, %arg1, %c0_i32 : i32, i32, i32
  }
  func.func @transform_7(%arg0: i32, %arg1: i32) -> (i32, i32, i32) {
    %c0_i32 = arith.constant 0 : i32
    %c0_i32_0 = arith.constant 0 : i32
    %c0_i32_1 = arith.constant 0 : i32
    return %arg0, %c0_i32, %c0_i32_0 : i32, i32, i32
  }
  func.func @transform_8(%arg0: i32, %arg1: i32) -> (i32, i32, i32) {
    %c0_i32 = arith.constant 0 : i32
    %c0_i32_0 = arith.constant 0 : i32
    %c0_i32_1 = arith.constant 0 : i32
    return %arg0, %c0_i32, %c0_i32_0 : i32, i32, i32
  }
}

module attributes {stable_mosaic.version = 11 : i64} {
  func.func @_bn_kernel(%arg0: i32, %arg1: i32, %arg2: memref<1x128xf32, #tpu.memory_space<vmem>>, %arg3: memref<1x128xf32, #tpu.memory_space<vmem>>, %arg4: memref<1x16x128xbf16, #tpu.memory_space<vmem>>, %arg5: memref<1x16x128xbf16, #tpu.memory_space<vmem>>) attributes {dimension_semantics = [#tpu.dimension_semantics<parallel>, #tpu.dimension_semantics<parallel>], iteration_bounds = array<i64: 2, 1>, scalar_prefetch = 0 : i64, scratch_operands = 0 : i64, tpu.core_type = #tpu.core_type<tc>, window_params = [{pipeline_mode = #tpu.pipeline_mode<synchronous>, transform_indices = @transform_0, window_bounds = array<i64: 1, 128>}, {pipeline_mode = #tpu.pipeline_mode<synchronous>, transform_indices = @transform_1, window_bounds = array<i64: 1, 128>}, {transform_indices = @transform_2, window_bounds = array<i64: 1, 16, 128>}, {transform_indices = @transform_3, window_bounds = array<i64: 1, 16, 128>}]} {
    %c0 = arith.constant 0 : index
    %c0_0 = arith.constant 0 : index
    %c0_1 = arith.constant 0 : index
    %0 = vector.load %arg4[%c0, %c0_0, %c0_1] : memref<1x16x128xbf16, #tpu.memory_space<vmem>>, vector<1x16x128xbf16>
    %1 = vector.shape_cast %0 : vector<1x16x128xbf16> to vector<16x128xbf16>
    %2 = arith.extf %1 : vector<16x128xbf16> to vector<16x128xf32>
    %c0_2 = arith.constant 0 : index
    %c0_3 = arith.constant 0 : index
    %3 = vector.load %arg2[%c0_2, %c0_3] : memref<1x128xf32, #tpu.memory_space<vmem>>, vector<1x128xf32>
    %4 = vector.broadcast %3 : vector<1x128xf32> to vector<16x128xf32>
    %5 = arith.mulf %2, %4 : vector<16x128xf32>
    %c0_4 = arith.constant 0 : index
    %c0_5 = arith.constant 0 : index
    %6 = vector.load %arg3[%c0_4, %c0_5] : memref<1x128xf32, #tpu.memory_space<vmem>>, vector<1x128xf32>
    %7 = vector.broadcast %6 : vector<1x128xf32> to vector<16x128xf32>
    %8 = arith.addf %5, %7 : vector<16x128xf32>
    %9 = arith.truncf %8 : vector<16x128xf32> to vector<16x128xbf16>
    %c0_6 = arith.constant 0 : index
    %c0_7 = arith.constant 0 : index
    %c0_8 = arith.constant 0 : index
    %10 = vector.load %arg5[%c0_6, %c0_7, %c0_8] : memref<1x16x128xbf16, #tpu.memory_space<vmem>>, vector<1x16x128xbf16>
    %11 = vector.shape_cast %10 : vector<1x16x128xbf16> to vector<16x128xbf16>
    %12 = vector.shape_cast %9 : vector<16x128xbf16> to vector<1x16x128xbf16>
    tpu.vector_store %arg5[%c0_6, %c0_7, %c0_8], %12 {strides = array<i32>} : memref<1x16x128xbf16, #tpu.memory_space<vmem>>, vector<1x16x128xbf16>,
    return
  }
  func.func @transform_0(%arg0: i32, %arg1: i32) -> (i32, i32) {
    %c0_i32 = arith.constant 0 : i32
    %c0_i32_0 = arith.constant 0 : i32
    %c0_i32_1 = arith.constant 0 : i32
    return %c0_i32, %c0_i32_0 : i32, i32
  }
  func.func @transform_1(%arg0: i32, %arg1: i32) -> (i32, i32) {
    %c0_i32 = arith.constant 0 : i32
    %c0_i32_0 = arith.constant 0 : i32
    %c0_i32_1 = arith.constant 0 : i32
    return %c0_i32, %c0_i32_0 : i32, i32
  }
  func.func @transform_2(%arg0: i32, %arg1: i32) -> (i32, i32, i32) {
    %c0_i32 = arith.constant 0 : i32
    %c0_i32_0 = arith.constant 0 : i32
    return %arg0, %arg1, %c0_i32 : i32, i32, i32
  }
  func.func @transform_3(%arg0: i32, %arg1: i32) -> (i32, i32, i32) {
    %c0_i32 = arith.constant 0 : i32
    %c0_i32_0 = arith.constant 0 : i32
    return %arg0, %arg1, %c0_i32 : i32, i32, i32
  }
}

module attributes {stable_mosaic.version = 11 : i64} {
  func.func @_conv_kernel(%arg0: i32, %arg1: i32, %arg2: memref<1x16x16x8xbf16, #tpu.memory_space<vmem>>, %arg3: memref<72x8xbf16, #tpu.memory_space<vmem>>, %arg4: memref<1x128x8xbf16, #tpu.memory_space<vmem>>, %arg5: memref<1x1x8xf32, #tpu.memory_space<vmem>>, %arg6: memref<1x1x8xf32, #tpu.memory_space<vmem>>, %arg7: memref<18x18x8xf32, #tpu.memory_space<vmem>>) attributes {dimension_semantics = [#tpu.dimension_semantics<parallel>, #tpu.dimension_semantics<arbitrary>], iteration_bounds = array<i64: 2, 2>, scalar_prefetch = 0 : i64, scratch_operands = 1 : i64, tpu.core_type = #tpu.core_type<tc>, window_params = [{transform_indices = @transform_0, window_bounds = array<i64: 1, 16, 16, 8>}, {pipeline_mode = #tpu.pipeline_mode<synchronous>, transform_indices = @transform_1, window_bounds = array<i64: 72, 8>}, {transform_indices = @transform_2, window_bounds = array<i64: 1, 128, 8>}, {transform_indices = @transform_3, window_bounds = array<i64: 1, 1, 8>}, {transform_indices = @transform_4, window_bounds = array<i64: 1, 1, 8>}]} {
    %c0_i32 = arith.constant 0 : i32
    %0 = arith.cmpi eq, %arg1, %c0_i32 : i32
    %1 = arith.extui %0 : i1 to i32
    %c0_i32_0 = arith.constant 0 : i32
    %2 = arith.cmpi ne, %1, %c0_i32_0 : i32
    scf.if %2 {
      %cst_59 = arith.constant 0.000000e+00 : f32
      %99 = vector.broadcast %cst_59 : f32 to vector<1x18x8xf32>
      %c0_60 = arith.constant 0 : index
      %c0_61 = arith.constant 0 : index
      %c0_62 = arith.constant 0 : index
      %100 = vector.load %arg7[%c0_60, %c0_61, %c0_62] : memref<18x18x8xf32, #tpu.memory_space<vmem>>, vector<1x18x8xf32>
      tpu.vector_store %arg7[%c0_60, %c0_61, %c0_62], %99 {strides = array<i32>} : memref<18x18x8xf32, #tpu.memory_space<vmem>>, vector<1x18x8xf32>,
      %cst_63 = arith.constant 0.000000e+00 : f32
      %101 = vector.broadcast %cst_63 : f32 to vector<1x18x8xf32>
      %c17 = arith.constant 17 : index
      %c0_64 = arith.constant 0 : index
      %c0_65 = arith.constant 0 : index
      %102 = vector.load %arg7[%c17, %c0_64, %c0_65] : memref<18x18x8xf32, #tpu.memory_space<vmem>>, vector<1x18x8xf32>
      tpu.vector_store %arg7[%c17, %c0_64, %c0_65], %101 {strides = array<i32>} : memref<18x18x8xf32, #tpu.memory_space<vmem>>, vector<1x18x8xf32>,
      %cst_66 = arith.constant 0.000000e+00 : f32
      %103 = vector.broadcast %cst_66 : f32 to vector<16x1x8xf32>
      %c1_67 = arith.constant 1 : index
      %c0_68 = arith.constant 0 : index
      %c0_69 = arith.constant 0 : index
      %104 = vector.load %arg7[%c1_67, %c0_68, %c0_69] : memref<18x18x8xf32, #tpu.memory_space<vmem>>, vector<16x1x8xf32>
      tpu.vector_store %arg7[%c1_67, %c0_68, %c0_69], %103 {strides = array<i32>} : memref<18x18x8xf32, #tpu.memory_space<vmem>>, vector<16x1x8xf32>,
      %cst_70 = arith.constant 0.000000e+00 : f32
      %105 = vector.broadcast %cst_70 : f32 to vector<16x1x8xf32>
      %c1_71 = arith.constant 1 : index
      %c17_72 = arith.constant 17 : index
      %c0_73 = arith.constant 0 : index
      %106 = vector.load %arg7[%c1_71, %c17_72, %c0_73] : memref<18x18x8xf32, #tpu.memory_space<vmem>>, vector<16x1x8xf32>
      tpu.vector_store %arg7[%c1_71, %c17_72, %c0_73], %105 {strides = array<i32>} : memref<18x18x8xf32, #tpu.memory_space<vmem>>, vector<16x1x8xf32>,
      %c0_74 = arith.constant 0 : index
      %c0_75 = arith.constant 0 : index
      %c0_76 = arith.constant 0 : index
      %c0_77 = arith.constant 0 : index
      %107 = vector.load %arg2[%c0_74, %c0_75, %c0_76, %c0_77] : memref<1x16x16x8xbf16, #tpu.memory_space<vmem>>, vector<1x16x16x8xbf16>
      %108 = vector.shape_cast %107 : vector<1x16x16x8xbf16> to vector<16x16x8xbf16>
      %109 = arith.extf %108 : vector<16x16x8xbf16> to vector<16x16x8xf32>
      %c1_78 = arith.constant 1 : index
      %c1_79 = arith.constant 1 : index
      %c0_80 = arith.constant 0 : index
      %110 = vector.load %arg7[%c1_78, %c1_79, %c0_80] : memref<18x18x8xf32, #tpu.memory_space<vmem>>, vector<16x16x8xf32>
      tpu.vector_store %arg7[%c1_78, %c1_79, %c0_80], %109 {strides = array<i32>} : memref<18x18x8xf32, #tpu.memory_space<vmem>>, vector<16x16x8xf32>,
      %cst_81 = arith.constant 0.000000e+00 : f32
      %111 = vector.broadcast %cst_81 : f32 to vector<1x1x8xf32>
      %c0_82 = arith.constant 0 : index
      %c0_83 = arith.constant 0 : index
      %c0_84 = arith.constant 0 : index
      %112 = vector.load %arg5[%c0_82, %c0_83, %c0_84] : memref<1x1x8xf32, #tpu.memory_space<vmem>>, vector<1x1x8xf32>
      tpu.vector_store %arg5[%c0_82, %c0_83, %c0_84], %111 {strides = array<i32>} : memref<1x1x8xf32, #tpu.memory_space<vmem>>, vector<1x1x8xf32>,
      %cst_85 = arith.constant 0.000000e+00 : f32
      %113 = vector.broadcast %cst_85 : f32 to vector<1x1x8xf32>
      %c0_86 = arith.constant 0 : index
      %c0_87 = arith.constant 0 : index
      %c0_88 = arith.constant 0 : index
      %114 = vector.load %arg6[%c0_86, %c0_87, %c0_88] : memref<1x1x8xf32, #tpu.memory_space<vmem>>, vector<1x1x8xf32>
      tpu.vector_store %arg6[%c0_86, %c0_87, %c0_88], %113 {strides = array<i32>} : memref<1x1x8xf32, #tpu.memory_space<vmem>>, vector<1x1x8xf32>,
    } else {
    }
    %c8_i32 = arith.constant 8 : i32
    %3 = arith.muli %arg1, %c8_i32 : i32
    %4 = tpu.assume_multiple %3, 8 : i32
    %cst = arith.constant 0.000000e+00 : f32
    %5 = vector.broadcast %cst : f32 to vector<128x8xf32>
    %c0_i32_1 = arith.constant 0 : i32
    %6 = arith.addi %4, %c0_i32_1 : i32
    %7 = arith.index_cast %6 : i32 to index
    %c0 = arith.constant 0 : index
    %c0_2 = arith.constant 0 : index
    %8 = vector.load %arg7[%7, %c0, %c0_2] : memref<18x18x8xf32, #tpu.memory_space<vmem>>, vector<8x16x8xf32>
    %9 = vector.shape_cast %8 : vector<8x16x8xf32> to vector<128x8xf32>
    %c0_3 = arith.constant 0 : index
    %c0_4 = arith.constant 0 : index
    %10 = vector.load %arg3[%c0_3, %c0_4] : memref<72x8xbf16, #tpu.memory_space<vmem>>, vector<8x8xbf16>
    %11 = arith.truncf %9 : vector<128x8xf32> to vector<128x8xbf16>
    %cst_5 = arith.constant dense<0.000000e+00> : vector<128x8xf32>
    %12 = tpu.matmul %11, %10, %cst_5 {dimension_numbers = #tpu.dot_dimension_numbers<[1], [0], [0], [1], [0, 0, 1, 1], [], []>} : vector<128x8xbf16>, vector<8x8xbf16>, vector<128x8xf32> -> vector<128x8xf32>
    %13 = arith.addf %5, %12 : vector<128x8xf32>
    %c0_i32_6 = arith.constant 0 : i32
    %14 = arith.addi %4, %c0_i32_6 : i32
    %15 = arith.index_cast %14 : i32 to index
    %c1 = arith.constant 1 : index
    %c0_7 = arith.constant 0 : index
    %16 = vector.load %arg7[%15, %c1, %c0_7] : memref<18x18x8xf32, #tpu.memory_space<vmem>>, vector<8x16x8xf32>
    %17 = vector.shape_cast %16 : vector<8x16x8xf32> to vector<128x8xf32>
    %c8 = arith.constant 8 : index
    %c0_8 = arith.constant 0 : index
    %18 = vector.load %arg3[%c8, %c0_8] : memref<72x8xbf16, #tpu.memory_space<vmem>>, vector<8x8xbf16>
    %19 = arith.truncf %17 : vector<128x8xf32> to vector<128x8xbf16>
    %cst_9 = arith.constant dense<0.000000e+00> : vector<128x8xf32>
    %20 = tpu.matmul %19, %18, %cst_9 {dimension_numbers = #tpu.dot_dimension_numbers<[1], [0], [0], [1], [0, 0, 1, 1], [], []>} : vector<128x8xbf16>, vector<8x8xbf16>, vector<128x8xf32> -> vector<128x8xf32>
    %21 = arith.addf %13, %20 : vector<128x8xf32>
    %c0_i32_10 = arith.constant 0 : i32
    %22 = arith.addi %4, %c0_i32_10 : i32
    %23 = arith.index_cast %22 : i32 to index
    %c2 = arith.constant 2 : index
    %c0_11 = arith.constant 0 : index
    %24 = vector.load %arg7[%23, %c2, %c0_11] : memref<18x18x8xf32, #tpu.memory_space<vmem>>, vector<8x16x8xf32>
    %25 = vector.shape_cast %24 : vector<8x16x8xf32> to vector<128x8xf32>
    %c16 = arith.constant 16 : index
    %c0_12 = arith.constant 0 : index
    %26 = vector.load %arg3[%c16, %c0_12] : memref<72x8xbf16, #tpu.memory_space<vmem>>, vector<8x8xbf16>
    %27 = arith.truncf %25 : vector<128x8xf32> to vector<128x8xbf16>
    %cst_13 = arith.constant dense<0.000000e+00> : vector<128x8xf32>
    %28 = tpu.matmul %27, %26, %cst_13 {dimension_numbers = #tpu.dot_dimension_numbers<[1], [0], [0], [1], [0, 0, 1, 1], [], []>} : vector<128x8xbf16>, vector<8x8xbf16>, vector<128x8xf32> -> vector<128x8xf32>
    %29 = arith.addf %21, %28 : vector<128x8xf32>
    %c1_i32 = arith.constant 1 : i32
    %30 = arith.addi %4, %c1_i32 : i32
    %31 = arith.index_cast %30 : i32 to index
    %c0_14 = arith.constant 0 : index
    %c0_15 = arith.constant 0 : index
    %32 = vector.load %arg7[%31, %c0_14, %c0_15] : memref<18x18x8xf32, #tpu.memory_space<vmem>>, vector<8x16x8xf32>
    %33 = vector.shape_cast %32 : vector<8x16x8xf32> to vector<128x8xf32>
    %c24 = arith.constant 24 : index
    %c0_16 = arith.constant 0 : index
    %34 = vector.load %arg3[%c24, %c0_16] : memref<72x8xbf16, #tpu.memory_space<vmem>>, vector<8x8xbf16>
    %35 = arith.truncf %33 : vector<128x8xf32> to vector<128x8xbf16>
    %cst_17 = arith.constant dense<0.000000e+00> : vector<128x8xf32>
    %36 = tpu.matmul %35, %34, %cst_17 {dimension_numbers = #tpu.dot_dimension_numbers<[1], [0], [0], [1], [0, 0, 1, 1], [], []>} : vector<128x8xbf16>, vector<8x8xbf16>, vector<128x8xf32> -> vector<128x8xf32>
    %37 = arith.addf %29, %36 : vector<128x8xf32>
    %c1_i32_18 = arith.constant 1 : i32
    %38 = arith.addi %4, %c1_i32_18 : i32
    %39 = arith.index_cast %38 : i32 to index
    %c1_19 = arith.constant 1 : index
    %c0_20 = arith.constant 0 : index
    %40 = vector.load %arg7[%39, %c1_19, %c0_20] : memref<18x18x8xf32, #tpu.memory_space<vmem>>, vector<8x16x8xf32>
    %41 = vector.shape_cast %40 : vector<8x16x8xf32> to vector<128x8xf32>
    %c32 = arith.constant 32 : index
    %c0_21 = arith.constant 0 : index
    %42 = vector.load %arg3[%c32, %c0_21] : memref<72x8xbf16, #tpu.memory_space<vmem>>, vector<8x8xbf16>
    %43 = arith.truncf %41 : vector<128x8xf32> to vector<128x8xbf16>
    %cst_22 = arith.constant dense<0.000000e+00> : vector<128x8xf32>
    %44 = tpu.matmul %43, %42, %cst_22 {dimension_numbers = #tpu.dot_dimension_numbers<[1], [0], [0], [1], [0, 0, 1, 1], [], []>} : vector<128x8xbf16>, vector<8x8xbf16>, vector<128x8xf32> -> vector<128x8xf32>
    %45 = arith.addf %37, %44 : vector<128x8xf32>
    %c1_i32_23 = arith.constant 1 : i32
    %46 = arith.addi %4, %c1_i32_23 : i32
    %47 = arith.index_cast %46 : i32 to index
    %c2_24 = arith.constant 2 : index
    %c0_25 = arith.constant 0 : index
    %48 = vector.load %arg7[%47, %c2_24, %c0_25] : memref<18x18x8xf32, #tpu.memory_space<vmem>>, vector<8x16x8xf32>
    %49 = vector.shape_cast %48 : vector<8x16x8xf32> to vector<128x8xf32>
    %c40 = arith.constant 40 : index
    %c0_26 = arith.constant 0 : index
    %50 = vector.load %arg3[%c40, %c0_26] : memref<72x8xbf16, #tpu.memory_space<vmem>>, vector<8x8xbf16>
    %51 = arith.truncf %49 : vector<128x8xf32> to vector<128x8xbf16>
    %cst_27 = arith.constant dense<0.000000e+00> : vector<128x8xf32>
    %52 = tpu.matmul %51, %50, %cst_27 {dimension_numbers = #tpu.dot_dimension_numbers<[1], [0], [0], [1], [0, 0, 1, 1], [], []>} : vector<128x8xbf16>, vector<8x8xbf16>, vector<128x8xf32> -> vector<128x8xf32>
    %53 = arith.addf %45, %52 : vector<128x8xf32>
    %c2_i32 = arith.constant 2 : i32
    %54 = arith.addi %4, %c2_i32 : i32
    %55 = arith.index_cast %54 : i32 to index
    %c0_28 = arith.constant 0 : index
    %c0_29 = arith.constant 0 : index
    %56 = vector.load %arg7[%55, %c0_28, %c0_29] : memref<18x18x8xf32, #tpu.memory_space<vmem>>, vector<8x16x8xf32>
    %57 = vector.shape_cast %56 : vector<8x16x8xf32> to vector<128x8xf32>
    %c48 = arith.constant 48 : index
    %c0_30 = arith.constant 0 : index
    %58 = vector.load %arg3[%c48, %c0_30] : memref<72x8xbf16, #tpu.memory_space<vmem>>, vector<8x8xbf16>
    %59 = arith.truncf %57 : vector<128x8xf32> to vector<128x8xbf16>
    %cst_31 = arith.constant dense<0.000000e+00> : vector<128x8xf32>
    %60 = tpu.matmul %59, %58, %cst_31 {dimension_numbers = #tpu.dot_dimension_numbers<[1], [0], [0], [1], [0, 0, 1, 1], [], []>} : vector<128x8xbf16>, vector<8x8xbf16>, vector<128x8xf32> -> vector<128x8xf32>
    %61 = arith.addf %53, %60 : vector<128x8xf32>
    %c2_i32_32 = arith.constant 2 : i32
    %62 = arith.addi %4, %c2_i32_32 : i32
    %63 = arith.index_cast %62 : i32 to index
    %c1_33 = arith.constant 1 : index
    %c0_34 = arith.constant 0 : index
    %64 = vector.load %arg7[%63, %c1_33, %c0_34] : memref<18x18x8xf32, #tpu.memory_space<vmem>>, vector<8x16x8xf32>
    %65 = vector.shape_cast %64 : vector<8x16x8xf32> to vector<128x8xf32>
    %c56 = arith.constant 56 : index
    %c0_35 = arith.constant 0 : index
    %66 = vector.load %arg3[%c56, %c0_35] : memref<72x8xbf16, #tpu.memory_space<vmem>>, vector<8x8xbf16>
    %67 = arith.truncf %65 : vector<128x8xf32> to vector<128x8xbf16>
    %cst_36 = arith.constant dense<0.000000e+00> : vector<128x8xf32>
    %68 = tpu.matmul %67, %66, %cst_36 {dimension_numbers = #tpu.dot_dimension_numbers<[1], [0], [0], [1], [0, 0, 1, 1], [], []>} : vector<128x8xbf16>, vector<8x8xbf16>, vector<128x8xf32> -> vector<128x8xf32>
    %69 = arith.addf %61, %68 : vector<128x8xf32>
    %c2_i32_37 = arith.constant 2 : i32
    %70 = arith.addi %4, %c2_i32_37 : i32
    %71 = arith.index_cast %70 : i32 to index
    %c2_38 = arith.constant 2 : index
    %c0_39 = arith.constant 0 : index
    %72 = vector.load %arg7[%71, %c2_38, %c0_39] : memref<18x18x8xf32, #tpu.memory_space<vmem>>, vector<8x16x8xf32>
    %73 = vector.shape_cast %72 : vector<8x16x8xf32> to vector<128x8xf32>
    %c64 = arith.constant 64 : index
    %c0_40 = arith.constant 0 : index
    %74 = vector.load %arg3[%c64, %c0_40] : memref<72x8xbf16, #tpu.memory_space<vmem>>, vector<8x8xbf16>
    %75 = arith.truncf %73 : vector<128x8xf32> to vector<128x8xbf16>
    %cst_41 = arith.constant dense<0.000000e+00> : vector<128x8xf32>
    %76 = tpu.matmul %75, %74, %cst_41 {dimension_numbers = #tpu.dot_dimension_numbers<[1], [0], [0], [1], [0, 0, 1, 1], [], []>} : vector<128x8xbf16>, vector<8x8xbf16>, vector<128x8xf32> -> vector<128x8xf32>
    %77 = arith.addf %69, %76 : vector<128x8xf32>
    %78 = arith.truncf %77 : vector<128x8xf32> to vector<128x8xbf16>
    %c0_42 = arith.constant 0 : index
    %c0_43 = arith.constant 0 : index
    %c0_44 = arith.constant 0 : index
    %79 = vector.load %arg4[%c0_42, %c0_43, %c0_44] : memref<1x128x8xbf16, #tpu.memory_space<vmem>>, vector<1x128x8xbf16>
    %80 = vector.shape_cast %79 : vector<1x128x8xbf16> to vector<128x8xbf16>
    %81 = vector.shape_cast %78 : vector<128x8xbf16> to vector<1x128x8xbf16>
    tpu.vector_store %arg4[%c0_42, %c0_43, %c0_44], %81 {strides = array<i32>} : memref<1x128x8xbf16, #tpu.memory_space<vmem>>, vector<1x128x8xbf16>,
    %c0_45 = arith.constant 0 : index
    %c0_46 = arith.constant 0 : index
    %c0_47 = arith.constant 0 : index
    %82 = vector.load %arg5[%c0_45, %c0_46, %c0_47] : memref<1x1x8xf32, #tpu.memory_space<vmem>>, vector<1x1x8xf32>
    %83 = vector.shape_cast %82 : vector<1x1x8xf32> to vector<1x8xf32>
    %cst_48 = arith.constant dense<0.000000e+00> : vector<8xf32>
    %84 = vector.multi_reduction <add>, %77, %cst_48 [0] : vector<128x8xf32> to vector<8xf32>
    %85 = vector.shape_cast %84 : vector<8xf32> to vector<1x8xf32>
    %86 = arith.addf %83, %85 : vector<1x8xf32>
    %c0_49 = arith.constant 0 : index
    %c0_50 = arith.constant 0 : index
    %c0_51 = arith.constant 0 : index
    %87 = vector.load %arg5[%c0_49, %c0_50, %c0_51] : memref<1x1x8xf32, #tpu.memory_space<vmem>>, vector<1x1x8xf32>
    %88 = vector.shape_cast %87 : vector<1x1x8xf32> to vector<1x8xf32>
    %89 = vector.shape_cast %86 : vector<1x8xf32> to vector<1x1x8xf32>
    tpu.vector_store %arg5[%c0_49, %c0_50, %c0_51], %89 {strides = array<i32>} : memref<1x1x8xf32, #tpu.memory_space<vmem>>, vector<1x1x8xf32>,
    %c0_52 = arith.constant 0 : index
    %c0_53 = arith.constant 0 : index
    %c0_54 = arith.constant 0 : index
    %90 = vector.load %arg6[%c0_52, %c0_53, %c0_54] : memref<1x1x8xf32, #tpu.memory_space<vmem>>, vector<1x1x8xf32>
    %91 = vector.shape_cast %90 : vector<1x1x8xf32> to vector<1x8xf32>
    %92 = arith.mulf %77, %77 : vector<128x8xf32>
    %cst_55 = arith.constant dense<0.000000e+00> : vector<8xf32>
    %93 = vector.multi_reduction <add>, %92, %cst_55 [0] : vector<128x8xf32> to vector<8xf32>
    %94 = vector.shape_cast %93 : vector<8xf32> to vector<1x8xf32>
    %95 = arith.addf %91, %94 : vector<1x8xf32>
    %c0_56 = arith.constant 0 : index
    %c0_57 = arith.constant 0 : index
    %c0_58 = arith.constant 0 : index
    %96 = vector.load %arg6[%c0_56, %c0_57, %c0_58] : memref<1x1x8xf32, #tpu.memory_space<vmem>>, vector<1x1x8xf32>
    %97 = vector.shape_cast %96 : vector<1x1x8xf32> to vector<1x8xf32>
    %98 = vector.shape_cast %95 : vector<1x8xf32> to vector<1x1x8xf32>
    tpu.vector_store %arg6[%c0_56, %c0_57, %c0_58], %98 {strides = array<i32>} : memref<1x1x8xf32, #tpu.memory_space<vmem>>, vector<1x1x8xf32>,
    return
  }
  func.func @transform_0(%arg0: i32, %arg1: i32) -> (i32, i32, i32, i32) {
    %c0_i32 = arith.constant 0 : i32
    %c0_i32_0 = arith.constant 0 : i32
    %c0_i32_1 = arith.constant 0 : i32
    %c0_i32_2 = arith.constant 0 : i32
    return %arg0, %c0_i32, %c0_i32_0, %c0_i32_1 : i32, i32, i32, i32
  }
  func.func @transform_1(%arg0: i32, %arg1: i32) -> (i32, i32) {
    %c0_i32 = arith.constant 0 : i32
    %c0_i32_0 = arith.constant 0 : i32
    %c0_i32_1 = arith.constant 0 : i32
    return %c0_i32, %c0_i32_0 : i32, i32
  }
  func.func @transform_2(%arg0: i32, %arg1: i32) -> (i32, i32, i32) {
    %c0_i32 = arith.constant 0 : i32
    %c0_i32_0 = arith.constant 0 : i32
    return %arg0, %arg1, %c0_i32 : i32, i32, i32
  }
  func.func @transform_3(%arg0: i32, %arg1: i32) -> (i32, i32, i32) {
    %c0_i32 = arith.constant 0 : i32
    %c0_i32_0 = arith.constant 0 : i32
    %c0_i32_1 = arith.constant 0 : i32
    return %arg0, %c0_i32, %c0_i32_0 : i32, i32, i32
  }
  func.func @transform_4(%arg0: i32, %arg1: i32) -> (i32, i32, i32) {
    %c0_i32 = arith.constant 0 : i32
    %c0_i32_0 = arith.constant 0 : i32
    %c0_i32_1 = arith.constant 0 : i32
    return %arg0, %c0_i32, %c0_i32_0 : i32, i32, i32
  }
}

module attributes {stable_mosaic.version = 11 : i64} {
  func.func @_bn_kernel(%arg0: i32, %arg1: i32, %arg2: memref<1x128xf32, #tpu.memory_space<vmem>>, %arg3: memref<1x128xf32, #tpu.memory_space<vmem>>, %arg4: memref<1x16x128xbf16, #tpu.memory_space<vmem>>, %arg5: memref<1x16x128xbf16, #tpu.memory_space<vmem>>, %arg6: memref<1x16x128xf32, #tpu.memory_space<vmem>>) attributes {dimension_semantics = [#tpu.dimension_semantics<parallel>, #tpu.dimension_semantics<parallel>], iteration_bounds = array<i64: 2, 1>, scalar_prefetch = 0 : i64, scratch_operands = 0 : i64, tpu.core_type = #tpu.core_type<tc>, window_params = [{pipeline_mode = #tpu.pipeline_mode<synchronous>, transform_indices = @transform_0, window_bounds = array<i64: 1, 128>}, {pipeline_mode = #tpu.pipeline_mode<synchronous>, transform_indices = @transform_1, window_bounds = array<i64: 1, 128>}, {transform_indices = @transform_2, window_bounds = array<i64: 1, 16, 128>}, {transform_indices = @transform_3, window_bounds = array<i64: 1, 16, 128>}, {transform_indices = @transform_4, window_bounds = array<i64: 1, 16, 128>}]} {
    %c0 = arith.constant 0 : index
    %c0_0 = arith.constant 0 : index
    %c0_1 = arith.constant 0 : index
    %0 = vector.load %arg4[%c0, %c0_0, %c0_1] : memref<1x16x128xbf16, #tpu.memory_space<vmem>>, vector<1x16x128xbf16>
    %1 = vector.shape_cast %0 : vector<1x16x128xbf16> to vector<16x128xbf16>
    %2 = arith.extf %1 : vector<16x128xbf16> to vector<16x128xf32>
    %c0_2 = arith.constant 0 : index
    %c0_3 = arith.constant 0 : index
    %3 = vector.load %arg2[%c0_2, %c0_3] : memref<1x128xf32, #tpu.memory_space<vmem>>, vector<1x128xf32>
    %4 = vector.broadcast %3 : vector<1x128xf32> to vector<16x128xf32>
    %5 = arith.mulf %2, %4 : vector<16x128xf32>
    %c0_4 = arith.constant 0 : index
    %c0_5 = arith.constant 0 : index
    %6 = vector.load %arg3[%c0_4, %c0_5] : memref<1x128xf32, #tpu.memory_space<vmem>>, vector<1x128xf32>
    %7 = vector.broadcast %6 : vector<1x128xf32> to vector<16x128xf32>
    %8 = arith.addf %5, %7 : vector<16x128xf32>
    %c0_6 = arith.constant 0 : index
    %c0_7 = arith.constant 0 : index
    %c0_8 = arith.constant 0 : index
    %9 = vector.load %arg5[%c0_6, %c0_7, %c0_8] : memref<1x16x128xbf16, #tpu.memory_space<vmem>>, vector<1x16x128xbf16>
    %10 = vector.shape_cast %9 : vector<1x16x128xbf16> to vector<16x128xbf16>
    %11 = arith.extf %10 : vector<16x128xbf16> to vector<16x128xf32>
    %12 = arith.addf %8, %11 : vector<16x128xf32>
    %cst = arith.constant 0.000000e+00 : f32
    %13 = vector.broadcast %cst : f32 to vector<16x128xf32>
    %14 = arith.maximumf %12, %13 : vector<16x128xf32>
    %c0_9 = arith.constant 0 : index
    %c0_10 = arith.constant 0 : index
    %c0_11 = arith.constant 0 : index
    %15 = vector.load %arg6[%c0_9, %c0_10, %c0_11] : memref<1x16x128xf32, #tpu.memory_space<vmem>>, vector<1x16x128xf32>
    %16 = vector.shape_cast %15 : vector<1x16x128xf32> to vector<16x128xf32>
    %17 = vector.shape_cast %14 : vector<16x128xf32> to vector<1x16x128xf32>
    tpu.vector_store %arg6[%c0_9, %c0_10, %c0_11], %17 {strides = array<i32>} : memref<1x16x128xf32, #tpu.memory_space<vmem>>, vector<1x16x128xf32>,
    return
  }
  func.func @transform_0(%arg0: i32, %arg1: i32) -> (i32, i32) {
    %c0_i32 = arith.constant 0 : i32
    %c0_i32_0 = arith.constant 0 : i32
    %c0_i32_1 = arith.constant 0 : i32
    return %c0_i32, %c0_i32_0 : i32, i32
  }
  func.func @transform_1(%arg0: i32, %arg1: i32) -> (i32, i32) {
    %c0_i32 = arith.constant 0 : i32
    %c0_i32_0 = arith.constant 0 : i32
    %c0_i32_1 = arith.constant 0 : i32
    return %c0_i32, %c0_i32_0 : i32, i32
  }
  func.func @transform_2(%arg0: i32, %arg1: i32) -> (i32, i32, i32) {
    %c0_i32 = arith.constant 0 : i32
    %c0_i32_0 = arith.constant 0 : i32
    return %arg0, %arg1, %c0_i32 : i32, i32, i32
  }
  func.func @transform_3(%arg0: i32, %arg1: i32) -> (i32, i32, i32) {
    %c0_i32 = arith.constant 0 : i32
    %c0_i32_0 = arith.constant 0 : i32
    return %arg0, %arg1, %c0_i32 : i32, i32, i32
  }
  func.func @transform_4(%arg0: i32, %arg1: i32) -> (i32, i32, i32) {
    %c0_i32 = arith.constant 0 : i32
    %c0_i32_0 = arith.constant 0 : i32
    return %arg0, %arg1, %c0_i32 : i32, i32, i32
  }
}

</mosaic_0001>

<bundles_post_ra>
// kernel: tile.33
= control target key start
LH: loop header
LB: loop body
LE: loop exit
PB: predicated region body
PF: predicated region fallthrough
CT: control target
= control target key end

     0   :  { %s28_s0 = inlined_call_operand.vmem [shape: f32[8], index: 0, kind: input, shape index: {}]   ;;  %s29_s1 = inlined_call_operand.vmem [shape: f32[16,8], index: 1, kind: output, shape index: {}]  }
   0x1   :  { %v4_v0 = vld [vmem:[%s28_s0] ss:$0 sm:$0xff] }
   0x2   :  { %5 = vst [vmem:[%s29_s1] sm:$0xff] %v4_v0  ;;  %8 = vst [vmem:[%s29_s1 + $0x8] sm:$0xff] %v4_v0 }

// kernel: tile.34
= control target key start
LH: loop header
LB: loop body
LE: loop exit
PB: predicated region body
PF: predicated region fallthrough
CT: control target
= control target key end

     0   :  { %s133_s10 = smov 120   ;;  %s134_s11 = smov 104   ;;  %vm3_vm0 = vcmask 64512   ;;  %vm9_vm1 = vcmask 1048512   ;;  %vm15_vm2 = vcmask 982912   ;;  %vm21_vm3 = vcmask 917312   ;;  %s209_s0 = inlined_call_operand.vmem [shape: f32[16,8], index: 0, kind: input, shape index: {}]   ;;  %s210_s1 = inlined_call_operand.vmem [shape: f32[1,128], index: 1, kind: output, shape index: {}]  }
   0x1   :  { %v103_v0 = vld [vmem:[%s209_s0 + $0xf] sm:$0x1]   ;;  %v105_v1 = vld [vmem:[%s209_s0 + $0xd] sm:$0x1]   ;;  %v104_v2 = vld [vmem:[%s209_s0 + $0xe] sm:$0x1]  }
   0x2   :  { %7 = vrot.lane.b32.xlu0 %v103_v0, %s133_s10  ;;  %19 = vrot.lane.b32.xlu1 %v105_v1, %s134_s11  ;;  %v106_v3 = vld [vmem:[%s209_s0 + $0xc] sm:$0x1]   ;;  %s135_s16 = smov 112   ;;  %s136_s17 = smov 96   ;;  %v107_v4 = vld [vmem:[%s209_s0 + $0xb] sm:$0x1]  }
   0x3   :  { %v108_v5 = vld [vmem:[%s209_s0 + $0xa] sm:$0x1]   ;;  %v2_v6 = vld [vmem:[%s209_s0] sm:$0x1]   ;;  %s137_s24 = smov 88   ;;  %s138_s25 = smov 80  }
   0x4   :  { %4 = vst.msk [vmem:[#allocation0] sm:$0x1] %vm3_vm0, %v2_v6   ;;  %v109_v7 = vld [vmem:[%s209_s0 + $0x9] sm:$0x1]   ;;  %v110_v8 = vld [vmem:[%s209_s0 + $0x8] sm:$0x1]  }
   0x5   :  { %s139_s30 = smov 72   ;;  %s140_s2 = smov 64   ;;  %v111_v9 = vld [vmem:[%s209_s0 + $0x7] sm:$0x1]   ;;  %v112_v10 = vld [vmem:[%s209_s0 + $0x6] sm:$0x1]  }
   0x6   :  { %13 = vrot.lane.b32.xlu0 %v104_v2, %s135_s16  ;;  %25 = vrot.lane.b32.xlu1 %v106_v3, %s136_s17  ;;  %s141_s7 = smov 56   ;;  %s142_s8 = smov 48   ;;  %v113_v11 = vld [vmem:[%s209_s0 + $0x5] sm:$0x1]   ;;  %v114_v12 = vld [vmem:[%s209_s0 + $0x4] sm:$0x1]  }
   0x7   :  { %s143_s13 = smov 40   ;;  %s144_s14 = smov 32   ;;  %v115_v13 = vld [vmem:[%s209_s0 + $0x3] sm:$0x1]   ;;  %v116_v14 = vld [vmem:[%s209_s0 + $0x2] sm:$0x1]  }
   0x8   :  { %s145_s19 = smov 24   ;;  %s146_s20 = smov 16   ;;  %v117_v15 = vld [vmem:[%s209_s0 + $0x1] sm:$0x1]   ;;  %vm27_vm4 = vcmask 851712   ;;  %vm33_vm5 = vcmask 786112  }
   0x9   :  { %s147_s0 = smov 8   ;;  %vm39_vm6 = vcmask 720512   ;;  %vm45_vm7 = vcmask 654912   ;;  %vm51_vm8 = vcmask 589312   ;;  %vm57_vm9 = vcmask 523712  }
   0xa   :  { %31 = vrot.lane.b32.xlu0 %v107_v4, %s137_s24  ;;  %37 = vrot.lane.b32.xlu1 %v108_v5, %s138_s25  ;;  %vm63_vm10 = vcmask 458112   ;;  %vm69_vm11 = vcmask 392512   ;;  %vm75_vm12 = vcmask 326912   ;;  %vm81_vm13 = vcmask 261312  }
   0xb   :  { %vm87_vm14 = vcmask 195712   ;;  %vm93_vm15 = vcmask 130112  }
   0xe   :  { %43 = vrot.lane.b32.xlu0 %v109_v7, %s139_s30  ;;  %49 = vrot.lane.b32.xlu1 %v110_v8, %s140_s2 }
  0x12   :  { %55 = vrot.lane.b32.xlu0 %v111_v9, %s141_s7  ;;  %61 = vrot.lane.b32.xlu1 %v112_v10, %s142_s8 }
  0x16   :  { %67 = vrot.lane.b32.xlu0 %v113_v11, %s143_s13  ;;  %73 = vrot.lane.b32.xlu1 %v114_v12, %s144_s14 }
  0x1a   :  { %79 = vrot.lane.b32.xlu0 %v115_v13, %s145_s19  ;;  %85 = vrot.lane.b32.xlu1 %v116_v14, %s146_s20 }
  0x1e   :  { %91 = vrot.lane.b32.xlu0 %v117_v15, %s147_s0 }
  0x74   :  { %v8_v16 = vpop.permute.xlu0 %7   ;;  %v20_v17 = vpop.permute.xlu1 %19  }
  0x75   :  { %10 = vst.msk [vmem:[#allocation0] sm:$0x1] %vm9_vm1, %v8_v16  }
  0x78   :  { %v14_v18 = vpop.permute.xlu0 %13   ;;  %v26_v19 = vpop.permute.xlu1 %25  }
  0x79   :  { %16 = vst.msk [vmem:[#allocation0] sm:$0x1] %vm15_vm2, %v14_v18  }
  0x7a   :  { %22 = vst.msk [vmem:[#allocation0] sm:$0x1] %vm21_vm3, %v20_v17  }
  0x7b   :  { %28 = vst.msk [vmem:[#allocation0] sm:$0x1] %vm27_vm4, %v26_v19  }
  0x7c   :  { %v32_v20 = vpop.permute.xlu0 %31   ;;  %v38_v21 = vpop.permute.xlu1 %37  }
  0x7d   :  { %34 = vst.msk [vmem:[#allocation0] sm:$0x1] %vm33_vm5, %v32_v20  }
  0x7e   :  { %40 = vst.msk [vmem:[#allocation0] sm:$0x1] %vm39_vm6, %v38_v21  }
  0x80   :  { %v44_v22 = vpop.permute.xlu0 %43   ;;  %v50_v23 = vpop.permute.xlu1 %49  }
  0x81   :  { %46 = vst.msk [vmem:[#allocation0] sm:$0x1] %vm45_vm7, %v44_v22  }
  0x82   :  { %52 = vst.msk [vmem:[#allocation0] sm:$0x1] %vm51_vm8, %v50_v23  }
  0x84   :  { %v56_v24 = vpop.permute.xlu0 %55   ;;  %v62_v25 = vpop.permute.xlu1 %61  }
  0x85   :  { %58 = vst.msk [vmem:[#allocation0] sm:$0x1] %vm57_vm9, %v56_v24  }
  0x86   :  { %64 = vst.msk [vmem:[#allocation0] sm:$0x1] %vm63_vm10, %v62_v25  }
  0x88   :  { %v68_v26 = vpop.permute.xlu0 %67   ;;  %v74_v27 = vpop.permute.xlu1 %73  }
  0x89   :  { %70 = vst.msk [vmem:[#allocation0] sm:$0x1] %vm69_vm11, %v68_v26  }
  0x8a   :  { %76 = vst.msk [vmem:[#allocation0] sm:$0x1] %vm75_vm12, %v74_v27  }
  0x8c   :  { %v80_v28 = vpop.permute.xlu0 %79   ;;  %v86_v29 = vpop.permute.xlu1 %85  }
  0x8d   :  { %82 = vst.msk [vmem:[#allocation0] sm:$0x1] %vm81_vm13, %v80_v28  }
  0x8e   :  { %88 = vst.msk [vmem:[#allocation0] sm:$0x1] %vm87_vm14, %v86_v29  }
  0x90   :  { %v92_v30 = vpop.permute.xlu0 %91  }
  0x91   :  { %94 = vst.msk [vmem:[#allocation0] sm:$0x1] %vm93_vm15, %v92_v30  }
  0x98   :  { %v99_v31 = vld [vmem:[#allocation0] sm:$0x1] }
  0x99   :  { %102 = vst [vmem:[%s210_s1] sm:$0x1] %v99_v31 }

// kernel: basic_block_forward.6
= control target key start
LH: loop header
LB: loop body
LE: loop exit
PB: predicated region body
PF: predicated region fallthrough
CT: control target
= control target key end

     0   :  { %s427_s12 = smov 0   ;;  %s429_s13 = smov 0   ;;  %s463_s0 = inlined_call_operand.vmem [shape: f32[1,128], index: 0, kind: input, shape index: {}]   ;;  %s464_s1 = inlined_call_operand.vmem [shape: f32[1,128], index: 1, kind: input, shape index: {}]   ;;  %s465_s2 = inlined_call_operand.vmem [shape: bf16[2,16,128], index: 2, kind: input, shape index: {}]   ;;  %s466_s3 = inlined_call_operand.vmem [shape: bf16[2,16,128], index: 3, kind: output, shape index: {}]  }
   0x1   :  { %s431_s14 = smov 0  }
   0x2 LB: > { %s25_s15 = sadd.s32 1, %s401_s13  ;;  %p335_p0 = scmp.ge.s32.totalorder %s405_s14, 1  ;;  %s405_s14 = sphi %s431_s14, %s13_s14   ;;  %s401_s13 = sphi %s429_s13, %s468_s13   ;;  %s397_s12 = sphi %s427_s12, %s467_s12  }
   0x3   : > { %p27_p1 = scmp.ge.s32.totalorder %s25_s15, 2  ;;  %p158_p2 = scmp.lt.s32.totalorder %s405_s14, 3 }
   0x5   : > { %s470_s15 = smov (%p27_p1, %s25_s15), 0  ;;  %p159_p3 = pnand %p335_p0, %p158_p2 }
   0x6   : > { %p191_p4 = scmp.lt.s32.totalorder (!%p159_p3), %s397_s12, 1 }
   0x7   : > { %162 = sbr.rel (%p159_p3) target bundleno = 27 (0x1b), region = 32 }
   0xc   : > { %s472_s12 = smov (!%p191_p4, %s397_s12), 1  ;;  %v340_v1 = vld [vmem:[%s463_s0] ss:$0 sm:$0xff] }
   0xd   : > { %s346_s16 = sshll.u32 %s472_s12, 3  ;;  %v341_v4 = vld [vmem:[%s464_s1] ss:$0 sm:$0xff] }
   0xe   : > { %s198_s19 = scalar_lea.vmem %s465_s2, %s346_s16  ;;  %s208_s26 = scalar_lea.vmem %s466_s3, %s346_s16 }
   0xf   : > { %v351_v0 = vld [vmem:[%s198_s19] sm:$0xff]  }
  0x10   : > { %v352_v2 = vunpack.c.l.bf16 %v351_v0  ;;  %v353_v3 = vunpack.c.h.bf16 %v351_v0 }
  0x12   : > { %v221_v5 = vmul.f32 %v352_v2, %v340_v1  ;;  %v222_v6 = vmul.f32 %v353_v3, %v340_v1 }
  0x14   : > { %v230_v7 = vadd.f32 %v341_v4, %v221_v5  ;;  %v231_v8 = vadd.f32 %v341_v4, %v222_v6 }
  0x16   : > { %v232_v9 = vmax.f32 %v230_v7, 0.0  ;;  %v233_v10 = vmax.f32 %v231_v8, 0.0 }
  0x18   : > { %v357_v11 = vpack.c.bf16 %v233_v10, %v232_v9 }
  0x1a   : > { %358 = vst [vmem:[%s208_s26] sm:$0xff] %v357_v11  }
  0x1b PF: > { %s13_s14 = sadd.s32 1, %s405_s14   ;;  %s467_s12 = smov %s401_s13 }
  0x1c   : > { %p10_p5 = scmp.ge.s32.totalorder %s13_s14, 4   ;;  %s468_s13 = smov %s470_s15 }
  0x1e   :  { %12 = sbr.rel (!%p10_p5) target bundleno = 2 (0x2), region = 62 }

// kernel: basic_block_forward.8
= control target key start
LH: loop header
LB: loop body
LE: loop exit
PB: predicated region body
PF: predicated region fallthrough
CT: control target
= control target key end

     0   :  { %s425_s12 = smov 0   ;;  %s427_s13 = smov 0   ;;  %s457_s0 = inlined_call_operand.vmem [shape: f32[1,128], index: 0, kind: input, shape index: {}]   ;;  %s458_s1 = inlined_call_operand.vmem [shape: f32[1,128], index: 1, kind: input, shape index: {}]   ;;  %s459_s2 = inlined_call_operand.vmem [shape: bf16[2,16,128], index: 2, kind: input, shape index: {}]   ;;  %s460_s3 = inlined_call_operand.vmem [shape: bf16[2,16,128], index: 3, kind: output, shape index: {}]  }
   0x1   :  { %s429_s14 = smov 0  }
   0x2 LB: > { %s25_s15 = sadd.s32 1, %s399_s13  ;;  %p333_p0 = scmp.ge.s32.totalorder %s403_s14, 1  ;;  %s403_s14 = sphi %s429_s14, %s13_s14   ;;  %s399_s13 = sphi %s427_s13, %s462_s13   ;;  %s395_s12 = sphi %s425_s12, %s461_s12  }
   0x3   : > { %p27_p1 = scmp.ge.s32.totalorder %s25_s15, 2  ;;  %p158_p2 = scmp.lt.s32.totalorder %s403_s14, 3 }
   0x5   : > { %s464_s15 = smov (%p27_p1, %s25_s15), 0  ;;  %p159_p3 = pnand %p333_p0, %p158_p2 }
   0x6   : > { %p191_p4 = scmp.lt.s32.totalorder (!%p159_p3), %s395_s12, 1 }
   0x7   : > { %162 = sbr.rel (%p159_p3) target bundleno = 25 (0x19), region = 32 }
   0xc   : > { %s466_s12 = smov (!%p191_p4, %s395_s12), 1  ;;  %v338_v1 = vld [vmem:[%s457_s0] ss:$0 sm:$0xff] }
   0xd   : > { %s344_s16 = sshll.u32 %s466_s12, 3  ;;  %v339_v4 = vld [vmem:[%s458_s1] ss:$0 sm:$0xff] }
   0xe   : > { %s198_s19 = scalar_lea.vmem %s459_s2, %s344_s16  ;;  %s208_s26 = scalar_lea.vmem %s460_s3, %s344_s16 }
   0xf   : > { %v349_v0 = vld [vmem:[%s198_s19] sm:$0xff]  }
  0x10   : > { %v350_v2 = vunpack.c.l.bf16 %v349_v0  ;;  %v351_v3 = vunpack.c.h.bf16 %v349_v0 }
  0x12   : > { %v221_v5 = vmul.f32 %v350_v2, %v338_v1  ;;  %v222_v6 = vmul.f32 %v351_v3, %v338_v1 }
  0x14   : > { %v230_v7 = vadd.f32 %v339_v4, %v221_v5  ;;  %v231_v8 = vadd.f32 %v339_v4, %v222_v6 }
  0x16   : > { %v355_v9 = vpack.c.bf16 %v231_v8, %v230_v7 }
  0x18   : > { %356 = vst [vmem:[%s208_s26] sm:$0xff] %v355_v9  }
  0x19 PF: > { %s13_s14 = sadd.s32 1, %s403_s14   ;;  %s461_s12 = smov %s399_s13 }
  0x1a   : > { %p10_p5 = scmp.ge.s32.totalorder %s13_s14, 4   ;;  %s462_s13 = smov %s464_s15 }
  0x1c   :  { %12 = sbr.rel (!%p10_p5) target bundleno = 2 (0x2), region = 62 }

// kernel: basic_block_forward.9
= control target key start
LH: loop header
LB: loop body
LE: loop exit
PB: predicated region body
PF: predicated region fallthrough
CT: control target
= control target key end

     0   :  { %s509_s15 = smov 0   ;;  %s511_s16 = smov 0   ;;  %s551_s0 = inlined_call_operand.vmem [shape: f32[1,128], index: 0, kind: input, shape index: {}]   ;;  %s552_s1 = inlined_call_operand.vmem [shape: f32[1,128], index: 1, kind: input, shape index: {}]   ;;  %s553_s2 = inlined_call_operand.vmem [shape: bf16[2,16,128], index: 2, kind: input, shape index: {}]   ;;  %s554_s3 = inlined_call_operand.vmem [shape: bf16[2,16,128], index: 3, kind: input, shape index: {}]   ;;  %s555_s4 = inlined_call_operand.vmem [shape: f32[2,16,128], index: 4, kind: output, shape index: {}]  }
   0x1   :  { %s513_s17 = smov 0  }
   0x2 LB: > { %s26_s18 = sadd.s32 1, %s478_s16  ;;  %p414_p0 = scmp.ge.s32.totalorder %s482_s17, 1  ;;  %s482_s17 = sphi %s513_s17, %s14_s17   ;;  %s478_s16 = sphi %s511_s16, %s557_s16   ;;  %s474_s15 = sphi %s509_s15, %s556_s15  }
   0x3   : > { %p28_p1 = scmp.ge.s32.totalorder %s26_s18, 2  ;;  %p200_p2 = scmp.lt.s32.totalorder %s482_s17, 3 }
   0x5   : > { %s559_s18 = smov (%p28_p1, %s26_s18), 0  ;;  %p201_p3 = pnand %p414_p0, %p200_p2 }
   0x6   : > { %p244_p4 = scmp.lt.s32.totalorder (!%p201_p3), %s474_s15, 1 }
   0x7   : > { %204 = sbr.rel (%p201_p3) target bundleno = 27 (0x1b), region = 36 }
   0xc   : > { %s561_s15 = smov (!%p244_p4, %s474_s15), 1  ;;  %v421_v1 = vld [vmem:[%s551_s0] ss:$0 sm:$0xff] }
   0xd   : > { %s425_s19 = sshll.u32 %s561_s15, 3  ;;  %v422_v5 = vld [vmem:[%s552_s1] ss:$0 sm:$0xff]  ;;  %s427_s30 = sshll.u32 %s561_s15, 4 }
   0xe   : > { %s251_s22 = scalar_lea.vmem %s553_s2, %s425_s19  ;;  %s261_s25 = scalar_lea.vmem %s554_s3, %s425_s19 }
   0xf   : > { %v429_v0 = vld [vmem:[%s251_s22] sm:$0xff]   ;;  %s271_s7 = scalar_lea.vmem %s555_s4, %s427_s30 }
  0x10   : > { %v433_v2 = vld [vmem:[%s261_s25] sm:$0xff]   ;;  %v430_v3 = vunpack.c.l.bf16 %v429_v0  ;;  %v431_v4 = vunpack.c.h.bf16 %v429_v0 }
  0x11   : > { %v434_v7 = vunpack.c.l.bf16 %v433_v2  ;;  %v435_v9 = vunpack.c.h.bf16 %v433_v2 }
  0x12   : > { %v284_v6 = vmul.f32 %v430_v3, %v421_v1  ;;  %v285_v8 = vmul.f32 %v431_v4, %v421_v1 }
  0x14   : > { %v293_v10 = vadd.f32 %v422_v5, %v284_v6  ;;  %v294_v11 = vadd.f32 %v422_v5, %v285_v8 }
  0x16   : > { %v299_v12 = vadd.f32 %v434_v7, %v293_v10  ;;  %v300_v13 = vadd.f32 %v435_v9, %v294_v11 }
  0x18   : > { %v301_v14 = vmax.f32 %v299_v12, 0.0  ;;  %v302_v15 = vmax.f32 %v300_v13, 0.0 }
  0x1a   : > { %303 = vst [vmem:[%s271_s7] sm:$0xff] %v301_v14  ;;  %304 = vst [vmem:[%s271_s7 + $0x8] sm:$0xff] %v302_v15 }
  0x1b PF: > { %s14_s17 = sadd.s32 1, %s482_s17   ;;  %s556_s15 = smov %s478_s16 }
  0x1c   : > { %p11_p5 = scmp.ge.s32.totalorder %s14_s17, 4   ;;  %s557_s16 = smov %s559_s18 }
  0x1e   :  { %13 = sbr.rel (!%p11_p5) target bundleno = 2 (0x2), region = 69 }

// kernel: basic_block_forward.7
= control target key start
LH: loop header
LB: loop body
LE: loop exit
PB: predicated region body
PF: predicated region fallthrough
CT: control target
= control target key end

     0   :  { %s2831_s15 = smov 0   ;;  %s2833_s16 = smov 0   ;;  %s3521_s0 = inlined_call_operand.vmem [shape: bf16[2,16,16,8], index: 0, kind: input, shape index: {}]   ;;  %s3522_s1 = inlined_call_operand.vmem [shape: bf16[72,8], index: 1, kind: input, shape index: {}]   ;;  %s3523_s2 = inlined_call_operand.vmem [shape: bf16[2,256,8], index: 2, kind: output, shape index: {0}]   ;;  %s3524_s3 = inlined_call_operand.vmem [shape: f32[2,1,8], index: 3, kind: output, shape index: {1}]   ;;  %s3525_s4 = inlined_call_operand.vmem [shape: f32[2,1,8], index: 4, kind: output, shape index: {2}]  }
   0x1   :  { %s2835_s17 = smov 0   ;;  %s2837_s18 = smov 0  }
   0x2   :  { %s2839_s19 = smov 0  }
   0x3 LB: > { %s24_s20 = sadd.s32 1, %s2795_s17  ;;  %s27_s21 = sadd.s32 1, %s2799_s18  ;;  %s2803_s19 = sphi %s2839_s19, %s15_s19   ;;  %s2799_s18 = sphi %s2837_s18, %s3563_s18   ;;  %s2795_s17 = sphi %s2835_s17, %s3562_s17   ;;  %s2791_s16 = sphi %s2833_s16, %s3561_s16   ;;  %s2787_s15 = sphi %s2831_s15, %s3560_s15  }
   0x4   : > { %p25_p0 = scmp.ge.s32.totalorder %s24_s20, 2  ;;  %p2174_p1 = scmp.ge.s32.totalorder %s2803_s19, 1 }
   0x5   : > { %p181_p2 = scmp.lt.s32.totalorder %s2803_s19, 5 }
   0x6   : > { %s3565_s20 = smov (%p25_p0, %s24_s20), 0  ;;  %s3567_s21 = smov (!%p25_p0, %s27_s21), %s2799_s18 }
   0x7   : > { %p182_p3 = pnand %p2174_p1, %p181_p2  ;;  %p29_p4 = scmp.ge.s32.totalorder %s3567_s21, 2 }
   0x9   : > { %s3569_s21 = smov (%p29_p4, %s3567_s21), 0  ;;  %185 = sbr.rel (%p182_p3) target bundleno = 439 (0x1b7), region = 28 }
   0xe   : > { %p217_p5 = scmp.lt.s32.totalorder %s2791_s16, 1  ;;  %s2177_s22 = sshll.u32 %s2787_s15, 4 }
   0xf   : > { %p225_p6 = scmp.lt.s32.totalorder %s2177_s22, 31  ;;  %p2180_p7 = scmp.ne.s32.totalorder %s2787_s15, 0 }
  0x10   : > { %s3571_s16 = smov (!%p217_p5, %s2791_s16), 1 }
  0x11   : > { %s3573_s22 = smov (!%p225_p6, %s2177_s22), 31  ;;  %s2373_s23 = sshll.u32 %s3571_s16, 7 }
  0x12   : > { %s2178_s24 = sshll.u32 %s3571_s16, 5  ;;  %s2867_s27 = scalar_lea.vmem %s3521_s0, %s2373_s23 }
  0x13   : > { %s228_s28 = sadd.s32 %s2178_s24, %s3573_s22  ;;  %s2872_s6 = scalar_lea.vmem %s3524_s3, %s3571_s16 }
  0x14   : > { %s2179_s29 = sshll.u32 %s228_s28, 2  ;;  %s2882_s12 = scalar_lea.vmem %s3525_s4, %s3571_s16 }
  0x15   : > { %s2877_s9 = scalar_lea.vmem %s3523_s2, %s2179_s29  ;;  %242 = sbr.rel (%p2180_p7) target bundleno = 63 (0x3f), region = 32 }
  0x1a   : > { %vm243_vm0 = vcmask 64512   ;;  %vm246_vm1 = vcmask 58368   ;;  %vm253_vm2 = vcmask 57344   ;;  %v2391_v0 = vld [vmem:[%s2867_s27] sm:$0xff]   ;;  %v2454_v1 = vld [vmem:[%s2867_s27 + $0x8] sm:$0xff]   ;;  %v2805_v2 = vmov 0.0  }
  0x1b   : > { %244 = vst.msk [vmem:[#allocation2] sm:$0xff] %vm243_vm0, %v2805_v2  ;;  %245 = vst.msk [vmem:[#allocation2 + $0x8] sm:$0xff] %vm243_vm0, %v2805_v2  ;;  %v2392_v3 = vunpack.c.l.bf16 %v2391_v0  ;;  %v2393_v4 = vunpack.c.h.bf16 %v2391_v0  ;;  %v2396_v5 = vunpack.c.l.bf16 %v2454_v1  ;;  %v2397_v6 = vunpack.c.h.bf16 %v2454_v1  ;;  %v2455_v7 = vld [vmem:[%s2867_s27 + $0x10] sm:$0xff]   ;;  %v2456_v8 = vld [vmem:[%s2867_s27 + $0x18] sm:$0xff]  }
  0x1c   : > { %249 = vst.msk [vmem:[#allocation2 + $0x198] sm:$0xff] %vm243_vm0, %v2805_v2  ;;  %250 = vst.msk [vmem:[#allocation2 + $0x1a0] sm:$0xff] %vm243_vm0, %v2805_v2  ;;  %v2457_v9 = vld [vmem:[%s2867_s27 + $0x20] sm:$0xff]   ;;  %v2400_v10 = vunpack.c.l.bf16 %v2455_v7  ;;  %v2401_v11 = vunpack.c.h.bf16 %v2455_v7  ;;  %v2404_v12 = vunpack.c.l.bf16 %v2456_v8  ;;  %v2405_v13 = vunpack.c.h.bf16 %v2456_v8  ;;  %v2458_v14 = vld [vmem:[%s2867_s27 + $0x28] sm:$0xff]  }
  0x1d   : > { %247 = vst.msk [vmem:[#allocation2 + $0x10] sm:$0x3] %vm246_vm1, %v2805_v2  ;;  %251 = vst.msk [vmem:[#allocation2 + $0x1a8] sm:$0x3] %vm246_vm1, %v2805_v2  ;;  %v2459_v15 = vld [vmem:[%s2867_s27 + $0x30] sm:$0xff]   ;;  %v2460_v16 = vld [vmem:[%s2867_s27 + $0x38] sm:$0xff]   ;;  %v2408_v17 = vunpack.c.l.bf16 %v2457_v9  ;;  %v2409_v18 = vunpack.c.h.bf16 %v2457_v9  ;;  %v2412_v19 = vunpack.c.l.bf16 %v2458_v14  ;;  %v2413_v20 = vunpack.c.h.bf16 %v2458_v14 }
  0x1e   : > { %254 = vst.msk [vmem:[#allocation2 + $0x18] sm:$0x1] %vm253_vm2, %v2805_v2  ;;  %255 = vst.msk [vmem:[#allocation2 + $0x30] sm:$0x1] %vm253_vm2, %v2805_v2  ;;  %v2461_v21 = vld [vmem:[%s2867_s27 + $0x40] sm:$0xff]   ;;  %v2462_v22 = vld [vmem:[%s2867_s27 + $0x48] sm:$0xff]   ;;  %v2416_v24 = vunpack.c.l.bf16 %v2459_v15  ;;  %v2417_v25 = vunpack.c.h.bf16 %v2459_v15  ;;  %v2420_v26 = vunpack.c.l.bf16 %v2460_v16  ;;  %v2421_v27 = vunpack.c.h.bf16 %v2460_v16 }
  0x1f   : > { %256 = vst.msk [vmem:[#allocation2 + $0x48] sm:$0x1] %vm253_vm2, %v2805_v2  ;;  %257 = vst.msk [vmem:[#allocation2 + $0x60] sm:$0x1] %vm253_vm2, %v2805_v2  ;;  %v2463_v23 = vld [vmem:[%s2867_s27 + $0x50] sm:$0xff]   ;;  %v2464_v28 = vld [vmem:[%s2867_s27 + $0x58] sm:$0xff]   ;;  %v2424_v31 = vunpack.c.l.bf16 %v2461_v21  ;;  %v2425_v32 = vunpack.c.h.bf16 %v2461_v21  ;;  %v2428_v33 = vunpack.c.l.bf16 %v2462_v22  ;;  %v2429_v34 = vunpack.c.h.bf16 %v2462_v22 }
  0x20   : > { %258 = vst.msk [vmem:[#allocation2 + $0x78] sm:$0x1] %vm253_vm2, %v2805_v2  ;;  %259 = vst.msk [vmem:[#allocation2 + $0x90] sm:$0x1] %vm253_vm2, %v2805_v2  ;;  %v2465_v29 = vld [vmem:[%s2867_s27 + $0x60] sm:$0xff]   ;;  %v2466_v30 = vld [vmem:[%s2867_s27 + $0x68] sm:$0xff]   ;;  %v2432_v37 = vunpack.c.l.bf16 %v2463_v23  ;;  %v2433_v38 = vunpack.c.h.bf16 %v2463_v23  ;;  %v2436_v39 = vunpack.c.l.bf16 %v2464_v28  ;;  %v2437_v40 = vunpack.c.h.bf16 %v2464_v28 }
  0x21   : > { %260 = vst.msk [vmem:[#allocation2 + $0xa8] sm:$0x1] %vm253_vm2, %v2805_v2  ;;  %261 = vst.msk [vmem:[#allocation2 + $0xc0] sm:$0x1] %vm253_vm2, %v2805_v2  ;;  %v2467_v35 = vld [vmem:[%s2867_s27 + $0x70] sm:$0xff]   ;;  %v2468_v36 = vld [vmem:[%s2867_s27 + $0x78] sm:$0xff]   ;;  %v2440_v41 = vunpack.c.l.bf16 %v2465_v29  ;;  %v2441_v42 = vunpack.c.h.bf16 %v2465_v29  ;;  %v2444_v43 = vunpack.c.l.bf16 %v2466_v30  ;;  %v2445_v44 = vunpack.c.h.bf16 %v2466_v30 }
  0x22   : > { %262 = vst.msk [vmem:[#allocation2 + $0xd8] sm:$0x1] %vm253_vm2, %v2805_v2  ;;  %263 = vst.msk [vmem:[#allocation2 + $0xf0] sm:$0x1] %vm253_vm2, %v2805_v2  ;;  %v2448_v45 = vunpack.c.l.bf16 %v2467_v35  ;;  %v2449_v46 = vunpack.c.h.bf16 %v2467_v35  ;;  %v2452_v47 = vunpack.c.l.bf16 %v2468_v36  ;;  %v2453_v48 = vunpack.c.h.bf16 %v2468_v36 }
  0x23   : > { %264 = vst.msk [vmem:[#allocation2 + $0x108] sm:$0x1] %vm253_vm2, %v2805_v2  ;;  %265 = vst.msk [vmem:[#allocation2 + $0x120] sm:$0x1] %vm253_vm2, %v2805_v2 }
  0x24   : > { %266 = vst.msk [vmem:[#allocation2 + $0x138] sm:$0x1] %vm253_vm2, %v2805_v2  ;;  %267 = vst.msk [vmem:[#allocation2 + $0x150] sm:$0x1] %vm253_vm2, %v2805_v2 }
  0x25   : > { %268 = vst.msk [vmem:[#allocation2 + $0x168] sm:$0x1] %vm253_vm2, %v2805_v2  ;;  %269 = vst.msk [vmem:[#allocation2 + $0x180] sm:$0x1] %vm253_vm2, %v2805_v2 }
  0x26   : > { %270 = vst.msk [vmem:[#allocation2 + $0x29] sm:$0x1] %vm253_vm2, %v2805_v2  ;;  %271 = vst.msk [vmem:[#allocation2 + $0x41] sm:$0x1] %vm253_vm2, %v2805_v2 }
  0x27   : > { %272 = vst.msk [vmem:[#allocation2 + $0x59] sm:$0x1] %vm253_vm2, %v2805_v2  ;;  %273 = vst.msk [vmem:[#allocation2 + $0x71] sm:$0x1] %vm253_vm2, %v2805_v2 }
  0x28   : > { %274 = vst.msk [vmem:[#allocation2 + $0x89] sm:$0x1] %vm253_vm2, %v2805_v2  ;;  %275 = vst.msk [vmem:[#allocation2 + $0xa1] sm:$0x1] %vm253_vm2, %v2805_v2 }
  0x29   : > { %276 = vst.msk [vmem:[#allocation2 + $0xb9] sm:$0x1] %vm253_vm2, %v2805_v2  ;;  %277 = vst.msk [vmem:[#allocation2 + $0xd1] sm:$0x1] %vm253_vm2, %v2805_v2 }
  0x2a   : > { %278 = vst.msk [vmem:[#allocation2 + $0xe9] sm:$0x1] %vm253_vm2, %v2805_v2  ;;  %279 = vst.msk [vmem:[#allocation2 + $0x101] sm:$0x1] %vm253_vm2, %v2805_v2 }
  0x2b   : > { %280 = vst.msk [vmem:[#allocation2 + $0x119] sm:$0x1] %vm253_vm2, %v2805_v2  ;;  %281 = vst.msk [vmem:[#allocation2 + $0x131] sm:$0x1] %vm253_vm2, %v2805_v2 }
  0x2c   : > { %282 = vst.msk [vmem:[#allocation2 + $0x149] sm:$0x1] %vm253_vm2, %v2805_v2  ;;  %283 = vst.msk [vmem:[#allocation2 + $0x161] sm:$0x1] %vm253_vm2, %v2805_v2 }
  0x2d   : > { %284 = vst.msk [vmem:[#allocation2 + $0x179] sm:$0x1] %vm253_vm2, %v2805_v2  ;;  %285 = vst.msk [vmem:[#allocation2 + $0x191] sm:$0x1] %vm253_vm2, %v2805_v2 }
  0x2e   : > { %382 = vst.msk [vmem:[%s2872_s6] sm:$0x1] %vm253_vm2, %v2805_v2  ;;  %383 = vst.msk [vmem:[%s2882_s12] sm:$0x1] %vm253_vm2, %v2805_v2 }
  0x2f   : > { %350 = vst.msk [vmem:[#allocation2 + $0x19] sm:$0xff] %vm243_vm0, %v2392_v3  ;;  %351 = vst.msk [vmem:[#allocation2 + $0x21] sm:$0xff] %vm243_vm0, %v2393_v4 }
  0x30   : > { %352 = vst.msk [vmem:[#allocation2 + $0x31] sm:$0xff] %vm243_vm0, %v2396_v5  ;;  %353 = vst.msk [vmem:[#allocation2 + $0x39] sm:$0xff] %vm243_vm0, %v2397_v6 }
  0x31   : > { %354 = vst.msk [vmem:[#allocation2 + $0x49] sm:$0xff] %vm243_vm0, %v2400_v10  ;;  %355 = vst.msk [vmem:[#allocation2 + $0x51] sm:$0xff] %vm243_vm0, %v2401_v11 }
  0x32   : > { %356 = vst.msk [vmem:[#allocation2 + $0x61] sm:$0xff] %vm243_vm0, %v2404_v12  ;;  %357 = vst.msk [vmem:[#allocation2 + $0x69] sm:$0xff] %vm243_vm0, %v2405_v13 }
  0x33   : > { %358 = vst.msk [vmem:[#allocation2 + $0x79] sm:$0xff] %vm243_vm0, %v2408_v17  ;;  %359 = vst.msk [vmem:[#allocation2 + $0x81] sm:$0xff] %vm243_vm0, %v2409_v18 }
  0x34   : > { %360 = vst.msk [vmem:[#allocation2 + $0x91] sm:$0xff] %vm243_vm0, %v2412_v19  ;;  %361 = vst.msk [vmem:[#allocation2 + $0x99] sm:$0xff] %vm243_vm0, %v2413_v20 }
  0x35   : > { %362 = vst.msk [vmem:[#allocation2 + $0xa9] sm:$0xff] %vm243_vm0, %v2416_v24  ;;  %363 = vst.msk [vmem:[#allocation2 + $0xb1] sm:$0xff] %vm243_vm0, %v2417_v25 }
  0x36   : > { %364 = vst.msk [vmem:[#allocation2 + $0xc1] sm:$0xff] %vm243_vm0, %v2420_v26  ;;  %365 = vst.msk [vmem:[#allocation2 + $0xc9] sm:$0xff] %vm243_vm0, %v2421_v27 }
  0x37   : > { %366 = vst.msk [vmem:[#allocation2 + $0xd9] sm:$0xff] %vm243_vm0, %v2424_v31  ;;  %367 = vst.msk [vmem:[#allocation2 + $0xe1] sm:$0xff] %vm243_vm0, %v2425_v32 }
  0x38   : > { %368 = vst.msk [vmem:[#allocation2 + $0xf1] sm:$0xff] %vm243_vm0, %v2428_v33  ;;  %369 = vst.msk [vmem:[#allocation2 + $0xf9] sm:$0xff] %vm243_vm0, %v2429_v34 }
  0x39   : > { %370 = vst.msk [vmem:[#allocation2 + $0x109] sm:$0xff] %vm243_vm0, %v2432_v37  ;;  %371 = vst.msk [vmem:[#allocation2 + $0x111] sm:$0xff] %vm243_vm0, %v2433_v38 }
  0x3a   : > { %372 = vst.msk [vmem:[#allocation2 + $0x121] sm:$0xff] %vm243_vm0, %v2436_v39  ;;  %373 = vst.msk [vmem:[#allocation2 + $0x129] sm:$0xff] %vm243_vm0, %v2437_v40 }
  0x3b   : > { %374 = vst.msk [vmem:[#allocation2 + $0x139] sm:$0xff] %vm243_vm0, %v2440_v41  ;;  %375 = vst.msk [vmem:[#allocation2 + $0x141] sm:$0xff] %vm243_vm0, %v2441_v42 }
  0x3c   : > { %376 = vst.msk [vmem:[#allocation2 + $0x151] sm:$0xff] %vm243_vm0, %v2444_v43  ;;  %377 = vst.msk [vmem:[#allocation2 + $0x159] sm:$0xff] %vm243_vm0, %v2445_v44 }
  0x3d   : > { %378 = vst.msk [vmem:[#allocation2 + $0x169] sm:$0xff] %vm243_vm0, %v2448_v45  ;;  %379 = vst.msk [vmem:[#allocation2 + $0x171] sm:$0xff] %vm243_vm0, %v2449_v46 }
  0x3e   : > { %380 = vst.msk [vmem:[#allocation2 + $0x181] sm:$0xff] %vm243_vm0, %v2452_v47  ;;  %381 = vst.msk [vmem:[#allocation2 + $0x189] sm:$0xff] %vm243_vm0, %v2453_v48 }
  0x3f PF: > { %v428_v49 = vld [vmem:[%s3522_s1 + $0x4] sm:$0xf]  ;;  %vm462_vm3 = vcmask 1043456   ;;  %s2182_s16 = smul.u32 192, %s2787_s15  ;;  %v403_v51 = vld [vmem:[%s3522_s1] sm:$0xf] }
  0x40   : > { %2715 = vmatprep.subr.msk.bf16.mxu1 %vm462_vm3, %v428_v49  ;;  %2714 = vmatprep.subr.msk.bf16.mxu0 %vm462_vm3, %v428_v49  ;;  %v464_v50 = vsel %vm462_vm3, %v428_v49, 0  ;;  %v703_v52 = vld [vmem:[%s3522_s1 + $0x8] sm:$0xf]  ;;  %vm437_vm4 = vcmask 64512   ;;  %v588_v3 = vsel %vm462_vm3, %v403_v51, 0  ;;  %vm1912_vm5 = vcmask 60416  }
  0x41   : > { %2713 = vmatpush3.bf16.msra.mxu1 %v464_v50  ;;  %2551 = vmatpush3.bf16.msra.mxu0 %v464_v50  ;;  %s2986_s26 = scalar_lea.vmem [#allocation2], %s2182_s16  ;;  %v737_v0 = vsel %vm462_vm3, %v703_v52, 0  ;;  %v871_v9 = vld [vmem:[%s3522_s1 + $0xc] sm:$0xf]  ;;  %v1036_v19 = vld [vmem:[%s3522_s1 + $0x10] sm:$0xf] }
  0x42   : > { %2716 = vmatprep.subr.msk.bf16.mxu1 %vm462_vm3, %v403_v51  ;;  %2717 = vmatprep.subr.msk.bf16.mxu0 %vm462_vm3, %v703_v52  ;;  %v1070_v33 = vsel %vm462_vm3, %v1036_v19, 0  ;;  %v905_v35 = vsel %vm462_vm3, %v871_v9, 0  ;;  %v1201_v38 = vld [vmem:[%s3522_s1 + $0x14] sm:$0xf]  ;;  %v1369_v41 = vld [vmem:[%s3522_s1 + $0x18] sm:$0xf] }
  0x43   : > { %vm1968_vm6 = vcmask 57344  }
  0x45   : > { %v412_v53 = vld [vmem:[%s2986_s26 + $0x1] sm:$0xff]  ;;  %v413_v54 = vld [vmem:[%s2986_s26 + $0x9] sm:$0xff]  ;;  %v414_v58 = vld [vmem:[%s2986_s26 + $0x19] sm:$0xff] }
  0x46   : > { %v420_v55 = vld [vmem:[%s2986_s26 + $0x61] sm:$0xff]  ;;  %v429_v56 = vpack.c.bf16 %v413_v54, %v412_v53  ;;  %v421_v57 = vld [vmem:[%s2986_s26 + $0x69] sm:$0xff]  ;;  %v422_v62 = vld [vmem:[%s2986_s26 + $0x79] sm:$0xff] }
  0x47   : > { %v415_v59 = vld [vmem:[%s2986_s26 + $0x21] sm:$0xff]  ;;  %v2996_v60 = vpack.c.bf16 %v421_v57, %v420_v55  ;;  %v416_v1 = vld [vmem:[%s2986_s26 + $0x31] sm:$0xff]  ;;  %v417_v4 = vld [vmem:[%s2986_s26 + $0x39] sm:$0xff] }
  0x48   : > { %v2998_v61 = vpack.c.bf16 %v415_v59, %v414_v58  ;;  %v423_v63 = vld [vmem:[%s2986_s26 + $0x81] sm:$0xff]  ;;  %2552 = vmatprep.mubr.msk.bf16.mxu0 %vm437_vm4, %v429_v56  ;;  %v424_v5 = vld [vmem:[%s2986_s26 + $0x91] sm:$0xff]  ;;  %v425_v6 = vld [vmem:[%s2986_s26 + $0x99] sm:$0xff]  ;;  %v3015_v7 = vpack.c.bf16 %v417_v4, %v416_v1 }
  0x49   : > { %v3005_v2 = vpack.c.bf16 %v423_v63, %v422_v62  ;;  %2560 = vmatprep.mubr.msk.bf16.mxu1 %vm437_vm4, %v2996_v60  ;;  %v3017_v8 = vpack.c.bf16 %v425_v6, %v424_v5  ;;  %v418_v10 = vld [vmem:[%s2986_s26 + $0x49] sm:$0xff]  ;;  %v419_v11 = vld [vmem:[%s2986_s26 + $0x51] sm:$0xff]  ;;  %v387_v16 = vld [vmem:[%s2986_s26] sm:$0xff] }
  0x4a   : > { %2553 = vmatmul.mubr.msk.bf16.vlgmr.msra.gmra.mxu0 %vm437_vm4, %v2998_v61  ;;  %v426_v12 = vld [vmem:[%s2986_s26 + $0xa9] sm:$0xff]  ;;  %v427_v13 = vld [vmem:[%s2986_s26 + $0xb1] sm:$0xff]  ;;  %v3037_v18 = vpack.c.bf16 %v419_v11, %v418_v10  ;;  %v689_v23 = vld [vmem:[%s2986_s26 + $0x1a] sm:$0xff]  ;;  %v1403_v10 = vsel %vm462_vm3, %v1369_v41, 0  ;;  %v1235_v11 = vsel %vm462_vm3, %v1201_v38, 0 }
  0x4b   : > { %2561 = vmatmul.mubr.msk.bf16.vlgmr.msra.gmra.mxu1 %vm437_vm4, %v3005_v2  ;;  %2587 = vmatpush3.bf16.msra.mxu0 %v737_v0  ;;  %v687_v14 = vld [vmem:[%s2986_s26 + $0x2] sm:$0xff]  ;;  %v688_v15 = vld [vmem:[%s2986_s26 + $0xa] sm:$0xff]  ;;  %v3042_v20 = vpack.c.bf16 %v427_v13, %v426_v12  ;;  %v389_v25 = vld [vmem:[%s2986_s26 + $0x18] sm:$0xff] }
  0x4c   : > { %2569 = vmatpush3.bf16.msra.mxu1 %v588_v3  ;;  %2556 = vmatprep.mubr.msk.bf16.mxu0 %vm437_vm4, %v3015_v7  ;;  %v388_v17 = vld [vmem:[%s2986_s26 + $0x8] sm:$0xff]  ;;  %v704_v21 = vpack.c.bf16 %v688_v15, %v687_v14  ;;  %v390_v26 = vld [vmem:[%s2986_s26 + $0x20] sm:$0xff]  ;;  %v391_v27 = vld [vmem:[%s2986_s26 + $0x30] sm:$0xff] }
  0x4d   : > { %2564 = vmatprep.mubr.msk.bf16.mxu1 %vm437_vm4, %v3017_v8  ;;  %2718 = vmatprep.subr.msk.bf16.mxu1 %vm462_vm3, %v871_v9  ;;  %v404_v22 = vpack.c.bf16 %v388_v17, %v387_v16  ;;  %v690_v24 = vld [vmem:[%s2986_s26 + $0x22] sm:$0xff]  ;;  %v392_v28 = vld [vmem:[%s2986_s26 + $0x38] sm:$0xff]  ;;  %v405_v32 = vpack.c.bf16 %v390_v26, %v389_v25  ;;  %v693_v39 = vld [vmem:[%s2986_s26 + $0x4a] sm:$0xff] }
  0x4e   : > { %2719 = vmatprep.subr.msk.bf16.mxu0 %vm462_vm3, %v1036_v19  ;;  %v3057_v29 = vpack.c.bf16 %v690_v24, %v689_v23  ;;  %v691_v30 = vld [vmem:[%s2986_s26 + $0x32] sm:$0xff]  ;;  %v692_v31 = vld [vmem:[%s2986_s26 + $0x3a] sm:$0xff]  ;;  %v3062_v34 = vpack.c.bf16 %v392_v28, %v391_v27  ;;  %v393_v37 = vld [vmem:[%s2986_s26 + $0x48] sm:$0xff] }
  0x4f   : > { %v3065_v36 = vpack.c.bf16 %v692_v31, %v691_v30  ;;  %v694_v40 = vld [vmem:[%s2986_s26 + $0x52] sm:$0xff]  ;;  %v695_v43 = vld [vmem:[%s2986_s26 + $0x62] sm:$0xff]  ;;  %v696_v44 = vld [vmem:[%s2986_s26 + $0x6a] sm:$0xff] }
  0x50   : > { %v394_v42 = vld [vmem:[%s2986_s26 + $0x50] sm:$0xff]  ;;  %v395_v45 = vld [vmem:[%s2986_s26 + $0x60] sm:$0xff]  ;;  %v396_v46 = vld [vmem:[%s2986_s26 + $0x68] sm:$0xff]  ;;  %v3089_v47 = vpack.c.bf16 %v694_v40, %v693_v39  ;;  %v3094_v49 = vpack.c.bf16 %v696_v44, %v695_v43 }
  0x51   : > { %v3092_v48 = vpack.c.bf16 %v394_v42, %v393_v37  ;;  %v3096_v50 = vpack.c.bf16 %v396_v46, %v395_v45  ;;  %v397_v51 = vld [vmem:[%s2986_s26 + $0x78] sm:$0xff]  ;;  %v698_v53 = vld [vmem:[%s2986_s26 + $0x82] sm:$0xff]  ;;  %v399_v57 = vld [vmem:[%s2986_s26 + $0x90] sm:$0xff] }
  0x52   : > { %2557 = vmatmul.mubr.msk.bf16.gmra.mxu0 %vm437_vm4, %v3037_v18  ;;  %v697_v52 = vld [vmem:[%s2986_s26 + $0x7a] sm:$0xff]  ;;  %v699_v55 = vld [vmem:[%s2986_s26 + $0x92] sm:$0xff]  ;;  %v701_v1 = vld [vmem:[%s2986_s26 + $0xaa] sm:$0xff] }
  0x53   : > { %2565 = vmatmul.mubr.msk.bf16.gmra.mxu1 %vm437_vm4, %v3042_v20  ;;  %2588 = vmatprep.mubr.msk.bf16.mxu0 %vm437_vm4, %v704_v21  ;;  %v398_v54 = vld [vmem:[%s2986_s26 + $0x80] sm:$0xff]  ;;  %v400_v58 = vld [vmem:[%s2986_s26 + $0x98] sm:$0xff]  ;;  %v3114_v59 = vpack.c.bf16 %v698_v53, %v697_v52  ;;  %v401_v4 = vld [vmem:[%s2986_s26 + $0xa8] sm:$0xff] }
  0x54   : > { %2570 = vmatprep.mubr.msk.bf16.mxu1 %vm437_vm4, %v404_v22  ;;  %v700_v56 = vld [vmem:[%s2986_s26 + $0x9a] sm:$0xff]  ;;  %v409_v62 = vpack.c.bf16 %v398_v54, %v397_v51  ;;  %v410_v0 = vpack.c.bf16 %v400_v58, %v399_v57  ;;  %v702_v3 = vld [vmem:[%s2986_s26 + $0xb2] sm:$0xff]  ;;  %v2248_v14 = vld [vmem:[%s2986_s26 + $0xc9] sm:$0xff] }
  0x55   : > { %v3116_v63 = vpack.c.bf16 %v700_v56, %v699_v55  ;;  %v402_v5 = vld [vmem:[%s2986_s26 + $0xb0] sm:$0xff]  ;;  %v3128_v6 = vpack.c.bf16 %v702_v3, %v701_v1  ;;  %v1534_v12 = vld [vmem:[%s3522_s1 + $0x1c] sm:$0xf]  ;;  %v2247_v13 = vld [vmem:[%s2986_s26 + $0xc1] sm:$0xff] }
  0x56   : > { %v411_v9 = vpack.c.bf16 %v402_v5, %v401_v4  ;;  %v2223_v15 = vld [vmem:[%s2986_s26 + $0xc0] sm:$0xff]  ;;  %v2224_v16 = vld [vmem:[%s2986_s26 + $0xc8] sm:$0xff]  ;;  %v1044_v17 = vpack.c.bf16 %v2248_v14, %v2247_v13  ;;  %v1568_v22 = vsel %vm462_vm3, %v1534_v12, 0  ;;  %v2297_v23 = vld [vmem:[%s2986_s26 + $0xd8] sm:$0xff] }
  0x57   : > { %v879_v19 = vpack.c.bf16 %v2224_v16, %v2223_v15  ;;  %v2298_v24 = vld [vmem:[%s2986_s26 + $0xe0] sm:$0xff]  ;;  %v2272_v26 = vld [vmem:[%s2986_s26 + $0xca] sm:$0xff] }
  0x58   : > { %v2271_v25 = vld [vmem:[%s2986_s26 + $0xc2] sm:$0xff]  ;;  %v1377_v27 = vpack.c.bf16 %v2298_v24, %v2297_v23 }
  0x59   : > { %v1209_v28 = vpack.c.bf16 %v2272_v26, %v2271_v25 }
  0x5a   : > { %2589 = vmatmul.mubr.msk.bf16.vlgmr.msra.gmra.mxu0 %vm437_vm4, %v3057_v29 }
  0x5b   : > { %2571 = vmatmul.mubr.msk.bf16.vlgmr.msra.gmra.mxu1 %vm437_vm4, %v405_v32  ;;  %2623 = vmatpush3.bf16.msra.mxu0 %v1070_v33 }
  0x5c   : > { %2605 = vmatpush3.bf16.msra.mxu1 %v905_v35  ;;  %2574 = vmatprep.mubr.msk.bf16.mxu1 %vm437_vm4, %v3062_v34 }
  0x5d   : > { %2592 = vmatprep.mubr.msk.bf16.mxu0 %vm437_vm4, %v3065_v36  ;;  %2720 = vmatprep.subr.msk.bf16.mxu1 %vm462_vm3, %v1201_v38 }
  0x5e   : > { %2721 = vmatprep.subr.msk.bf16.mxu0 %vm462_vm3, %v1369_v41 }
  0x62   : > { %2593 = vmatmul.mubr.msk.bf16.gmra.mxu0 %vm437_vm4, %v3089_v47 }
  0x63   : > { %2575 = vmatmul.mubr.msk.bf16.gmra.mxu1 %vm437_vm4, %v3092_v48  ;;  %2596 = vmatprep.mubr.msk.bf16.mxu0 %vm437_vm4, %v3094_v49 }
  0x64   : > { %2578 = vmatprep.mubr.msk.bf16.mxu1 %vm437_vm4, %v3096_v50 }
  0x6a   : > { %2597 = vmatmul.mubr.msk.bf16.gmra.mxu0 %vm437_vm4, %v3114_v59 }
  0x6b   : > { %2579 = vmatmul.mubr.msk.bf16.gmra.mxu1 %vm437_vm4, %v409_v62  ;;  %2600 = vmatprep.mubr.msk.bf16.mxu0 %vm437_vm4, %v3116_v63 }
  0x6c   : > { %2582 = vmatprep.mubr.msk.bf16.mxu1 %vm437_vm4, %v410_v0 }
  0x72   : > { %2601 = vmatmul.mubr.msk.bf16.gmra.mxu0 %vm437_vm4, %v3128_v6 }
  0x73   : > { %2583 = vmatmul.mubr.msk.bf16.gmra.mxu1 %vm437_vm4, %v411_v9  ;;  %2624 = vmatprep.mubr.msk.bf16.mxu0 %vm437_vm4, %v2998_v61  ;;  %v1699_v61 = vld [vmem:[%s3522_s1 + $0x20] sm:$0xf] }
  0x74   : > { %2606 = vmatprep.mubr.msk.bf16.mxu1 %vm437_vm4, %v405_v32  ;;  %v1733_v21 = vsel %vm462_vm3, %v1699_v61, 0 }
  0x7a   : > { %2625 = vmatmul.mubr.msk.bf16.vlgmr.msra.gmra.mxu0 %vm437_vm4, %v3015_v7 }
  0x7b   : > { %2607 = vmatmul.mubr.msk.bf16.vlgmr.msra.gmra.mxu1 %vm437_vm4, %v3062_v34  ;;  %2659 = vmatpush3.bf16.msra.mxu0 %v1403_v10 }
  0x7c   : > { %2641 = vmatpush3.bf16.msra.mxu1 %v1235_v11  ;;  %2610 = vmatprep.mubr.msk.bf16.mxu1 %vm437_vm4, %v3092_v48 }
  0x7d   : > { %2628 = vmatprep.mubr.msk.bf16.mxu0 %vm437_vm4, %v3037_v18  ;;  %2722 = vmatprep.subr.msk.bf16.mxu1 %vm462_vm3, %v1534_v12 }
  0x7e   : > { %2723 = vmatprep.subr.msk.bf16.mxu0 %vm462_vm3, %v1699_v61 }
  0x82   : > { %2629 = vmatmul.mubr.msk.bf16.gmra.mxu0 %vm437_vm4, %v2996_v60 }
  0x83   : > { %2611 = vmatmul.mubr.msk.bf16.gmra.mxu1 %vm437_vm4, %v3096_v50  ;;  %2632 = vmatprep.mubr.msk.bf16.mxu0 %vm437_vm4, %v3005_v2 }
  0x84   : > { %2614 = vmatprep.mubr.msk.bf16.mxu1 %vm437_vm4, %v409_v62 }
  0x8a   : > { %2633 = vmatmul.mubr.msk.bf16.gmra.mxu0 %vm437_vm4, %v3017_v8 }
  0x8b   : > { %2615 = vmatmul.mubr.msk.bf16.gmra.mxu1 %vm437_vm4, %v410_v0  ;;  %2636 = vmatprep.mubr.msk.bf16.mxu0 %vm437_vm4, %v3042_v20 }
  0x8c   : > { %2618 = vmatprep.mubr.msk.bf16.mxu1 %vm437_vm4, %v411_v9 }
  0x92   : > { %2637 = vmatmul.mubr.msk.bf16.gmra.mxu0 %vm437_vm4, %v1044_v17 }
  0x93   : > { %2619 = vmatmul.mubr.msk.bf16.gmra.mxu1 %vm437_vm4, %v879_v19  ;;  %2660 = vmatprep.mubr.msk.bf16.mxu0 %vm437_vm4, %v3062_v34 }
  0x94   : > { %2642 = vmatprep.mubr.msk.bf16.mxu1 %vm437_vm4, %v3057_v29 }
  0x9a   : > { %2661 = vmatmul.mubr.msk.bf16.vlgmr.msra.gmra.mxu0 %vm437_vm4, %v3092_v48 }
  0x9b   : > { %2643 = vmatmul.mubr.msk.bf16.vlgmr.msra.gmra.mxu1 %vm437_vm4, %v3065_v36  ;;  %2695 = vmatpush3.bf16.msra.mxu0 %v1733_v21 }
  0x9c   : > { %2677 = vmatpush3.bf16.msra.mxu1 %v1568_v22  ;;  %2646 = vmatprep.mubr.msk.bf16.mxu1 %vm437_vm4, %v3089_v47 }
  0x9d   : > { %2664 = vmatprep.mubr.msk.bf16.mxu0 %vm437_vm4, %v3096_v50 }
  0xa2   : > { %2665 = vmatmul.mubr.msk.bf16.gmra.mxu0 %vm437_vm4, %v409_v62 }
  0xa3   : > { %2647 = vmatmul.mubr.msk.bf16.gmra.mxu1 %vm437_vm4, %v3094_v49  ;;  %2668 = vmatprep.mubr.msk.bf16.mxu0 %vm437_vm4, %v410_v0 }
  0xa4   : > { %2650 = vmatprep.mubr.msk.bf16.mxu1 %vm437_vm4, %v3114_v59 }
  0xaa   : > { %2669 = vmatmul.mubr.msk.bf16.gmra.mxu0 %vm437_vm4, %v411_v9 }
  0xab   : > { %2651 = vmatmul.mubr.msk.bf16.gmra.mxu1 %vm437_vm4, %v3116_v63  ;;  %2672 = vmatprep.mubr.msk.bf16.mxu0 %vm437_vm4, %v879_v19 }
  0xac   : > { %2654 = vmatprep.mubr.msk.bf16.mxu1 %vm437_vm4, %v3128_v6 }
  0xb2   : > { %2673 = vmatmul.mubr.msk.bf16.gmra.mxu0 %vm437_vm4, %v1377_v27 }
  0xb3   : > { %2655 = vmatmul.mubr.msk.bf16.gmra.mxu1 %vm437_vm4, %v1209_v28  ;;  %2696 = vmatprep.mubr.msk.bf16.mxu0 %vm437_vm4, %v3065_v36 }
  0xb4   : > { %2678 = vmatprep.mubr.msk.bf16.mxu1 %vm437_vm4, %v3015_v7  ;;  %v2346_v7 = vld [vmem:[%s2986_s26 + $0xe2] sm:$0xff] }
  0xba   : > { %2697 = vmatmul.mubr.msk.bf16.vlgmr.msra.gmra.mxu0 %vm437_vm4, %v3089_v47 }
  0xbb   : > { %2679 = vmatmul.mubr.msk.bf16.vlgmr.msra.gmra.mxu1 %vm437_vm4, %v3037_v18  ;;  %2700 = vmatprep.mubr.msk.bf16.mxu0 %vm437_vm4, %v3094_v49  ;;  %v2321_v18 = vld [vmem:[%s2986_s26 + $0xd9] sm:$0xff] }
  0xbc   : > { %2682 = vmatprep.mubr.msk.bf16.mxu1 %vm437_vm4, %v2996_v60  ;;  %v2345_v60 = vld [vmem:[%s2986_s26 + $0xda] sm:$0xff] }
  0xbd   : > { %v1707_v29 = vpack.c.bf16 %v2346_v7, %v2345_v60 }
  0xc2   : > { %2701 = vmatmul.mubr.msk.bf16.gmra.mxu0 %vm437_vm4, %v3114_v59 }
  0xc3   : > { %2683 = vmatmul.mubr.msk.bf16.gmra.mxu1 %vm437_vm4, %v3005_v2  ;;  %2704 = vmatprep.mubr.msk.bf16.mxu0 %vm437_vm4, %v3116_v63  ;;  %v2322_v2 = vld [vmem:[%s2986_s26 + $0xe1] sm:$0xff] }
  0xc4   : > { %2686 = vmatprep.mubr.msk.bf16.mxu1 %vm437_vm4, %v3017_v8  ;;  %v1542_v30 = vpack.c.bf16 %v2322_v2, %v2321_v18 }
  0xca   : > { %2705 = vmatmul.mubr.msk.bf16.gmra.mxu0 %vm437_vm4, %v3128_v6 }
  0xcb   : > { %2687 = vmatmul.mubr.msk.bf16.gmra.mxu1 %vm437_vm4, %v3042_v20  ;;  %2708 = vmatprep.mubr.msk.bf16.mxu0 %vm437_vm4, %v1209_v28 }
  0xcc   : > { %2690 = vmatprep.mubr.msk.bf16.mxu1 %vm437_vm4, %v1044_v17 }
  0xd2   : > { %2709 = vmatmul.mubr.msk.bf16.gmra.mxu0 %vm437_vm4, %v1707_v29 }
  0xd3   : > { %2691 = vmatmul.mubr.msk.bf16.gmra.mxu1 %vm437_vm4, %v1542_v30 }
 0x10a   : > { %v2554_v8 = vpop.f32.mrf.mxu0 }
 0x10b   : > { %v2562_v31 = vpop.f32.mrf.mxu1 }
 0x10c   : > { %v500_v32 = vpop.f32.mrf.mxu0 }
 0x10d   : > { %v532_v33 = vpop.f32.mrf.mxu1 }
 0x10e   : > { %v2555_v34 = vpop.f32.mrf.mxu0 }
 0x10f   : > { %v2563_v20 = vpop.f32.mrf.mxu1 }
 0x110   : > { %v503_v35 = vpop.f32.mrf.mxu0 }
 0x111   : > { %v535_v36 = vpop.f32.mrf.mxu1 }
 0x112   : > { %v2558_v37 = vpop.f32.mrf.mxu0 }
 0x113   : > { %v2566_v38 = vpop.f32.mrf.mxu1 }
 0x114   : > { %v516_v39 = vpop.f32.mrf.mxu0 }
 0x115   : > { %v548_v40 = vpop.f32.mrf.mxu1 }
 0x116   : > { %v2559_v41 = vpop.f32.mrf.mxu0 }
 0x117   : > { %v2567_v42 = vpop.f32.mrf.mxu1 }
 0x118   : > { %v519_v43 = vpop.f32.mrf.mxu0 }
 0x119   : > { %v3237_v44 = vpop.f32.mrf.mxu1 }
 0x11a   : > { %v2590_v45 = vpop.f32.mrf.mxu0 }
 0x11b   : > { %v2572_v46 = vpop.f32.mrf.mxu1 }
 0x11c   : > { %v633_v47 = vadd.f32 %v2572_v46, %v2554_v8  ;;  %v773_v48 = vpop.f32.mrf.mxu0 }
 0x11d   : > { %v624_v49 = vpop.f32.mrf.mxu1 }
 0x11e   : > { %v3239_v50 = vadd.f32 %v2590_v45, %v633_v47  ;;  %v625_v51 = vadd.f32 %v624_v49, %v500_v32  ;;  %v2591_v52 = vpop.f32.mrf.mxu0 }
 0x11f   : > { %v2573_v53 = vpop.f32.mrf.mxu1 }
 0x120   : > { %v3241_v54 = vadd.f32 %v773_v48, %v625_v51  ;;  %v636_v55 = vadd.f32 %v2573_v53, %v2555_v34  ;;  %v776_v56 = vpop.f32.mrf.mxu0 }
 0x121   : > { %v627_v57 = vpop.f32.mrf.mxu1 }
 0x122   : > { %v3243_v58 = vadd.f32 %v2591_v52, %v636_v55  ;;  %v628_v59 = vadd.f32 %v627_v57, %v503_v35  ;;  %v2594_v62 = vpop.f32.mrf.mxu0 }
 0x123   : > { %v2576_v63 = vpop.f32.mrf.mxu1 }
 0x124   : > { %v3245_v0 = vadd.f32 %v776_v56, %v628_v59  ;;  %v649_v1 = vadd.f32 %v2576_v63, %v2558_v37  ;;  %v789_v3 = vpop.f32.mrf.mxu0 }
 0x125   : > { %v640_v4 = vpop.f32.mrf.mxu1 }
 0x126   : > { %v3247_v5 = vadd.f32 %v2594_v62, %v649_v1  ;;  %v641_v6 = vadd.f32 %v640_v4, %v516_v39  ;;  %v2595_v9 = vpop.f32.mrf.mxu0 }
 0x127   : > { %v2577_v10 = vpop.f32.mrf.mxu1 }
 0x128   : > { %v3249_v11 = vadd.f32 %v789_v3, %v641_v6  ;;  %v652_v12 = vadd.f32 %v2577_v10, %v2559_v41  ;;  %v792_v61 = vpop.f32.mrf.mxu0 }
 0x129   : > { %v643_v13 = vpop.f32.mrf.mxu1 }
 0x12a   : > { %v3251_v14 = vadd.f32 %v2595_v9, %v652_v12  ;;  %v644_v15 = vadd.f32 %v643_v13, %v519_v43  ;;  %v2598_v16 = vpop.f32.mrf.mxu0 }
 0x12b   : > { %v2580_v17 = vpop.f32.mrf.mxu1 }
 0x12c   : > { %v3253_v19 = vadd.f32 %v792_v61, %v644_v15  ;;  %v665_v21 = vadd.f32 %v2580_v17, %v2562_v31  ;;  %v805_v22 = vpop.f32.mrf.mxu0 }
 0x12d   : > { %v656_v23 = vpop.f32.mrf.mxu1 }
 0x12e   : > { %v3255_v24 = vadd.f32 %v2598_v16, %v665_v21  ;;  %v657_v25 = vadd.f32 %v656_v23, %v532_v33  ;;  %v2599_v26 = vpop.f32.mrf.mxu0 }
 0x12f   : > { %v2581_v27 = vpop.f32.mrf.mxu1 }
 0x130   : > { %v3257_v28 = vadd.f32 %v805_v22, %v657_v25  ;;  %v668_v60 = vadd.f32 %v2581_v27, %v2563_v20  ;;  %v808_v7 = vpop.f32.mrf.mxu0 }
 0x131   : > { %v659_v18 = vpop.f32.mrf.mxu1 }
 0x132   : > { %v3259_v2 = vadd.f32 %v2599_v26, %v668_v60  ;;  %v660_v29 = vadd.f32 %v659_v18, %v535_v36  ;;  %v2602_v30 = vpop.f32.mrf.mxu0 }
 0x133   : > { %v2584_v8 = vpop.f32.mrf.mxu1 }
 0x134   : > { %v3261_v32 = vadd.f32 %v808_v7, %v660_v29  ;;  %v681_v31 = vadd.f32 %v2584_v8, %v2566_v38  ;;  %v821_v34 = vpop.f32.mrf.mxu0 }
 0x135   : > { %v672_v35 = vpop.f32.mrf.mxu1 }
 0x136   : > { %v3263_v37 = vadd.f32 %v2602_v30, %v681_v31  ;;  %v673_v33 = vadd.f32 %v672_v35, %v548_v40  ;;  %v2603_v39 = vpop.f32.mrf.mxu0 }
 0x137   : > { %v2585_v41 = vpop.f32.mrf.mxu1 }
 0x138   : > { %v3265_v43 = vadd.f32 %v821_v34, %v673_v33  ;;  %v684_v20 = vadd.f32 %v2585_v41, %v2567_v42  ;;  %v824_v45 = vpop.f32.mrf.mxu0 }
 0x139   : > { %v675_v46 = vpop.f32.mrf.mxu1 }
 0x13a   : > { %v3267_v47 = vadd.f32 %v2603_v39, %v684_v20  ;;  %v676_v36 = vadd.f32 %v675_v46, %v3237_v44  ;;  %v3270_v48 = vpop.f32.mrf.mxu0 }
 0x13b   : > { %v2608_v49 = vpop.f32.mrf.mxu1 }
 0x13c   : > { %v3272_v38 = vadd.f32 %v824_v45, %v676_v36  ;;  %v3274_v51 = vpop.f32.mrf.mxu0 }
 0x13d   : > { %v941_v52 = vpop.f32.mrf.mxu1 }
 0x13e   : > { %v3276_v40 = vpop.f32.mrf.mxu0 }
 0x13f   : > { %v2609_v53 = vpop.f32.mrf.mxu1 }
 0x140   : > { %v3278_v55 = vpop.f32.mrf.mxu0 }
 0x141   : > { %v944_v42 = vpop.f32.mrf.mxu1 }
 0x142   : > { %v3280_v56 = vpop.f32.mrf.mxu0 }
 0x143   : > { %v2612_v57 = vpop.f32.mrf.mxu1 }
 0x144   : > { %v3282_v59 = vpop.f32.mrf.mxu0 }
 0x145   : > { %v957_v44 = vpop.f32.mrf.mxu1 }
 0x146   : > { %v3284_v62 = vpop.f32.mrf.mxu0 }
 0x147   : > { %v2613_v63 = vpop.f32.mrf.mxu1 }
 0x148   : > { %v3286_v1 = vpop.f32.mrf.mxu0 }
 0x149   : > { %v960_v3 = vpop.f32.mrf.mxu1 }
 0x14a   : > { %v3288_v4 = vpop.f32.mrf.mxu0 }
 0x14b   : > { %v2616_v6 = vpop.f32.mrf.mxu1 }
 0x14c   : > { %v3290_v9 = vpop.f32.mrf.mxu0 }
 0x14d   : > { %v973_v10 = vpop.f32.mrf.mxu1 }
 0x14e   : > { %v3292_v12 = vpop.f32.mrf.mxu0 }
 0x14f   : > { %v2617_v61 = vpop.f32.mrf.mxu1 }
 0x150   : > { %v3294_v13 = vpop.f32.mrf.mxu0 }
 0x151   : > { %v976_v15 = vpop.f32.mrf.mxu1 }
 0x152   : > { %v3296_v16 = vpop.f32.mrf.mxu0 }
 0x153   : > { %v2620_v17 = vpop.f32.mrf.mxu1 }
 0x154   : > { %v3298_v21 = vpop.f32.mrf.mxu0 }
 0x155   : > { %v989_v22 = vpop.f32.mrf.mxu1 }
 0x156   : > { %v3300_v23 = vpop.f32.mrf.mxu0 }
 0x157   : > { %v2621_v25 = vpop.f32.mrf.mxu1 }
 0x158   : > { %v3302_v26 = vpop.f32.mrf.mxu0 }
 0x159   : > { %3526 = vst [vmem:[#allocation3_spill] sm:$0xff] %v3302_v26  ;;  %v992_v27 = vpop.f32.mrf.mxu1 }
 0x15a   : > { %v2662_v60 = vpop.f32.mrf.mxu0 }
 0x15b   : > { %v2644_v7 = vpop.f32.mrf.mxu1 }
 0x15c   : > { %v3304_v18 = vpop.f32.mrf.mxu0 }
 0x15d   : > { %v1271_v29 = vpop.f32.mrf.mxu1 }
 0x15e   : > { %v3306_v30 = vpop.f32.mrf.mxu0 }
 0x15f   : > { %3527 = vst [vmem:[#allocation4_spill] sm:$0xff] %v3306_v30  ;;  %v2645_v8 = vpop.f32.mrf.mxu1 }
 0x160   : > { %v3308_v31 = vpop.f32.mrf.mxu0 }
 0x161   : > { %3528 = vst [vmem:[#allocation5_spill] sm:$0xff] %v3308_v31  ;;  %v1274_v34 = vpop.f32.mrf.mxu1 }
 0x162   : > { %v3310_v35 = vpop.f32.mrf.mxu0 }
 0x163   : > { %3529 = vst [vmem:[#allocation6_spill] sm:$0xff] %v3310_v35  ;;  %v3312_v33 = vpop.f32.mrf.mxu1 }
 0x164   : > { %3530 = vst [vmem:[#allocation7_spill] sm:$0xff] %v3312_v33  ;;  %v3314_v39 = vpop.f32.mrf.mxu0 }
 0x165   : > { %3531 = vst [vmem:[#allocation8_spill] sm:$0xff] %v3314_v39  ;;  %v3316_v41 = vpop.f32.mrf.mxu1 }
 0x166   : > { %3532 = vst [vmem:[#allocation9_spill] sm:$0xff] %v3316_v41  ;;  %v3318_v20 = vpop.f32.mrf.mxu0 }
 0x167   : > { %3533 = vst [vmem:[#allocation10_spill] sm:$0xff] %v3318_v20  ;;  %v3320_v45 = vpop.f32.mrf.mxu1  ;;  %v1006_v20 = vadd.f32 %v2608_v49, %v3239_v50 }
 0x168   : > { %3534 = vst [vmem:[#allocation11_spill] sm:$0xff] %v3320_v45  ;;  %v3322_v46 = vpop.f32.mrf.mxu0 }
 0x169   : > { %3535 = vst [vmem:[#allocation12_spill] sm:$0xff] %v3322_v46  ;;  %v3324_v36 = vpop.f32.mrf.mxu1  ;;  %v1004_v46 = vadd.f32 %v941_v52, %v3241_v54  ;;  %v1008_v54 = vadd.f32 %v957_v44, %v3249_v11  ;;  %v1011_v52 = vadd.f32 %v2613_v63, %v3251_v14 }
 0x16a   : > { %3536 = vst [vmem:[#allocation13_spill] sm:$0xff] %v3324_v36  ;;  %v3326_v30 = vpop.f32.mrf.mxu0 }
 0x16b   : > { %3537 = vst [vmem:[#allocation14_spill] sm:$0xff] %v3326_v30  ;;  %v3328_v31 = vpop.f32.mrf.mxu1  ;;  %v1007_v30 = vadd.f32 %v2609_v53, %v3243_v58  ;;  %v1169_v50 = vadd.f32 %v3274_v51, %v1004_v46  ;;  %v1009_v58 = vadd.f32 %v960_v3, %v3253_v19  ;;  %v1015_v51 = vadd.f32 %v2617_v61, %v3259_v2 }
 0x16c   : > { %3538 = vst [vmem:[#allocation15_spill] sm:$0xff] %v3328_v31  ;;  %v3330_v26 = vpop.f32.mrf.mxu0  ;;  %v1013_v19 = vadd.f32 %v976_v15, %v3261_v32  ;;  %v1017_v2 = vadd.f32 %v992_v27, %v3272_v38 }
 0x16d   : > { %3539 = vst [vmem:[#allocation16_spill] sm:$0xff] %v3330_v26  ;;  %v3332_v35 = vpop.f32.mrf.mxu1  ;;  %v1005_v26 = vadd.f32 %v944_v42, %v3245_v0  ;;  %v1014_v0 = vadd.f32 %v2616_v6, %v3255_v24  ;;  %v1018_v24 = vadd.f32 %v2620_v17, %v3263_v37  ;;  %v1334_v44 = vadd.f32 %v1271_v29, %v1169_v50 }
 0x16e   : > { %3540 = vst [vmem:[#allocation17_spill] sm:$0xff] %v3332_v35  ;;  %v3334_v33 = vpop.f32.mrf.mxu0  ;;  %v1176_v6 = vadd.f32 %v3284_v62, %v1011_v52 }
 0x16f   : > { %3541 = vst [vmem:[#allocation18_spill] sm:$0xff] %v3334_v33  ;;  %v3336_v39 = vpop.f32.mrf.mxu1  ;;  %v1171_v33 = vadd.f32 %v3270_v48, %v1006_v20  ;;  %v1172_v48 = vadd.f32 %v3276_v40, %v1007_v30  ;;  %v1173_v40 = vadd.f32 %v3282_v59, %v1008_v54  ;;  %v1179_v32 = vadd.f32 %v3288_v4, %v1014_v0 }
 0x170   : > { %3542 = vst [vmem:[#allocation19_spill] sm:$0xff] %v3336_v39  ;;  %v3339_v41 = vpop.f32.mrf.mxu0  ;;  %v1010_v39 = vadd.f32 %v2612_v57, %v3247_v5  ;;  %v1170_v5 = vadd.f32 %v3278_v55, %v1005_v26  ;;  %v1012_v57 = vadd.f32 %v973_v10, %v3257_v28  ;;  %v1016_v55 = vadd.f32 %v989_v22, %v3265_v43  ;;  %v3543_v26 = vld [vmem:[#allocation3_spill] sm:$0xff] }
 0x171   : > { %v3342_v45 = vpop.f32.mrf.mxu1  ;;  %v1336_v53 = vadd.f32 %v2644_v7, %v1171_v33  ;;  %v1019_v28 = vadd.f32 %v2621_v25, %v3267_v47  ;;  %v1180_v59 = vadd.f32 %v3292_v12, %v1015_v51  ;;  %v1337_v15 = vadd.f32 %v2645_v8, %v1172_v48  ;;  %v3544_v12 = vld [vmem:[#allocation7_spill] sm:$0xff]  ;;  %v3545_v7 = vld [vmem:[#allocation9_spill] sm:$0xff]  ;;  %v3553_v51 = vld [vmem:[#allocation6_spill] sm:$0xff] }
 0x172   : > { %v3344_v36 = vpop.f32.mrf.mxu0  ;;  %v1175_v14 = vadd.f32 %v3280_v56, %v1010_v39  ;;  %v1174_v56 = vadd.f32 %v3286_v1, %v1009_v58  ;;  %v1177_v61 = vadd.f32 %v3290_v9, %v1012_v57  ;;  %v1335_v43 = vadd.f32 %v1274_v34, %v1170_v5  ;;  %v3547_v34 = vld [vmem:[#allocation4_spill] sm:$0xff]  ;;  %v3548_v39 = vld [vmem:[#allocation5_spill] sm:$0xff] }
 0x173   : > { %v3348_v31 = vpop.f32.mrf.mxu1  ;;  %v1504_v37 = vadd.f32 %v2662_v60, %v1336_v53  ;;  %v1178_v47 = vadd.f32 %v3294_v13, %v1013_v19  ;;  %v1183_v38 = vadd.f32 %v3296_v16, %v1018_v24  ;;  %v1502_v22 = vadd.f32 %v3304_v18, %v1334_v44  ;;  %v3546_v13 = vld [vmem:[#allocation11_spill] sm:$0xff]  ;;  %v3549_v20 = vld [vmem:[#allocation13_spill] sm:$0xff] }
 0x174   : > { %v3352_v35 = vpop.f32.mrf.mxu0  ;;  %v1181_v1 = vadd.f32 %v3298_v21, %v1016_v55  ;;  %v3390_v4 = vadd.f32 %v3300_v23, %v1019_v28  ;;  %v3393_v9 = vadd.f32 %v3543_v26, %v1017_v2  ;;  %v1340_v27 = vadd.f32 %v3544_v12, %v1175_v14  ;;  %v3550_v46 = vld [vmem:[#allocation15_spill] sm:$0xff]  ;;  %v3554_v55 = vld [vmem:[#allocation8_spill] sm:$0xff]  ;;  %v3555_v2 = vld [vmem:[#allocation10_spill] sm:$0xff] }
 0x175   : > { %v3356_v49 = vpop.f32.mrf.mxu1  ;;  %v1338_v29 = vadd.f32 %v3545_v7, %v1173_v40  ;;  %v1341_v30 = vadd.f32 %v3546_v13, %v1176_v6  ;;  %v1505_v33 = vadd.f32 %v3547_v34, %v1337_v15  ;;  %v1503_v21 = vadd.f32 %v3548_v39, %v1335_v43  ;;  %v3551_v52 = vld [vmem:[#allocation17_spill] sm:$0xff] }
 0x176   : > { %v3361_v42 = vpop.f32.mrf.mxu0  ;;  %v1339_v23 = vadd.f32 %v3549_v20, %v1174_v56  ;;  %v1344_v50 = vadd.f32 %v3550_v46, %v1179_v32  ;;  %v1342_v58 = vadd.f32 %v3551_v52, %v1177_v61  ;;  %v1508_v14 = vadd.f32 %v3553_v51, %v1340_v27 }
 0x177   : > { %v3367_v11 = vpop.f32.mrf.mxu1  ;;  %v3552_v0 = vld [vmem:[#allocation19_spill] sm:$0xff]  ;;  %v1343_v19 = vadd.f32 %v3342_v45, %v1178_v47  ;;  %v1348_v24 = vadd.f32 %v3348_v31, %v1183_v38  ;;  %v1506_v28 = vadd.f32 %v3554_v55, %v1338_v29  ;;  %v1509_v6 = vadd.f32 %v3555_v2, %v1341_v30  ;;  %v3559_v38 = vld [vmem:[#allocation18_spill] sm:$0xff] }
 0x178   : > { %v3372_v63 = vpop.f32.mrf.mxu0  ;;  %v1345_v53 = vadd.f32 %v3552_v0, %v1180_v59  ;;  %v1346_v56 = vadd.f32 %v3356_v49, %v1181_v1  ;;  %v3557_v59 = vld [vmem:[#allocation14_spill] sm:$0xff] }
 0x179   : > { %v3378_v3 = vpop.f32.mrf.mxu1  ;;  %v1512_v15 = vadd.f32 %v3557_v59, %v1344_v50  ;;  %v3423_v1 = vadd.f32 %v3339_v41, %v1343_v19  ;;  %v3426_v26 = vadd.f32 %v3344_v36, %v1348_v24 }
 0x17a   : > { %v2698_v10 = vpop.f32.mrf.mxu0  ;;  %v3429_v7 = vadd.f32 %v3352_v35, %v1346_v56 }
 0x17b   : > { %v2680_v17 = vpop.f32.mrf.mxu1 }
 0x17c   : > { %v1669_v62 = vadd.f32 %v2680_v17, %v1504_v37  ;;  %v1769_v25 = vpop.f32.mrf.mxu0  ;;  %v3558_v17 = vld [vmem:[#allocation16_spill] sm:$0xff] }
 0x17d   : > { %v1604_v60 = vpop.f32.mrf.mxu1  ;;  %v3415_v47 = vadd.f32 %v3558_v17, %v1342_v58 }
 0x17e   : > { %v1834_v16 = vadd.f32 %v2698_v10, %v1669_v62  ;;  %v1667_v8 = vadd.f32 %v1604_v60, %v1502_v22  ;;  %v2699_v18 = vpop.f32.mrf.mxu0  ;;  %v3556_v10 = vld [vmem:[#allocation12_spill] sm:$0xff]  ;;  %v3418_v22 = vadd.f32 %v3559_v38, %v1345_v53 }
 0x17f   : > { %v2681_v54 = vpop.f32.mrf.mxu1  ;;  %v1507_v61 = vadd.f32 %v3556_v10, %v1339_v23 }
 0x180   : > { %v2376_v48 = vpack.c.bf16 %v1834_v16, %v1834_v16  ;;  %v1832_v5 = vadd.f32 %v1769_v25, %v1667_v8  ;;  %v1772_v57 = vpop.f32.mrf.mxu0  ;;  %v1670_v44 = vadd.f32 %v2681_v54, %v1505_v33  ;;  %v1973_v29 = vmul.f32 %v1834_v16, %v1834_v16 }
 0x181   : > { %v1607_v40 = vpop.f32.mrf.mxu1  ;;  %v1933_v39 = vsel %vm437_vm4, %v1834_v16, 0.0 }
 0x182   : > { %1915 = vst.msk [vmem:[%s2877_s9 + $0x8] sm:$0xf] %vm1912_vm5, %v2376_v48  ;;  %v2374_v32 = vpack.c.bf16 %v1832_v5, %v1832_v5  ;;  %v2702_v37 = vpop.f32.mrf.mxu0  ;;  %v1835_v45 = vadd.f32 %v2699_v18, %v1670_v44  ;;  %v1668_v43 = vadd.f32 %v1607_v40, %v1503_v21  ;;  %v1971_v49 = vmul.f32 %v1832_v5, %v1832_v5 }
 0x183   : > { %v2684_v31 = vpop.f32.mrf.mxu1  ;;  %v1930_v18 = vsel %vm437_vm4, %v1832_v5, 0.0  ;;  %v1990_v0 = vsel %vm437_vm4, %v1973_v29, 0.0 }
 0x184   : > { %1913 = vst.msk [vmem:[%s2877_s9] sm:$0xf] %vm1912_vm5, %v2374_v32  ;;  %v1673_v62 = vadd.f32 %v2684_v31, %v1508_v14  ;;  %v1785_v25 = vpop.f32.mrf.mxu0  ;;  %v2377_v12 = vpack.c.bf16 %v1835_v45, %v1835_v45  ;;  %v1833_v27 = vadd.f32 %v1772_v57, %v1668_v43  ;;  %v1987_v35 = vsel %vm437_vm4, %v1971_v49, 0.0 }
 0x185   : > { %v1620_v60 = vpop.f32.mrf.mxu1  ;;  %v1974_v46 = vmul.f32 %v1835_v45, %v1835_v45  ;;  %v1935_v57 = vsel %vm437_vm4, %v1835_v45, 0.0 }
 0x186   : > { %v1838_v13 = vadd.f32 %v2702_v37, %v1673_v62  ;;  %v1671_v30 = vadd.f32 %v1620_v60, %v1506_v28  ;;  %v2703_v8 = vpop.f32.mrf.mxu0  ;;  %1916 = vst.msk [vmem:[%s2877_s9 + $0xc] sm:$0xf] %vm1912_vm5, %v2377_v12  ;;  %v2375_v41 = vpack.c.bf16 %v1833_v27, %v1833_v27  ;;  %v1931_v34 = vsel %vm437_vm4, %v1833_v27, 0.0 }
 0x187   : > { %v1972_v36 = vmul.f32 %v1833_v27, %v1833_v27  ;;  %v2685_v33 = vpop.f32.mrf.mxu1  ;;  %v1932_v21 = vadd.f32 %v1931_v34, %v1930_v18 }
 0x188   : > { %v2380_v20 = vpack.c.bf16 %v1838_v13, %v1838_v13  ;;  %v1788_v23 = vpop.f32.mrf.mxu0  ;;  %1914 = vst.msk [vmem:[%s2877_s9 + $0x4] sm:$0xf] %vm1912_vm5, %v2375_v41  ;;  %v1836_v54 = vadd.f32 %v1785_v25, %v1671_v30  ;;  %v1674_v52 = vadd.f32 %v2685_v33, %v1509_v6  ;;  %v1992_v6 = vsel %vm437_vm4, %v1974_v46, 0.0 }
 0x189   : > { %v1988_v50 = vsel %vm437_vm4, %v1972_v36, 0.0  ;;  %v1623_v58 = vpop.f32.mrf.mxu1  ;;  %v1934_v53 = vadd.f32 %v1933_v39, %v1932_v21  ;;  %v1977_v56 = vmul.f32 %v1838_v13, %v1838_v13  ;;  %v1349_v25 = vadd.f32 %v3367_v11, %v3390_v4 }
 0x18a   : > { %v1989_v48 = vadd.f32 %v1988_v50, %v1987_v35  ;;  %1919 = vst.msk [vmem:[%s2877_s9 + $0x18] sm:$0xf] %vm1912_vm5, %v2380_v20  ;;  %v1672_v16 = vadd.f32 %v1623_v58, %v1507_v61  ;;  %v2706_v5 = vpop.f32.mrf.mxu0  ;;  %v2378_v51 = vpack.c.bf16 %v1836_v54, %v1836_v54  ;;  %v1975_v14 = vmul.f32 %v1836_v54, %v1836_v54 }
 0x18b   : > { %v1839_v19 = vadd.f32 %v2703_v8, %v1674_v52  ;;  %v2688_v24 = vpop.f32.mrf.mxu1  ;;  %v1936_v40 = vadd.f32 %v1935_v57, %v1934_v53  ;;  %v1937_v32 = vsel %vm437_vm4, %v1836_v54, 0.0  ;;  %v1941_v30 = vsel %vm437_vm4, %v1838_v13, 0.0 }
 0x18c   : > { %v1991_v44 = vadd.f32 %v1990_v0, %v1989_v48  ;;  %v1837_v55 = vadd.f32 %v1788_v23, %v1672_v16  ;;  %v1677_v28 = vadd.f32 %v2688_v24, %v1512_v15  ;;  %v1801_v2 = vpop.f32.mrf.mxu0  ;;  %1917 = vst.msk [vmem:[%s2877_s9 + $0x10] sm:$0xf] %vm1912_vm5, %v2378_v51  ;;  %v1994_v17 = vsel %vm437_vm4, %v1975_v14, 0.0 }
 0x18d   : > { %v2381_v37 = vpack.c.bf16 %v1839_v19, %v1839_v19  ;;  %v1636_v10 = vpop.f32.mrf.mxu1  ;;  %v1938_v61 = vadd.f32 %v1937_v32, %v1936_v40  ;;  %v1978_v8 = vmul.f32 %v1839_v19, %v1839_v19  ;;  %v1347_v4 = vadd.f32 %v3378_v3, %v3393_v9 }
 0x18e   : > { %v1993_v59 = vadd.f32 %v1992_v6, %v1991_v44  ;;  %v2379_v45 = vpack.c.bf16 %v1837_v55, %v1837_v55  ;;  %v1939_v43 = vsel %vm437_vm4, %v1837_v55, 0.0  ;;  %v2707_v31 = vpop.f32.mrf.mxu0  ;;  %v1976_v15 = vmul.f32 %v1837_v55, %v1837_v55 }
 0x18f   : > { %1920 = vst.msk [vmem:[%s2877_s9 + $0x1c] sm:$0xf] %vm1912_vm5, %v2381_v37  ;;  %v1842_v38 = vadd.f32 %v2706_v5, %v1677_v28  ;;  %v1675_v49 = vadd.f32 %v1636_v10, %v3415_v47  ;;  %v2689_v62 = vpop.f32.mrf.mxu1  ;;  %v1940_v27 = vadd.f32 %v1939_v43, %v1938_v61  ;;  %v1998_v35 = vsel %vm437_vm4, %v1977_v56, 0.0 }
 0x190   : > { %v1995_v12 = vadd.f32 %v1994_v17, %v1993_v59  ;;  %1918 = vst.msk [vmem:[%s2877_s9 + $0x14] sm:$0xf] %vm1912_vm5, %v2379_v45  ;;  %v1678_v60 = vadd.f32 %v2689_v62, %v3418_v22  ;;  %v1804_v29 = vpop.f32.mrf.mxu0  ;;  %v1996_v18 = vsel %vm437_vm4, %v1976_v15, 0.0  ;;  %v1943_v22 = vsel %vm437_vm4, %v1839_v19, 0.0 }
 0x191   : > { %v2384_v41 = vpack.c.bf16 %v1842_v38, %v1842_v38  ;;  %v1639_v34 = vpop.f32.mrf.mxu1  ;;  %v1942_v47 = vadd.f32 %v1941_v30, %v1940_v27  ;;  %v1840_v33 = vadd.f32 %v1801_v2, %v1675_v49  ;;  %v1517_v20 = vadd.f32 %v3361_v42, %v1349_v25 }
 0x192   : > { %v1997_v36 = vadd.f32 %v1996_v18, %v1995_v12  ;;  %v1843_v39 = vadd.f32 %v2707_v31, %v1678_v60  ;;  %v2710_v11 = vpop.f32.mrf.mxu0  ;;  %v1676_v13 = vadd.f32 %v1639_v34, %v3423_v1  ;;  %v2000_v52 = vsel %vm437_vm4, %v1978_v8, 0.0 }
 0x193   : > { %1923 = vst.msk [vmem:[%s2877_s9 + $0x28] sm:$0xf] %vm1912_vm5, %v2384_v41  ;;  %v2692_v21 = vpop.f32.mrf.mxu1  ;;  %v2382_v46 = vpack.c.bf16 %v1840_v33, %v1840_v33  ;;  %v1944_v50 = vadd.f32 %v1943_v22, %v1942_v47  ;;  %v1945_v3 = vsel %vm437_vm4, %v1840_v33, 0.0  ;;  %v1979_v9 = vmul.f32 %v1840_v33, %v1840_v33 }
 0x194   : > { %v1999_v23 = vadd.f32 %v1998_v35, %v1997_v36  ;;  %v1817_v54 = vpop.f32.mrf.mxu0  ;;  %v2385_v58 = vpack.c.bf16 %v1843_v39, %v1843_v39  ;;  %v1841_v1 = vadd.f32 %v1804_v29, %v1676_v13  ;;  %v1681_v16 = vadd.f32 %v2692_v21, %v3426_v26 }
 0x195   : > { %v1652_v0 = vpop.f32.mrf.mxu1  ;;  %1921 = vst.msk [vmem:[%s2877_s9 + $0x20] sm:$0xf] %vm1912_vm5, %v2382_v46  ;;  %v1946_v53 = vadd.f32 %v1945_v3, %v1944_v50  ;;  %v1515_v42 = vadd.f32 %v3372_v63, %v1347_v4  ;;  %v1981_v5 = vmul.f32 %v1842_v38, %v1842_v38  ;;  %v2002_v57 = vsel %vm437_vm4, %v1979_v9, 0.0 }
 0x196   : > { %v2001_v48 = vadd.f32 %v2000_v52, %v1999_v23  ;;  %1924 = vst.msk [vmem:[%s2877_s9 + $0x2c] sm:$0xf] %vm1912_vm5, %v2385_v58  ;;  %v1679_v51 = vadd.f32 %v1652_v0, %v3429_v7  ;;  %v2383_v24 = vpack.c.bf16 %v1841_v1, %v1841_v1  ;;  %v1947_v44 = vsel %vm437_vm4, %v1841_v1, 0.0  ;;  %v2711_v55 = vpop.f32.mrf.mxu0 }
 0x197   : > { %v2693_v14 = vpop.f32.mrf.mxu1  ;;  %v1980_v40 = vmul.f32 %v1841_v1, %v1841_v1  ;;  %v1948_v28 = vadd.f32 %v1947_v44, %v1946_v53  ;;  %v1846_v2 = vadd.f32 %v2710_v11, %v1681_v16  ;;  %v1949_v56 = vsel %vm437_vm4, %v1842_v38, 0.0  ;;  %v1929_v16 = vld [vmem:[%s2872_s6] sm:$0x1] }
 0x198   : > { %v2003_v19 = vadd.f32 %v2002_v57, %v2001_v48  ;;  %v1844_v26 = vadd.f32 %v1817_v54, %v1679_v51  ;;  %v1682_v6 = vadd.f32 %v2693_v14, %v1517_v20  ;;  %v1982_v32 = vmul.f32 %v1843_v39, %v1843_v39  ;;  %1922 = vst.msk [vmem:[%s2877_s9 + $0x24] sm:$0xf] %vm1912_vm5, %v2383_v24  ;;  %v1820_v15 = vpop.f32.mrf.mxu0  ;;  %v1970_v57 = vld [vmem:[%s2882_s12] sm:$0x1] }
 0x199   : > { %v1655_v63 = vpop.f32.mrf.mxu1  ;;  %v2004_v7 = vsel %vm437_vm4, %v1980_v40, 0.0  ;;  %v1950_v10 = vadd.f32 %v1949_v56, %v1948_v28  ;;  %v2388_v59 = vpack.c.bf16 %v1846_v2, %v1846_v2  ;;  %v2006_v45 = vsel %vm437_vm4, %v1981_v5, 0.0 }
 0x19a   : > { %v1680_v37 = vadd.f32 %v1655_v63, %v1515_v42  ;;  %v2005_v61 = vadd.f32 %v2004_v7, %v2003_v19  ;;  %v1951_v43 = vsel %vm437_vm4, %v1843_v39, 0.0  ;;  %v2386_v31 = vpack.c.bf16 %v1844_v26, %v1844_v26 }
 0x19b   : > { %v1983_v17 = vmul.f32 %v1844_v26, %v1844_v26  ;;  %1927 = vst.msk [vmem:[%s2877_s9 + $0x38] sm:$0xf] %vm1912_vm5, %v2388_v59  ;;  %v1952_v38 = vadd.f32 %v1951_v43, %v1950_v10  ;;  %v1847_v62 = vadd.f32 %v2711_v55, %v1682_v6  ;;  %v2008_v12 = vsel %vm437_vm4, %v1982_v32, 0.0 }
 0x19c   : > { %v2007_v49 = vadd.f32 %v2006_v45, %v2005_v61  ;;  %v1845_v25 = vadd.f32 %v1820_v15, %v1680_v37  ;;  %1925 = vst.msk [vmem:[%s2877_s9 + $0x30] sm:$0xf] %vm1912_vm5, %v2386_v31  ;;  %v1953_v27 = vsel %vm437_vm4, %v1844_v26, 0.0  ;;  %v1985_v60 = vmul.f32 %v1846_v2, %v1846_v2 }
 0x19d   : > { %v1954_v29 = vadd.f32 %v1953_v27, %v1952_v38  ;;  %v2389_v8 = vpack.c.bf16 %v1847_v62, %v1847_v62  ;;  %v2010_v18 = vsel %vm437_vm4, %v1983_v17, 0.0  ;;  %v1957_v39 = vsel %vm437_vm4, %v1846_v2, 0.0 }
 0x19e   : > { %v2009_v30 = vadd.f32 %v2008_v12, %v2007_v49  ;;  %v2387_v41 = vpack.c.bf16 %v1845_v25, %v1845_v25  ;;  %v1955_v34 = vsel %vm437_vm4, %v1845_v25, 0.0  ;;  %v1984_v47 = vmul.f32 %v1845_v25, %v1845_v25 }
 0x19f   : > { %1928 = vst.msk [vmem:[%s2877_s9 + $0x3c] sm:$0xf] %vm1912_vm5, %v2389_v8  ;;  %v1956_v33 = vadd.f32 %v1955_v34, %v1954_v29  ;;  %v1986_v11 = vmul.f32 %v1847_v62, %v1847_v62  ;;  %v2014_v13 = vsel %vm437_vm4, %v1985_v60, 0.0  ;;  %v1959_v21 = vsel %vm437_vm4, %v1847_v62, 0.0 }
 0x1a0   : > { %v2011_v36 = vadd.f32 %v2010_v18, %v2009_v30  ;;  %1926 = vst.msk [vmem:[%s2877_s9 + $0x34] sm:$0xf] %vm1912_vm5, %v2387_v41  ;;  %v2012_v4 = vsel %vm437_vm4, %v1984_v47, 0.0 }
 0x1a1   : > { %v1958_v35 = vadd.f32 %v1957_v39, %v1956_v33  ;;  %v2016_v46 = vsel %vm437_vm4, %v1986_v11, 0.0 }
 0x1a2   : > { %v2013_v22 = vadd.f32 %v2012_v4, %v2011_v36 }
 0x1a3   : > { %v1960_v20 = vadd.f32 %v1959_v21, %v1958_v35 }
 0x1a4   : > { %v2015_v23 = vadd.f32 %v2014_v13, %v2013_v22 }
 0x1a5   : > { %v1961_v50 = vrot.slane %v1960_v20, 4 }
 0x1a6   : > { %v2017_v54 = vadd.f32 %v2016_v46, %v2015_v23 }
 0x1a7   : > { %v1962_v52 = vadd.f32 %v1961_v50, %v1960_v20 }
 0x1a8   : > { %v2018_v3 = vrot.slane %v2017_v54, 4 }
 0x1a9   : > { %v1963_v9 = vrot.slane %v1962_v52, 2 }
 0x1aa   : > { %v2019_v58 = vadd.f32 %v2018_v3, %v2017_v54 }
 0x1ab   : > { %v1964_v0 = vadd.f32 %v1963_v9, %v1962_v52 }
 0x1ac   : > { %v2020_v53 = vrot.slane %v2019_v58, 2 }
 0x1ad   : > { %v1965_v48 = vrot.slane %v1964_v0, 1 }
 0x1ae   : > { %v2021_v1 = vadd.f32 %v2020_v53, %v2019_v58 }
 0x1af   : > { %v1966_v42 = vadd.f32 %v1965_v48, %v1964_v0 }
 0x1b0   : > { %v2022_v5 = vrot.slane %v2021_v1, 1 }
 0x1b1   : > { %v1967_v51 = vadd.f32 %v1966_v42, %v1929_v16 }
 0x1b2   : > { %v2023_v14 = vadd.f32 %v2022_v5, %v2021_v1 }
 0x1b3   : > { %1969 = vst.msk [vmem:[%s2872_s6] sm:$0x1] %vm1968_vm6, %v1967_v51 }
 0x1b4   : > { %v2024_v19 = vadd.f32 %v2023_v14, %v1970_v57 }
 0x1b6   : > { %2025 = vst.msk [vmem:[%s2882_s12] sm:$0x1] %vm1968_vm6, %v2024_v19 }
 0x1b7 PF: > { %s15_s19 = sadd.s32 1, %s2803_s19   ;;  %s3560_s15 = smov %s2795_s17 }
 0x1b8   : > { %p12_p8 = scmp.ge.s32.totalorder %s15_s19, 6   ;;  %s3561_s16 = smov %s2799_s18 }
 0x1b9   : > { %s3562_s17 = smov %s3565_s20  ;;  %s3563_s18 = smov %s3569_s21 }
 0x1ba   :  { %14 = sbr.rel (!%p12_p8) target bundleno = 3 (0x3), region = 91 }

// kernel: basic_block_forward.5
= control target key start
LH: loop header
LB: loop body
LE: loop exit
PB: predicated region body
PF: predicated region fallthrough
CT: control target
= control target key end

     0   :  { %s3535_s27 = smov 0   ;;  %s3537_s28 = smov 0   ;;  %s4342_s0 = inlined_call_operand.vmem [shape: bf16[2,16,16,4], index: 0, kind: input, shape index: {}]   ;;  %s4343_s1 = inlined_call_operand.vmem [shape: bf16[36,8], index: 1, kind: input, shape index: {}]   ;;  %s4344_s2 = inlined_call_operand.vmem [shape: bf16[4,8], index: 2, kind: input, shape index: {}]   ;;  %s4345_s3 = inlined_call_operand.vmem [shape: bf16[2,256,8], index: 3, kind: output, shape index: {0}]   ;;  %s4346_s4 = inlined_call_operand.vmem [shape: f32[2,1,8], index: 4, kind: output, shape index: {1}]   ;;  %s4347_s5 = inlined_call_operand.vmem [shape: f32[2,1,8], index: 5, kind: output, shape index: {2}]   ;;  %s4348_s6 = inlined_call_operand.vmem [shape: bf16[2,256,8], index: 6, kind: output, shape index: {3}]   ;;  %s4349_s7 = inlined_call_operand.vmem [shape: f32[2,1,8], index: 7, kind: output, shape index: {4}]   ;;  %s4350_s8 = inlined_call_operand.vmem [shape: f32[2,1,8], index: 8, kind: output, shape index: {5}]  }
   0x1   :  { %s3539_s29 = smov 0   ;;  %s3541_s30 = smov 0  }
   0x2   :  { %s3543_s9 = smov 0  }
   0x3 LB: > { %s28_s10 = sadd.s32 1, %s3479_s29  ;;  %s31_s11 = sadd.s32 1, %s3483_s30  ;;  %s3487_s9 = sphi %s3543_s9, %s19_s9   ;;  %s3483_s30 = sphi %s3541_s30, %s4358_s30   ;;  %s3479_s29 = sphi %s3539_s29, %s4357_s29   ;;  %s3475_s28 = sphi %s3537_s28, %s4356_s28   ;;  %s3471_s27 = sphi %s3535_s27, %s4355_s27  }
   0x4   : > { %p29_p0 = scmp.ge.s32.totalorder %s28_s10, 2  ;;  %p2766_p1 = scmp.ge.s32.totalorder %s3487_s9, 1 }
   0x5   : > { %p289_p2 = scmp.lt.s32.totalorder %s3487_s9, 5 }
   0x6   : > { %s4360_s10 = smov (%p29_p0, %s28_s10), 0  ;;  %s4362_s11 = smov (!%p29_p0, %s31_s11), %s3483_s30 }
   0x7   : > { %4351 = sst [smem:[#allocation3_spill]] %s4360_s10  ;;  %p290_p3 = pnand %p2766_p1, %p289_p2 }
   0x8   : > { %p33_p4 = scmp.ge.s32.totalorder %s4362_s11, 2  ;;  %p348_p5 = scmp.lt.s32.totalorder (!%p290_p3), %s3475_s28, 1 }
   0x9   : > { %293 = sbr.rel (%p290_p3) target bundleno = 465 (0x1d1), region = 32  ;;  %s2769_s12 = sshll.u32 (!%p290_p3), %s3471_s27, 4 }
   0xa   : > { %s4364_s11 = smov (%p33_p4, %s4362_s11), 0  ;;  %p356_p6 = scmp.lt.s32.totalorder (!%p290_p3), %s2769_s12, 31 }
   0xb   : > { %4352 = sst [smem:[#allocation4_spill]] %s4364_s11  ;;  %p2775_p7 = scmp.ne.s32.totalorder (!%p290_p3), %s3471_s27, 0 }
   0xe   : > { %s4366_s28 = smov (!%p348_p5, %s3475_s28), 1  ;;  %s4368_s12 = smov (!%p356_p6, %s2769_s12), 31 }
   0xf   : > { %s3012_s13 = sshll.u32 %s4366_s28, 7  ;;  %s2770_s14 = sshll.u32 %s4366_s28, 5 }
  0x10   : > { %s3571_s17 = scalar_lea.vmem %s4342_s0, %s3012_s13  ;;  %s359_s18 = sadd.s32 %s2770_s14, %s4368_s12 }
  0x11   : > { %s2771_s19 = sshll.u32 %s359_s18, 2  ;;  %s3576_s22 = scalar_lea.vmem %s4346_s4, %s4366_s28 }
  0x12   : > { %s3581_s25 = scalar_lea.vmem %s4345_s3, %s2771_s19  ;;  %s3586_s10 = scalar_lea.vmem %s4347_s5, %s4366_s28 }
  0x13   : > { %s3591_s12 = scalar_lea.vmem %s4348_s6, %s2771_s19  ;;  %s3596_s18 = scalar_lea.vmem %s4349_s7, %s4366_s28 }
  0x14   : > { %s3601_s23 = scalar_lea.vmem %s4350_s8, %s4366_s28  ;;  %389 = sbr.rel (%p2775_p7) target bundleno = 63 (0x3f), region = 36 }
  0x19   : > { %vm390_vm0 = vcmask 31744   ;;  %vm393_vm1 = vcmask 25600   ;;  %vm400_vm2 = vcmask 24576   ;;  %v3046_v0 = vld [vmem:[%s3571_s17] sm:$0xff]   ;;  %v3109_v1 = vld [vmem:[%s3571_s17 + $0x8] sm:$0xff]   ;;  %v3489_v2 = vmov 0.0  }
  0x1a   : > { %391 = vst.msk [vmem:[#allocation2] sm:$0xff] %vm390_vm0, %v3489_v2  ;;  %392 = vst.msk [vmem:[#allocation2 + $0x8] sm:$0xff] %vm390_vm0, %v3489_v2  ;;  %v3047_v3 = vunpack.c.l.bf16 %v3046_v0  ;;  %v3048_v4 = vunpack.c.h.bf16 %v3046_v0  ;;  %v3051_v5 = vunpack.c.l.bf16 %v3109_v1  ;;  %v3052_v6 = vunpack.c.h.bf16 %v3109_v1  ;;  %v3110_v7 = vld [vmem:[%s3571_s17 + $0x10] sm:$0xff]   ;;  %v3111_v8 = vld [vmem:[%s3571_s17 + $0x18] sm:$0xff]  }
  0x1b   : > { %396 = vst.msk [vmem:[#allocation2 + $0x198] sm:$0xff] %vm390_vm0, %v3489_v2  ;;  %397 = vst.msk [vmem:[#allocation2 + $0x1a0] sm:$0xff] %vm390_vm0, %v3489_v2  ;;  %v3112_v9 = vld [vmem:[%s3571_s17 + $0x20] sm:$0xff]   ;;  %v3055_v10 = vunpack.c.l.bf16 %v3110_v7  ;;  %v3056_v11 = vunpack.c.h.bf16 %v3110_v7  ;;  %v3059_v12 = vunpack.c.l.bf16 %v3111_v8  ;;  %v3060_v13 = vunpack.c.h.bf16 %v3111_v8  ;;  %v3113_v14 = vld [vmem:[%s3571_s17 + $0x28] sm:$0xff]  }
  0x1c   : > { %394 = vst.msk [vmem:[#allocation2 + $0x10] sm:$0x3] %vm393_vm1, %v3489_v2  ;;  %398 = vst.msk [vmem:[#allocation2 + $0x1a8] sm:$0x3] %vm393_vm1, %v3489_v2  ;;  %v3114_v15 = vld [vmem:[%s3571_s17 + $0x30] sm:$0xff]   ;;  %v3115_v16 = vld [vmem:[%s3571_s17 + $0x38] sm:$0xff]   ;;  %v3063_v17 = vunpack.c.l.bf16 %v3112_v9  ;;  %v3064_v18 = vunpack.c.h.bf16 %v3112_v9  ;;  %v3067_v19 = vunpack.c.l.bf16 %v3113_v14  ;;  %v3068_v20 = vunpack.c.h.bf16 %v3113_v14 }
  0x1d   : > { %401 = vst.msk [vmem:[#allocation2 + $0x18] sm:$0x1] %vm400_vm2, %v3489_v2  ;;  %402 = vst.msk [vmem:[#allocation2 + $0x30] sm:$0x1] %vm400_vm2, %v3489_v2  ;;  %v3116_v21 = vld [vmem:[%s3571_s17 + $0x40] sm:$0xff]   ;;  %v3117_v22 = vld [vmem:[%s3571_s17 + $0x48] sm:$0xff]   ;;  %v3071_v24 = vunpack.c.l.bf16 %v3114_v15  ;;  %v3072_v25 = vunpack.c.h.bf16 %v3114_v15  ;;  %v3075_v26 = vunpack.c.l.bf16 %v3115_v16  ;;  %v3076_v27 = vunpack.c.h.bf16 %v3115_v16 }
  0x1e   : > { %403 = vst.msk [vmem:[#allocation2 + $0x48] sm:$0x1] %vm400_vm2, %v3489_v2  ;;  %404 = vst.msk [vmem:[#allocation2 + $0x60] sm:$0x1] %vm400_vm2, %v3489_v2  ;;  %v3118_v23 = vld [vmem:[%s3571_s17 + $0x50] sm:$0xff]   ;;  %v3119_v28 = vld [vmem:[%s3571_s17 + $0x58] sm:$0xff]   ;;  %v3079_v31 = vunpack.c.l.bf16 %v3116_v21  ;;  %v3080_v32 = vunpack.c.h.bf16 %v3116_v21  ;;  %v3083_v33 = vunpack.c.l.bf16 %v3117_v22  ;;  %v3084_v34 = vunpack.c.h.bf16 %v3117_v22 }
  0x1f   : > { %405 = vst.msk [vmem:[#allocation2 + $0x78] sm:$0x1] %vm400_vm2, %v3489_v2  ;;  %406 = vst.msk [vmem:[#allocation2 + $0x90] sm:$0x1] %vm400_vm2, %v3489_v2  ;;  %v3120_v29 = vld [vmem:[%s3571_s17 + $0x60] sm:$0xff]   ;;  %v3121_v30 = vld [vmem:[%s3571_s17 + $0x68] sm:$0xff]   ;;  %v3087_v37 = vunpack.c.l.bf16 %v3118_v23  ;;  %v3088_v38 = vunpack.c.h.bf16 %v3118_v23  ;;  %v3091_v39 = vunpack.c.l.bf16 %v3119_v28  ;;  %v3092_v40 = vunpack.c.h.bf16 %v3119_v28 }
  0x20   : > { %407 = vst.msk [vmem:[#allocation2 + $0xa8] sm:$0x1] %vm400_vm2, %v3489_v2  ;;  %408 = vst.msk [vmem:[#allocation2 + $0xc0] sm:$0x1] %vm400_vm2, %v3489_v2  ;;  %v3122_v35 = vld [vmem:[%s3571_s17 + $0x70] sm:$0xff]   ;;  %v3123_v36 = vld [vmem:[%s3571_s17 + $0x78] sm:$0xff]   ;;  %v3095_v41 = vunpack.c.l.bf16 %v3120_v29  ;;  %v3096_v42 = vunpack.c.h.bf16 %v3120_v29  ;;  %v3099_v43 = vunpack.c.l.bf16 %v3121_v30  ;;  %v3100_v44 = vunpack.c.h.bf16 %v3121_v30 }
  0x21   : > { %409 = vst.msk [vmem:[#allocation2 + $0xd8] sm:$0x1] %vm400_vm2, %v3489_v2  ;;  %410 = vst.msk [vmem:[#allocation2 + $0xf0] sm:$0x1] %vm400_vm2, %v3489_v2  ;;  %v3103_v45 = vunpack.c.l.bf16 %v3122_v35  ;;  %v3104_v46 = vunpack.c.h.bf16 %v3122_v35  ;;  %v3107_v47 = vunpack.c.l.bf16 %v3123_v36  ;;  %v3108_v48 = vunpack.c.h.bf16 %v3123_v36 }
  0x22   : > { %411 = vst.msk [vmem:[#allocation2 + $0x108] sm:$0x1] %vm400_vm2, %v3489_v2  ;;  %412 = vst.msk [vmem:[#allocation2 + $0x120] sm:$0x1] %vm400_vm2, %v3489_v2  ;;  %vm529_vm3 = vcmask 57344  }
  0x23   : > { %413 = vst.msk [vmem:[#allocation2 + $0x138] sm:$0x1] %vm400_vm2, %v3489_v2  ;;  %414 = vst.msk [vmem:[#allocation2 + $0x150] sm:$0x1] %vm400_vm2, %v3489_v2 }
  0x24   : > { %415 = vst.msk [vmem:[#allocation2 + $0x168] sm:$0x1] %vm400_vm2, %v3489_v2  ;;  %416 = vst.msk [vmem:[#allocation2 + $0x180] sm:$0x1] %vm400_vm2, %v3489_v2 }
  0x25   : > { %417 = vst.msk [vmem:[#allocation2 + $0x29] sm:$0x1] %vm400_vm2, %v3489_v2  ;;  %418 = vst.msk [vmem:[#allocation2 + $0x41] sm:$0x1] %vm400_vm2, %v3489_v2 }
  0x26   : > { %419 = vst.msk [vmem:[#allocation2 + $0x59] sm:$0x1] %vm400_vm2, %v3489_v2  ;;  %420 = vst.msk [vmem:[#allocation2 + $0x71] sm:$0x1] %vm400_vm2, %v3489_v2 }
  0x27   : > { %421 = vst.msk [vmem:[#allocation2 + $0x89] sm:$0x1] %vm400_vm2, %v3489_v2  ;;  %422 = vst.msk [vmem:[#allocation2 + $0xa1] sm:$0x1] %vm400_vm2, %v3489_v2 }
  0x28   : > { %423 = vst.msk [vmem:[#allocation2 + $0xb9] sm:$0x1] %vm400_vm2, %v3489_v2  ;;  %424 = vst.msk [vmem:[#allocation2 + $0xd1] sm:$0x1] %vm400_vm2, %v3489_v2 }
  0x29   : > { %425 = vst.msk [vmem:[#allocation2 + $0xe9] sm:$0x1] %vm400_vm2, %v3489_v2  ;;  %426 = vst.msk [vmem:[#allocation2 + $0x101] sm:$0x1] %vm400_vm2, %v3489_v2 }
  0x2a   : > { %427 = vst.msk [vmem:[#allocation2 + $0x119] sm:$0x1] %vm400_vm2, %v3489_v2  ;;  %428 = vst.msk [vmem:[#allocation2 + $0x131] sm:$0x1] %vm400_vm2, %v3489_v2 }
  0x2b   : > { %429 = vst.msk [vmem:[#allocation2 + $0x149] sm:$0x1] %vm400_vm2, %v3489_v2  ;;  %430 = vst.msk [vmem:[#allocation2 + $0x161] sm:$0x1] %vm400_vm2, %v3489_v2 }
  0x2c   : > { %431 = vst.msk [vmem:[#allocation2 + $0x179] sm:$0x1] %vm400_vm2, %v3489_v2  ;;  %432 = vst.msk [vmem:[#allocation2 + $0x191] sm:$0x1] %vm400_vm2, %v3489_v2 }
  0x2d   : > { %497 = vst.msk [vmem:[#allocation2 + $0x19] sm:$0xff] %vm390_vm0, %v3047_v3  ;;  %498 = vst.msk [vmem:[#allocation2 + $0x21] sm:$0xff] %vm390_vm0, %v3048_v4 }
  0x2e   : > { %499 = vst.msk [vmem:[#allocation2 + $0x31] sm:$0xff] %vm390_vm0, %v3051_v5  ;;  %500 = vst.msk [vmem:[#allocation2 + $0x39] sm:$0xff] %vm390_vm0, %v3052_v6 }
  0x2f   : > { %501 = vst.msk [vmem:[#allocation2 + $0x49] sm:$0xff] %vm390_vm0, %v3055_v10  ;;  %502 = vst.msk [vmem:[#allocation2 + $0x51] sm:$0xff] %vm390_vm0, %v3056_v11 }
  0x30   : > { %503 = vst.msk [vmem:[#allocation2 + $0x61] sm:$0xff] %vm390_vm0, %v3059_v12  ;;  %504 = vst.msk [vmem:[#allocation2 + $0x69] sm:$0xff] %vm390_vm0, %v3060_v13 }
  0x31   : > { %505 = vst.msk [vmem:[#allocation2 + $0x79] sm:$0xff] %vm390_vm0, %v3063_v17  ;;  %506 = vst.msk [vmem:[#allocation2 + $0x81] sm:$0xff] %vm390_vm0, %v3064_v18 }
  0x32   : > { %507 = vst.msk [vmem:[#allocation2 + $0x91] sm:$0xff] %vm390_vm0, %v3067_v19  ;;  %508 = vst.msk [vmem:[#allocation2 + $0x99] sm:$0xff] %vm390_vm0, %v3068_v20 }
  0x33   : > { %509 = vst.msk [vmem:[#allocation2 + $0xa9] sm:$0xff] %vm390_vm0, %v3071_v24  ;;  %510 = vst.msk [vmem:[#allocation2 + $0xb1] sm:$0xff] %vm390_vm0, %v3072_v25 }
  0x34   : > { %511 = vst.msk [vmem:[#allocation2 + $0xc1] sm:$0xff] %vm390_vm0, %v3075_v26  ;;  %512 = vst.msk [vmem:[#allocation2 + $0xc9] sm:$0xff] %vm390_vm0, %v3076_v27 }
  0x35   : > { %513 = vst.msk [vmem:[#allocation2 + $0xd9] sm:$0xff] %vm390_vm0, %v3079_v31  ;;  %514 = vst.msk [vmem:[#allocation2 + $0xe1] sm:$0xff] %vm390_vm0, %v3080_v32 }
  0x36   : > { %515 = vst.msk [vmem:[#allocation2 + $0xf1] sm:$0xff] %vm390_vm0, %v3083_v33  ;;  %516 = vst.msk [vmem:[#allocation2 + $0xf9] sm:$0xff] %vm390_vm0, %v3084_v34 }
  0x37   : > { %517 = vst.msk [vmem:[#allocation2 + $0x109] sm:$0xff] %vm390_vm0, %v3087_v37  ;;  %518 = vst.msk [vmem:[#allocation2 + $0x111] sm:$0xff] %vm390_vm0, %v3088_v38 }
  0x38   : > { %519 = vst.msk [vmem:[#allocation2 + $0x121] sm:$0xff] %vm390_vm0, %v3091_v39  ;;  %520 = vst.msk [vmem:[#allocation2 + $0x129] sm:$0xff] %vm390_vm0, %v3092_v40 }
  0x39   : > { %521 = vst.msk [vmem:[#allocation2 + $0x139] sm:$0xff] %vm390_vm0, %v3095_v41  ;;  %522 = vst.msk [vmem:[#allocation2 + $0x141] sm:$0xff] %vm390_vm0, %v3096_v42 }
  0x3a   : > { %523 = vst.msk [vmem:[#allocation2 + $0x151] sm:$0xff] %vm390_vm0, %v3099_v43  ;;  %524 = vst.msk [vmem:[#allocation2 + $0x159] sm:$0xff] %vm390_vm0, %v3100_v44 }
  0x3b   : > { %525 = vst.msk [vmem:[#allocation2 + $0x169] sm:$0xff] %vm390_vm0, %v3103_v45  ;;  %526 = vst.msk [vmem:[#allocation2 + $0x171] sm:$0xff] %vm390_vm0, %v3104_v46 }
  0x3c   : > { %527 = vst.msk [vmem:[#allocation2 + $0x181] sm:$0xff] %vm390_vm0, %v3107_v47  ;;  %528 = vst.msk [vmem:[#allocation2 + $0x189] sm:$0xff] %vm390_vm0, %v3108_v48 }
  0x3d   : > { %530 = vst.msk [vmem:[%s3576_s22] sm:$0x1] %vm529_vm3, %v3489_v2  ;;  %531 = vst.msk [vmem:[%s3586_s10] sm:$0x1] %vm529_vm3, %v3489_v2 }
  0x3e   : > { %532 = vst.msk [vmem:[%s3596_s18] sm:$0x1] %vm529_vm3, %v3489_v2  ;;  %533 = vst.msk [vmem:[%s3601_s23] sm:$0x1] %vm529_vm3, %v3489_v2 }
  0x3f PF: > { %v553_v49 = vld [vmem:[%s4343_s1] sm:$0x3]  ;;  %vm616_vm4 = vcmask 1041408   ;;  %s2777_s17 = smul.u32 192, %s3471_s27  ;;  %v857_v52 = vld [vmem:[%s4343_s1 + $0x4] sm:$0x3] }
  0x40   : > { %3395 = vmatprep.subr.msk.bf16.mxu1 %vm616_vm4, %v553_v49  ;;  %v742_v50 = vsel %vm616_vm4, %v553_v49, 0  ;;  %v3445_v51 = vld [vmem:[%s4343_s1] ss:$0 sps:$4 sm:$0xcc]   ;;  %vm591_vm5 = vcmask 31744   ;;  %v891_v6 = vsel %vm616_vm4, %v857_v52, 0 }
  0x41   : > { %3233 = vmatpush3.bf16.msra.mxu1 %v742_v50  ;;  %v590_v53 = vrot.slane %v3445_v51, 2  ;;  %s3746_s13 = scalar_lea.vmem [#allocation2], %s2777_s17  ;;  %v3446_v2 = vld [vmem:[%s4343_s1 + $0x4] ss:$0 sps:$4 sm:$0xcc]   ;;  %vm2078_vm6 = vcmask 60416  }
  0x42   : > { %v1037_v7 = vrot.slane %v3446_v2, 2  ;;  %v1194_v25 = vld [vmem:[%s4343_s1 + $0x8] sm:$0x3]  ;;  %v3448_v49 = vld [vmem:[%s4343_s1 + $0xc] ss:$0 sps:$4 sm:$0xcc]  }
  0x43   : > { %v537_v54 = vld [vmem:[%s3746_s13] sm:$0xff]  ;;  %v538_v55 = vld [vmem:[%s3746_s13 + $0x8] sm:$0xff]  ;;  %v539_v56 = vld [vmem:[%s3746_s13 + $0x18] sm:$0xff]  ;;  %3394 = vmatprep.subr.msk.bf16.mxu0 %vm616_vm4, %v590_v53  ;;  %v618_v61 = vsel %vm616_vm4, %v590_v53, 0  ;;  %vm2096_vm7 = vcmask 64512   ;;  %vm2135_vm8 = vcmask 57344  }
  0x44   : > { %v554_v57 = vpack.c.bf16 %v538_v55, %v537_v54  ;;  %v540_v58 = vld [vmem:[%s3746_s13 + $0x20] sm:$0xff]  ;;  %v563_v60 = vld [vmem:[%s3746_s13 + $0x9] sm:$0xff]  ;;  %3215 = vmatpush3.bf16.msra.mxu0 %v618_v61  ;;  %v542_v5 = vld [vmem:[%s3746_s13 + $0x38] sm:$0xff]  ;;  %3397 = vmatprep.subr.msk.bf16.mxu1 %vm616_vm4, %v1037_v7  ;;  %v1063_v14 = vsel %vm616_vm4, %v1037_v7, 0 }
  0x45   : > { %v562_v59 = vld [vmem:[%s3746_s13 + $0x1] sm:$0xff]  ;;  %v3756_v62 = vpack.c.bf16 %v540_v58, %v539_v56  ;;  %v564_v0 = vld [vmem:[%s3746_s13 + $0x19] sm:$0xff]  ;;  %v541_v4 = vld [vmem:[%s3746_s13 + $0x30] sm:$0xff]  ;;  %3396 = vmatprep.subr.msk.bf16.mxu0 %vm616_vm4, %v857_v52  ;;  %v1708_v56 = vrot.slane %v3448_v49, 2  ;;  %v1228_v58 = vsel %vm616_vm4, %v1194_v25, 0 }
  0x46   : > { %v579_v63 = vpack.c.bf16 %v563_v60, %v562_v59  ;;  %v565_v1 = vld [vmem:[%s3746_s13 + $0x21] sm:$0xff]  ;;  %3234 = vmatprep.mubr.msk.bf16.mxu1 %vm591_vm5, %v554_v57  ;;  %v3772_v8 = vpack.c.bf16 %v542_v5, %v541_v4  ;;  %v566_v9 = vld [vmem:[%s3746_s13 + $0x31] sm:$0xff]  ;;  %v567_v10 = vld [vmem:[%s3746_s13 + $0x39] sm:$0xff] }
  0x47   : > { %v3764_v3 = vpack.c.bf16 %v565_v1, %v564_v0  ;;  %3235 = vmatmul.mubr.msk.bf16.vlgmr.msra.gmra.mxu1 %vm591_vm5, %v3756_v62  ;;  %v543_v11 = vld [vmem:[%s3746_s13 + $0x48] sm:$0xff]  ;;  %v544_v12 = vld [vmem:[%s3746_s13 + $0x50] sm:$0xff]  ;;  %v3779_v13 = vpack.c.bf16 %v567_v10, %v566_v9  ;;  %v545_v15 = vld [vmem:[%s3746_s13 + $0x60] sm:$0xff] }
  0x48   : > { %3216 = vmatprep.mubr.msk.bf16.mxu0 %vm591_vm5, %v579_v63  ;;  %v546_v16 = vld [vmem:[%s3746_s13 + $0x68] sm:$0xff]  ;;  %3269 = vmatpush3.bf16.msra.mxu1 %v1063_v14  ;;  %v569_v18 = vld [vmem:[%s3746_s13 + $0x51] sm:$0xff]  ;;  %v3791_v19 = vpack.c.bf16 %v544_v12, %v543_v11  ;;  %v548_v27 = vld [vmem:[%s3746_s13 + $0x80] sm:$0xff] }
  0x49   : > { %3217 = vmatmul.mubr.msk.bf16.vlgmr.msra.gmra.mxu0 %vm591_vm5, %v3764_v3  ;;  %v568_v17 = vld [vmem:[%s3746_s13 + $0x49] sm:$0xff]  ;;  %3238 = vmatprep.mubr.msk.bf16.mxu1 %vm591_vm5, %v3772_v8  ;;  %v570_v20 = vld [vmem:[%s3746_s13 + $0x61] sm:$0xff]  ;;  %v3797_v22 = vpack.c.bf16 %v546_v16, %v545_v15  ;;  %v547_v26 = vld [vmem:[%s3746_s13 + $0x78] sm:$0xff] }
  0x4a   : > { %3251 = vmatpush3.bf16.msra.mxu0 %v891_v6  ;;  %3220 = vmatprep.mubr.msk.bf16.mxu0 %vm591_vm5, %v3779_v13  ;;  %v571_v21 = vld [vmem:[%s3746_s13 + $0x69] sm:$0xff]  ;;  %v3799_v23 = vpack.c.bf16 %v569_v18, %v568_v17  ;;  %v3447_v28 = vld [vmem:[%s4343_s1 + $0x8] ss:$0 sps:$4 sm:$0xcc]   ;;  %v550_v30 = vld [vmem:[%s3746_s13 + $0x98] sm:$0xff]  ;;  %v3824_v34 = vpack.c.bf16 %v548_v27, %v547_v26  ;;  %v1734_v17 = vsel %vm616_vm4, %v1708_v56, 0 }
  0x4b   : > { %v3801_v24 = vpack.c.bf16 %v571_v21, %v570_v20  ;;  %3398 = vmatprep.subr.msk.bf16.mxu0 %vm616_vm4, %v1194_v25  ;;  %v549_v29 = vld [vmem:[%s3746_s13 + $0x90] sm:$0xff]  ;;  %v572_v31 = vld [vmem:[%s3746_s13 + $0x79] sm:$0xff]  ;;  %v573_v32 = vld [vmem:[%s3746_s13 + $0x81] sm:$0xff]  ;;  %v1371_v33 = vrot.slane %v3447_v28, 2 }
  0x4c   : > { %v574_v35 = vld [vmem:[%s3746_s13 + $0x91] sm:$0xff]  ;;  %v575_v36 = vld [vmem:[%s3746_s13 + $0x99] sm:$0xff]  ;;  %v3828_v37 = vpack.c.bf16 %v550_v30, %v549_v29  ;;  %v3831_v38 = vpack.c.bf16 %v573_v32, %v572_v31  ;;  %v551_v40 = vld [vmem:[%s3746_s13 + $0xa8] sm:$0xff] }
  0x4d   : > { %3399 = vmatprep.subr.msk.bf16.mxu1 %vm616_vm4, %v1371_v33  ;;  %v3833_v39 = vpack.c.bf16 %v575_v36, %v574_v35  ;;  %v552_v41 = vld [vmem:[%s3746_s13 + $0xb0] sm:$0xff]  ;;  %v841_v45 = vld [vmem:[%s3746_s13 + $0x2] sm:$0xff]  ;;  %v843_v50 = vld [vmem:[%s3746_s13 + $0x1a] sm:$0xff]  ;;  %v1397_v55 = vsel %vm616_vm4, %v1371_v33, 0 }
  0x4e   : > { %v576_v42 = vld [vmem:[%s3746_s13 + $0xa9] sm:$0xff]  ;;  %v577_v43 = vld [vmem:[%s3746_s13 + $0xb1] sm:$0xff]  ;;  %v3847_v44 = vpack.c.bf16 %v552_v41, %v551_v40  ;;  %v846_v53 = vld [vmem:[%s3746_s13 + $0x3a] sm:$0xff] }
  0x4f   : > { %3239 = vmatmul.mubr.msk.bf16.gmra.mxu1 %vm591_vm5, %v3791_v19  ;;  %v842_v46 = vld [vmem:[%s3746_s13 + $0xa] sm:$0xff]  ;;  %v3851_v47 = vpack.c.bf16 %v577_v43, %v576_v42  ;;  %v844_v51 = vld [vmem:[%s3746_s13 + $0x22] sm:$0xff]  ;;  %v845_v52 = vld [vmem:[%s3746_s13 + $0x32] sm:$0xff] }
  0x50   : > { %3242 = vmatprep.mubr.msk.bf16.mxu1 %vm591_vm5, %v3797_v22  ;;  %v858_v48 = vpack.c.bf16 %v842_v46, %v841_v45  ;;  %v859_v54 = vpack.c.bf16 %v844_v51, %v843_v50  ;;  %v3868_v57 = vpack.c.bf16 %v846_v53, %v845_v52  ;;  %v1531_v59 = vld [vmem:[%s4343_s1 + $0xc] sm:$0x3]  ;;  %v848_v61 = vld [vmem:[%s3746_s13 + $0x52] sm:$0xff]  ;;  %v851_v2 = vld [vmem:[%s3746_s13 + $0x7a] sm:$0xff] }
  0x51   : > { %3221 = vmatmul.mubr.msk.bf16.gmra.mxu0 %vm591_vm5, %v3799_v23  ;;  %v847_v60 = vld [vmem:[%s3746_s13 + $0x4a] sm:$0xff]  ;;  %v852_v4 = vld [vmem:[%s3746_s13 + $0x82] sm:$0xff]  ;;  %v853_v5 = vld [vmem:[%s3746_s13 + $0x92] sm:$0xff]  ;;  %v1565_v20 = vsel %vm616_vm4, %v1531_v59, 0 }
  0x52   : > { %3224 = vmatprep.mubr.msk.bf16.mxu0 %vm591_vm5, %v3801_v24  ;;  %v850_v63 = vld [vmem:[%s3746_s13 + $0x6a] sm:$0xff]  ;;  %v3887_v0 = vpack.c.bf16 %v848_v61, %v847_v60  ;;  %v854_v6 = vld [vmem:[%s3746_s13 + $0x9a] sm:$0xff]  ;;  %v3903_v7 = vpack.c.bf16 %v852_v4, %v851_v2  ;;  %v856_v14 = vld [vmem:[%s3746_s13 + $0xb2] sm:$0xff] }
  0x53   : > { %v3905_v9 = vpack.c.bf16 %v854_v6, %v853_v5  ;;  %v2819_v10 = vld [vmem:[%s3746_s13 + $0xc0] sm:$0xff]  ;;  %v2820_v11 = vld [vmem:[%s3746_s13 + $0xc8] sm:$0xff]  ;;  %v1865_v21 = vld [vmem:[%s4343_s1 + $0x10] sm:$0x3] }
  0x54   : > { %v855_v12 = vld [vmem:[%s3746_s13 + $0xaa] sm:$0xff]  ;;  %v1033_v15 = vpack.c.bf16 %v2820_v11, %v2819_v10  ;;  %v2217_v18 = vld [vmem:[%s4344_s2] sm:$0x3]  ;;  %v2868_v25 = vld [vmem:[%s3746_s13 + $0xc2] sm:$0xff]  ;;  %v1899_v32 = vsel %vm616_vm4, %v1865_v21, 0 }
  0x55   : > { %v3919_v16 = vpack.c.bf16 %v856_v14, %v855_v12  ;;  %v2869_v26 = vld [vmem:[%s3746_s13 + $0xca] sm:$0xff]  ;;  %v2844_v27 = vld [vmem:[%s3746_s13 + $0xc1] sm:$0xff]  ;;  %v2243_v31 = vsel %vm616_vm4, %v2217_v18, 0 }
  0x56   : > { %v2845_v28 = vld [vmem:[%s3746_s13 + $0xc9] sm:$0xff]  ;;  %v1367_v29 = vpack.c.bf16 %v2869_v26, %v2868_v25  ;;  %v2896_v33 = vld [vmem:[%s3746_s13 + $0xe0] sm:$0xff] }
  0x57   : > { %3243 = vmatmul.mubr.msk.bf16.gmra.mxu1 %vm591_vm5, %v3824_v34  ;;  %v1202_v30 = vpack.c.bf16 %v2845_v28, %v2844_v27 }
  0x58   : > { %3246 = vmatprep.mubr.msk.bf16.mxu1 %vm591_vm5, %v3828_v37 }
  0x59   : > { %3225 = vmatmul.mubr.msk.bf16.gmra.mxu0 %vm591_vm5, %v3831_v38 }
  0x5a   : > { %3228 = vmatprep.mubr.msk.bf16.mxu0 %vm591_vm5, %v3833_v39 }
  0x5f   : > { %3247 = vmatmul.mubr.msk.bf16.gmra.mxu1 %vm591_vm5, %v3847_v44 }
  0x60   : > { %3270 = vmatprep.mubr.msk.bf16.mxu1 %vm591_vm5, %v3756_v62  ;;  %v849_v62 = vld [vmem:[%s3746_s13 + $0x62] sm:$0xff] }
  0x61   : > { %3229 = vmatmul.mubr.msk.bf16.gmra.mxu0 %vm591_vm5, %v3851_v47  ;;  %v3889_v1 = vpack.c.bf16 %v850_v63, %v849_v62 }
  0x62   : > { %3252 = vmatprep.mubr.msk.bf16.mxu0 %vm591_vm5, %v858_v48 }
  0x67   : > { %3271 = vmatmul.mubr.msk.bf16.vlgmr.msra.gmra.mxu1 %vm591_vm5, %v3772_v8 }
  0x68   : > { %3305 = vmatpush3.bf16.msra.mxu1 %v1397_v55  ;;  %3274 = vmatprep.mubr.msk.bf16.mxu1 %vm591_vm5, %v3791_v19 }
  0x69   : > { %3253 = vmatmul.mubr.msk.bf16.vlgmr.msra.gmra.mxu0 %vm591_vm5, %v859_v54  ;;  %3401 = vmatprep.subr.msk.bf16.mxu1 %vm616_vm4, %v1708_v56 }
  0x6a   : > { %3287 = vmatpush3.bf16.msra.mxu0 %v1228_v58  ;;  %3256 = vmatprep.mubr.msk.bf16.mxu0 %vm591_vm5, %v3868_v57 }
  0x6b   : > { %3400 = vmatprep.subr.msk.bf16.mxu0 %vm616_vm4, %v1531_v59 }
  0x6f   : > { %3275 = vmatmul.mubr.msk.bf16.gmra.mxu1 %vm591_vm5, %v3797_v22 }
  0x70   : > { %3278 = vmatprep.mubr.msk.bf16.mxu1 %vm591_vm5, %v3824_v34 }
  0x71   : > { %3257 = vmatmul.mubr.msk.bf16.gmra.mxu0 %vm591_vm5, %v3887_v0 }
  0x72   : > { %3260 = vmatprep.mubr.msk.bf16.mxu0 %vm591_vm5, %v3889_v1 }
  0x77   : > { %3279 = vmatmul.mubr.msk.bf16.gmra.mxu1 %vm591_vm5, %v3828_v37 }
  0x78   : > { %3282 = vmatprep.mubr.msk.bf16.mxu1 %vm591_vm5, %v3847_v44 }
  0x79   : > { %3261 = vmatmul.mubr.msk.bf16.gmra.mxu0 %vm591_vm5, %v3903_v7 }
  0x7a   : > { %3264 = vmatprep.mubr.msk.bf16.mxu0 %vm591_vm5, %v3905_v9 }
  0x7f   : > { %3283 = vmatmul.mubr.msk.bf16.gmra.mxu1 %vm591_vm5, %v1033_v15 }
  0x80   : > { %3306 = vmatprep.mubr.msk.bf16.mxu1 %vm591_vm5, %v859_v54 }
  0x81   : > { %3265 = vmatmul.mubr.msk.bf16.gmra.mxu0 %vm591_vm5, %v3919_v16 }
  0x82   : > { %3288 = vmatprep.mubr.msk.bf16.mxu0 %vm591_vm5, %v3764_v3 }
  0x87   : > { %3307 = vmatmul.mubr.msk.bf16.vlgmr.msra.gmra.mxu1 %vm591_vm5, %v3868_v57 }
  0x88   : > { %3341 = vmatpush3.bf16.msra.mxu1 %v1734_v17  ;;  %3310 = vmatprep.mubr.msk.bf16.mxu1 %vm591_vm5, %v3887_v0 }
  0x89   : > { %3289 = vmatmul.mubr.msk.bf16.vlgmr.msra.gmra.mxu0 %vm591_vm5, %v3779_v13  ;;  %3403 = vmatprep.subr.msk.bf16.mxu1 %vm616_vm4, %v2217_v18 }
  0x8a   : > { %3323 = vmatpush3.bf16.msra.mxu0 %v1565_v20  ;;  %3292 = vmatprep.mubr.msk.bf16.mxu0 %vm591_vm5, %v3799_v23 }
  0x8b   : > { %3402 = vmatprep.subr.msk.bf16.mxu0 %vm616_vm4, %v1865_v21 }
  0x8f   : > { %3311 = vmatmul.mubr.msk.bf16.gmra.mxu1 %vm591_vm5, %v3889_v1 }
  0x90   : > { %3314 = vmatprep.mubr.msk.bf16.mxu1 %vm591_vm5, %v3903_v7 }
  0x91   : > { %3293 = vmatmul.mubr.msk.bf16.gmra.mxu0 %vm591_vm5, %v3801_v24 }
  0x92   : > { %3296 = vmatprep.mubr.msk.bf16.mxu0 %vm591_vm5, %v3831_v38 }
  0x97   : > { %3315 = vmatmul.mubr.msk.bf16.gmra.mxu1 %vm591_vm5, %v3905_v9 }
  0x98   : > { %3318 = vmatprep.mubr.msk.bf16.mxu1 %vm591_vm5, %v3919_v16 }
  0x99   : > { %3297 = vmatmul.mubr.msk.bf16.gmra.mxu0 %vm591_vm5, %v3833_v39 }
  0x9a   : > { %3300 = vmatprep.mubr.msk.bf16.mxu0 %vm591_vm5, %v3851_v47 }
  0x9f   : > { %3319 = vmatmul.mubr.msk.bf16.gmra.mxu1 %vm591_vm5, %v1367_v29 }
  0xa0   : > { %3342 = vmatprep.mubr.msk.bf16.mxu1 %vm591_vm5, %v3779_v13 }
  0xa1   : > { %3301 = vmatmul.mubr.msk.bf16.gmra.mxu0 %vm591_vm5, %v1202_v30 }
  0xa2   : > { %3324 = vmatprep.mubr.msk.bf16.mxu0 %vm591_vm5, %v3772_v8  ;;  %v2919_v8 = vld [vmem:[%s3746_s13 + $0xd9] sm:$0xff] }
  0xa7   : > { %3343 = vmatmul.mubr.msk.bf16.vlgmr.msra.gmra.mxu1 %vm591_vm5, %v3799_v23 }
  0xa8   : > { %3377 = vmatpush3.bf16.msra.mxu1 %v2243_v31  ;;  %3346 = vmatprep.mubr.msk.bf16.mxu1 %vm591_vm5, %v3801_v24 }
  0xa9   : > { %3325 = vmatmul.mubr.msk.bf16.vlgmr.msra.gmra.mxu0 %vm591_vm5, %v3791_v19  ;;  %v2920_v19 = vld [vmem:[%s3746_s13 + $0xe1] sm:$0xff] }
  0xaa   : > { %3359 = vmatpush3.bf16.msra.mxu0 %v1899_v32  ;;  %3328 = vmatprep.mubr.msk.bf16.mxu0 %vm591_vm5, %v3797_v22  ;;  %v2895_v22 = vld [vmem:[%s3746_s13 + $0xd8] sm:$0xff]  ;;  %v1704_v35 = vpack.c.bf16 %v2920_v19, %v2919_v8 }
  0xab   : > { %v1539_v36 = vpack.c.bf16 %v2896_v33, %v2895_v22 }
  0xaf   : > { %3347 = vmatmul.mubr.msk.bf16.gmra.mxu1 %vm591_vm5, %v3831_v38 }
  0xb0   : > { %3350 = vmatprep.mubr.msk.bf16.mxu1 %vm591_vm5, %v3833_v39 }
  0xb1   : > { %3329 = vmatmul.mubr.msk.bf16.gmra.mxu0 %vm591_vm5, %v3824_v34 }
  0xb2   : > { %3332 = vmatprep.mubr.msk.bf16.mxu0 %vm591_vm5, %v3828_v37 }
  0xb7   : > { %3351 = vmatmul.mubr.msk.bf16.gmra.mxu1 %vm591_vm5, %v3851_v47 }
  0xb8   : > { %3354 = vmatprep.mubr.msk.bf16.mxu1 %vm591_vm5, %v1202_v30 }
  0xb9   : > { %3333 = vmatmul.mubr.msk.bf16.gmra.mxu0 %vm591_vm5, %v3847_v44 }
  0xba   : > { %3336 = vmatprep.mubr.msk.bf16.mxu0 %vm591_vm5, %v1033_v15 }
  0xbf   : > { %3355 = vmatmul.mubr.msk.bf16.gmra.mxu1 %vm591_vm5, %v1704_v35 }
  0xc0   : > { %3378 = vmatprep.mubr.msk.bf16.mxu1 %vm591_vm5, %v3764_v3  ;;  %v2944_v3 = vld [vmem:[%s3746_s13 + $0xda] sm:$0xff] }
  0xc1   : > { %3337 = vmatmul.mubr.msk.bf16.gmra.mxu0 %vm591_vm5, %v1539_v36 }
  0xc2   : > { %3360 = vmatprep.mubr.msk.bf16.mxu0 %vm591_vm5, %v3868_v57 }
  0xc7   : > { %3379 = vmatmul.mubr.msk.bf16.vlgmr.msra.gmra.mxu1 %vm591_vm5, %v3779_v13  ;;  %v2945_v13 = vld [vmem:[%s3746_s13 + $0xe2] sm:$0xff] }
  0xc8   : > { %3382 = vmatprep.mubr.msk.bf16.mxu1 %vm591_vm5, %v3799_v23  ;;  %v1873_v23 = vpack.c.bf16 %v2945_v13, %v2944_v3 }
  0xc9   : > { %3361 = vmatmul.mubr.msk.bf16.vlgmr.msra.gmra.mxu0 %vm591_vm5, %v3887_v0 }
  0xca   : > { %3364 = vmatprep.mubr.msk.bf16.mxu0 %vm591_vm5, %v3889_v1 }
  0xcf   : > { %3383 = vmatmul.mubr.msk.bf16.gmra.mxu1 %vm591_vm5, %v3801_v24 }
  0xd0   : > { %3386 = vmatprep.mubr.msk.bf16.mxu1 %vm591_vm5, %v3831_v38 }
  0xd1   : > { %3365 = vmatmul.mubr.msk.bf16.gmra.mxu0 %vm591_vm5, %v3903_v7 }
  0xd2   : > { %3368 = vmatprep.mubr.msk.bf16.mxu0 %vm591_vm5, %v3905_v9 }
  0xd7   : > { %3387 = vmatmul.mubr.msk.bf16.gmra.mxu1 %vm591_vm5, %v3833_v39 }
  0xd8   : > { %3390 = vmatprep.mubr.msk.bf16.mxu1 %vm591_vm5, %v3851_v47 }
  0xd9   : > { %3369 = vmatmul.mubr.msk.bf16.gmra.mxu0 %vm591_vm5, %v3919_v16 }
  0xda   : > { %3372 = vmatprep.mubr.msk.bf16.mxu0 %vm591_vm5, %v1367_v29 }
  0xdf   : > { %3391 = vmatmul.mubr.msk.bf16.gmra.mxu1 %vm591_vm5, %v1202_v30 }
  0xe1   : > { %3373 = vmatmul.mubr.msk.bf16.gmra.mxu0 %vm591_vm5, %v1873_v23 }
 0x107   : > { %v3236_v24 = vpop.f32.mrf.mxu1 }
 0x109   : > { %v3218_v34 = vpop.f32.mrf.mxu0  ;;  %v778_v37 = vpop.f32.mrf.mxu1 }
 0x10a   : > { %v787_v38 = vadd.f32 %v3236_v24, %v3218_v34 }
 0x10b   : > { %v654_v39 = vpop.f32.mrf.mxu0  ;;  %v3237_v40 = vpop.f32.mrf.mxu1 }
 0x10c   : > { %v779_v41 = vadd.f32 %v778_v37, %v654_v39 }
 0x10d   : > { %v3219_v42 = vpop.f32.mrf.mxu0  ;;  %v781_v43 = vpop.f32.mrf.mxu1 }
 0x10e   : > { %v790_v44 = vadd.f32 %v3237_v40, %v3219_v42 }
 0x10f   : > { %v657_v45 = vpop.f32.mrf.mxu0  ;;  %v3240_v46 = vpop.f32.mrf.mxu1 }
 0x110   : > { %v782_v47 = vadd.f32 %v781_v43, %v657_v45 }
 0x111   : > { %v3222_v48 = vpop.f32.mrf.mxu0  ;;  %v794_v49 = vpop.f32.mrf.mxu1 }
 0x112   : > { %v803_v50 = vadd.f32 %v3240_v46, %v3222_v48 }
 0x113   : > { %v670_v51 = vpop.f32.mrf.mxu0  ;;  %v3241_v52 = vpop.f32.mrf.mxu1 }
 0x114   : > { %v795_v53 = vadd.f32 %v794_v49, %v670_v51 }
 0x115   : > { %v3223_v54 = vpop.f32.mrf.mxu0  ;;  %v797_v55 = vpop.f32.mrf.mxu1 }
 0x116   : > { %v806_v56 = vadd.f32 %v3241_v52, %v3223_v54 }
 0x117   : > { %v673_v57 = vpop.f32.mrf.mxu0  ;;  %v3244_v58 = vpop.f32.mrf.mxu1 }
 0x118   : > { %v798_v59 = vadd.f32 %v797_v55, %v673_v57 }
 0x119   : > { %v3226_v60 = vpop.f32.mrf.mxu0  ;;  %v810_v61 = vpop.f32.mrf.mxu1 }
 0x11a   : > { %v819_v62 = vadd.f32 %v3244_v58, %v3226_v60 }
 0x11b   : > { %v686_v63 = vpop.f32.mrf.mxu0  ;;  %v3245_v0 = vpop.f32.mrf.mxu1 }
 0x11c   : > { %v811_v1 = vadd.f32 %v810_v61, %v686_v63 }
 0x11d   : > { %v3227_v2 = vpop.f32.mrf.mxu0  ;;  %v813_v4 = vpop.f32.mrf.mxu1 }
 0x11e   : > { %v822_v5 = vadd.f32 %v3245_v0, %v3227_v2 }
 0x11f   : > { %v689_v6 = vpop.f32.mrf.mxu0  ;;  %v3248_v7 = vpop.f32.mrf.mxu1 }
 0x120   : > { %v814_v9 = vadd.f32 %v813_v4, %v689_v6 }
 0x121   : > { %v3230_v10 = vpop.f32.mrf.mxu0  ;;  %v826_v11 = vpop.f32.mrf.mxu1 }
 0x122   : > { %v835_v12 = vadd.f32 %v3248_v7, %v3230_v10 }
 0x123   : > { %v702_v14 = vpop.f32.mrf.mxu0  ;;  %v3249_v15 = vpop.f32.mrf.mxu1 }
 0x124   : > { %v827_v16 = vadd.f32 %v826_v11, %v702_v14 }
 0x125   : > { %v3231_v17 = vpop.f32.mrf.mxu0  ;;  %v829_v18 = vpop.f32.mrf.mxu1 }
 0x126   : > { %v838_v20 = vadd.f32 %v3249_v15, %v3231_v17 }
 0x127   : > { %v705_v21 = vpop.f32.mrf.mxu0  ;;  %v3272_v25 = vpop.f32.mrf.mxu1 }
 0x128   : > { %v830_v26 = vadd.f32 %v829_v18, %v705_v21 }
 0x129   : > { %v3254_v27 = vpop.f32.mrf.mxu0  ;;  %v1099_v28 = vpop.f32.mrf.mxu1 }
 0x12a   : > { %v992_v29 = vadd.f32 %v3254_v27, %v787_v38 }
 0x12b   : > { %v927_v30 = vpop.f32.mrf.mxu0  ;;  %v3273_v31 = vpop.f32.mrf.mxu1 }
 0x12c   : > { %v990_v32 = vadd.f32 %v927_v30, %v779_v41  ;;  %v4032_v8 = vadd.f32 %v3272_v25, %v992_v29 }
 0x12d   : > { %v3255_v19 = vpop.f32.mrf.mxu0  ;;  %v1102_v22 = vpop.f32.mrf.mxu1 }
 0x12e   : > { %v993_v33 = vadd.f32 %v3255_v19, %v790_v44  ;;  %v4034_v35 = vadd.f32 %v1099_v28, %v990_v32 }
 0x12f   : > { %v930_v36 = vpop.f32.mrf.mxu0  ;;  %v3276_v3 = vpop.f32.mrf.mxu1 }
 0x130   : > { %v991_v13 = vadd.f32 %v930_v36, %v782_v47  ;;  %v4036_v23 = vadd.f32 %v3273_v31, %v993_v33 }
 0x131   : > { %v3258_v24 = vpop.f32.mrf.mxu0  ;;  %v1115_v34 = vpop.f32.mrf.mxu1 }
 0x132   : > { %v996_v37 = vadd.f32 %v3258_v24, %v803_v50  ;;  %v4038_v39 = vadd.f32 %v1102_v22, %v991_v13 }
 0x133   : > { %v943_v38 = vpop.f32.mrf.mxu0  ;;  %v3277_v40 = vpop.f32.mrf.mxu1 }
 0x134   : > { %v994_v41 = vadd.f32 %v943_v38, %v795_v53  ;;  %v4040_v42 = vadd.f32 %v3276_v3, %v996_v37 }
 0x135   : > { %v3259_v43 = vpop.f32.mrf.mxu0  ;;  %v1118_v45 = vpop.f32.mrf.mxu1 }
 0x136   : > { %v997_v44 = vadd.f32 %v3259_v43, %v806_v56  ;;  %v1166_v46 = vadd.f32 %v1115_v34, %v994_v41 }
 0x137   : > { %v946_v48 = vpop.f32.mrf.mxu0  ;;  %v3280_v49 = vpop.f32.mrf.mxu1 }
 0x138   : > { %v995_v51 = vadd.f32 %v946_v48, %v798_v59  ;;  %v1169_v47 = vadd.f32 %v3277_v40, %v997_v44 }
 0x139   : > { %v3262_v52 = vpop.f32.mrf.mxu0  ;;  %v1131_v54 = vpop.f32.mrf.mxu1 }
 0x13a   : > { %v1000_v55 = vadd.f32 %v3262_v52, %v819_v62  ;;  %v1167_v57 = vadd.f32 %v1118_v45, %v995_v51 }
 0x13b   : > { %v959_v50 = vpop.f32.mrf.mxu0  ;;  %v3281_v58 = vpop.f32.mrf.mxu1 }
 0x13c   : > { %v998_v60 = vadd.f32 %v959_v50, %v811_v1  ;;  %v1172_v61 = vadd.f32 %v3280_v49, %v1000_v55 }
 0x13d   : > { %v3263_v63 = vpop.f32.mrf.mxu0  ;;  %v1134_v53 = vpop.f32.mrf.mxu1 }
 0x13e   : > { %v1001_v0 = vadd.f32 %v3263_v63, %v822_v5  ;;  %v1170_v2 = vadd.f32 %v1131_v54, %v998_v60 }
 0x13f   : > { %v962_v4 = vpop.f32.mrf.mxu0  ;;  %v3284_v6 = vpop.f32.mrf.mxu1 }
 0x140   : > { %v999_v56 = vadd.f32 %v962_v4, %v814_v9  ;;  %v1173_v7 = vadd.f32 %v3281_v58, %v1001_v0 }
 0x141   : > { %v3266_v10 = vpop.f32.mrf.mxu0  ;;  %v1147_v11 = vpop.f32.mrf.mxu1 }
 0x142   : > { %v1004_v59 = vadd.f32 %v3266_v10, %v835_v12  ;;  %v1171_v14 = vadd.f32 %v1134_v53, %v999_v56 }
 0x143   : > { %v975_v15 = vpop.f32.mrf.mxu0  ;;  %v3285_v17 = vpop.f32.mrf.mxu1 }
 0x144   : > { %v1002_v62 = vadd.f32 %v975_v15, %v827_v16  ;;  %v1176_v18 = vadd.f32 %v3284_v6, %v1004_v59 }
 0x145   : > { %v3267_v21 = vpop.f32.mrf.mxu0  ;;  %v1150_v25 = vpop.f32.mrf.mxu1 }
 0x146   : > { %v1005_v1 = vadd.f32 %v3267_v21, %v838_v20  ;;  %v1174_v27 = vadd.f32 %v1147_v11, %v1002_v62 }
 0x147   : > { %v978_v28 = vpop.f32.mrf.mxu0  ;;  %v4042_v29 = vpop.f32.mrf.mxu1 }
 0x148   : > { %v1003_v5 = vadd.f32 %v978_v28, %v830_v26  ;;  %v1177_v30 = vadd.f32 %v3285_v17, %v1005_v1 }
 0x149   : > { %v4044_v31 = vpop.f32.mrf.mxu0  ;;  %v4046_v9 = vpop.f32.mrf.mxu1 }
 0x14a   : > { %v1175_v32 = vadd.f32 %v1150_v25, %v1003_v5 }
 0x14b   : > { %v4048_v12 = vpop.f32.mrf.mxu0  ;;  %v4050_v19 = vpop.f32.mrf.mxu1 }
 0x14d   : > { %v4052_v16 = vpop.f32.mrf.mxu0  ;;  %v4054_v22 = vpop.f32.mrf.mxu1 }
 0x14f   : > { %v4056_v20 = vpop.f32.mrf.mxu0  ;;  %v4058_v33 = vpop.f32.mrf.mxu1 }
 0x151   : > { %v4060_v36 = vpop.f32.mrf.mxu0  ;;  %v1449_v26 = vpop.f32.mrf.mxu1 }
 0x153   : > { %v1280_v3 = vpop.f32.mrf.mxu0  ;;  %v3313_v13 = vpop.f32.mrf.mxu1 }
 0x154   : > { %v1331_v24 = vadd.f32 %v1280_v3, %v1166_v46 }
 0x155   : > { %v3295_v34 = vpop.f32.mrf.mxu0  ;;  %v1452_v37 = vpop.f32.mrf.mxu1 }
 0x156   : > { %v1334_v38 = vadd.f32 %v3295_v34, %v1169_v47  ;;  %v4062_v40 = vadd.f32 %v1449_v26, %v1331_v24 }
 0x157   : > { %v1283_v41 = vpop.f32.mrf.mxu0  ;;  %v3316_v43 = vpop.f32.mrf.mxu1 }
 0x158   : > { %v1332_v45 = vadd.f32 %v1283_v41, %v1167_v57  ;;  %v4064_v44 = vadd.f32 %v3313_v13, %v1334_v38 }
 0x159   : > { %v3298_v48 = vpop.f32.mrf.mxu0  ;;  %v1465_v49 = vpop.f32.mrf.mxu1 }
 0x15a   : > { %v1337_v51 = vadd.f32 %v3298_v48, %v1172_v61  ;;  %v4066_v52 = vadd.f32 %v1452_v37, %v1332_v45 }
 0x15b   : > { %v1296_v54 = vpop.f32.mrf.mxu0  ;;  %v3317_v55 = vpop.f32.mrf.mxu1 }
 0x15c   : > { %v1335_v50 = vadd.f32 %v1296_v54, %v1170_v2  ;;  %v4068_v58 = vadd.f32 %v3316_v43, %v1337_v51 }
 0x15d   : > { %v3299_v46 = vpop.f32.mrf.mxu0  ;;  %v1468_v60 = vpop.f32.mrf.mxu1 }
 0x15e   : > { %v1338_v47 = vadd.f32 %v3299_v46, %v1173_v7  ;;  %v4070_v63 = vadd.f32 %v1465_v49, %v1335_v50 }
 0x15f   : > { %v1299_v53 = vpop.f32.mrf.mxu0  ;;  %v3320_v0 = vpop.f32.mrf.mxu1 }
 0x160   : > { %v1336_v57 = vadd.f32 %v1299_v53, %v1171_v14  ;;  %v4072_v4 = vadd.f32 %v3317_v55, %v1338_v47  ;;  %v1329_v55 = vadd.f32 %v4044_v31, %v4032_v8  ;;  %v1330_v47 = vadd.f32 %v4052_v16, %v4036_v23 }
 0x161   : > { %v3302_v6 = vpop.f32.mrf.mxu0  ;;  %v1481_v56 = vpop.f32.mrf.mxu1  ;;  %v1328_v53 = vadd.f32 %v4056_v20, %v4038_v39 }
 0x162   : > { %v1341_v61 = vadd.f32 %v3302_v6, %v1176_v18  ;;  %v4074_v10 = vadd.f32 %v1468_v60, %v1336_v57  ;;  %v1327_v60 = vadd.f32 %v4048_v12, %v4034_v35  ;;  %v1333_v6 = vadd.f32 %v4060_v36, %v4040_v42 }
 0x163   : > { %v1312_v11 = vpop.f32.mrf.mxu0  ;;  %v3321_v59 = vpop.f32.mrf.mxu1  ;;  %v1497_v12 = vadd.f32 %v4054_v22, %v1328_v53 }
 0x164   : > { %v1339_v2 = vadd.f32 %v1312_v11, %v1174_v27  ;;  %v4076_v15 = vadd.f32 %v3320_v0, %v1341_v61  ;;  %v1496_v31 = vadd.f32 %v4046_v9, %v1327_v60  ;;  %v1499_v11 = vadd.f32 %v4050_v19, %v1330_v47 }
 0x165   : > { %v3303_v17 = vpop.f32.mrf.mxu0  ;;  %v1484_v62 = vpop.f32.mrf.mxu1  ;;  %v1502_v20 = vadd.f32 %v4058_v33, %v1333_v6 }
 0x166   : > { %v1342_v7 = vadd.f32 %v3303_v17, %v1177_v30  ;;  %v4078_v21 = vadd.f32 %v1481_v56, %v1339_v2  ;;  %v1498_v56 = vadd.f32 %v4042_v29, %v1329_v55 }
 0x167   : > { %v1315_v25 = vpop.f32.mrf.mxu0  ;;  %v3344_v1 = vpop.f32.mrf.mxu1 }
 0x168   : > { %v1340_v14 = vadd.f32 %v1315_v25, %v1175_v32  ;;  %v4080_v28 = vadd.f32 %v3321_v59, %v1342_v7 }
 0x169   : > { %v3326_v5 = vpop.f32.mrf.mxu0  ;;  %v1770_v26 = vpop.f32.mrf.mxu1 }
 0x16a   : > { %v4082_v18 = vadd.f32 %v1484_v62, %v1340_v14  ;;  %v1666_v35 = vadd.f32 %v3326_v5, %v1498_v56 }
 0x16b   : > { %v1601_v3 = vpop.f32.mrf.mxu0  ;;  %v3345_v13 = vpop.f32.mrf.mxu1 }
 0x16c   : > { %v1664_v59 = vadd.f32 %v1601_v3, %v1496_v31  ;;  %v1835_v22 = vadd.f32 %v3344_v1, %v1666_v35 }
 0x16d   : > { %v3327_v24 = vpop.f32.mrf.mxu0  ;;  %v1773_v27 = vpop.f32.mrf.mxu1 }
 0x16e   : > { %v1667_v39 = vadd.f32 %v3327_v24, %v1499_v11  ;;  %v1833_v14 = vadd.f32 %v1770_v26, %v1664_v59 }
 0x16f   : > { %v1604_v34 = vpop.f32.mrf.mxu0  ;;  %v3348_v37 = vpop.f32.mrf.mxu1 }
 0x170   : > { %v1665_v2 = vadd.f32 %v1604_v34, %v1497_v12  ;;  %v1836_v5 = vadd.f32 %v3345_v13, %v1667_v39 }
 0x171   : > { %v3330_v38 = vpop.f32.mrf.mxu0  ;;  %v1786_v41 = vpop.f32.mrf.mxu1 }
 0x172   : > { %v1670_v36 = vadd.f32 %v3330_v38, %v1502_v20  ;;  %v1834_v34 = vadd.f32 %v1773_v27, %v1665_v2 }
 0x173   : > { %v1617_v30 = vpop.f32.mrf.mxu0  ;;  %v3349_v43 = vpop.f32.mrf.mxu1 }
 0x174   : > { %v1668_v29 = vadd.f32 %v1617_v30, %v4062_v40  ;;  %v4110_v1 = vadd.f32 %v3348_v37, %v1670_v36 }
 0x175   : > { %v3331_v45 = vpop.f32.mrf.mxu0  ;;  %v1789_v48 = vpop.f32.mrf.mxu1 }
 0x176   : > { %v1671_v9 = vadd.f32 %v3331_v45, %v4064_v44 }
 0x177   : > { %v1620_v49 = vpop.f32.mrf.mxu0  ;;  %v3352_v32 = vpop.f32.mrf.mxu1 }
 0x178   : > { %v1669_v19 = vadd.f32 %v1620_v49, %v4066_v52  ;;  %v4115_v45 = vadd.f32 %v3349_v43, %v1671_v9 }
 0x179   : > { %v3334_v51 = vpop.f32.mrf.mxu0  ;;  %v1802_v54 = vpop.f32.mrf.mxu1 }
 0x17a   : > { %v1674_v25 = vadd.f32 %v3334_v51, %v4068_v58  ;;  %v4112_v58 = vadd.f32 %v1786_v41, %v1668_v29 }
 0x17b   : > { %v1633_v50 = vpop.f32.mrf.mxu0  ;;  %v3353_v46 = vpop.f32.mrf.mxu1 }
 0x17c   : > { %v1672_v33 = vadd.f32 %v1633_v50, %v4070_v63 }
 0x17d   : > { %v3335_v0 = vpop.f32.mrf.mxu0  ;;  %v1805_v57 = vpop.f32.mrf.mxu1 }
 0x17e   : > { %v1675_v3 = vadd.f32 %v3335_v0, %v4072_v4  ;;  %v4123_v37 = vadd.f32 %v1802_v54, %v1672_v33 }
 0x17f   : > { %v1636_v61 = vpop.f32.mrf.mxu0  ;;  %v3356_v8 = vpop.f32.mrf.mxu1 }
 0x180   : > { %v1673_v40 = vadd.f32 %v1636_v61, %v4074_v10  ;;  %v4117_v10 = vadd.f32 %v1789_v48, %v1669_v19  ;;  %v4125_v51 = vadd.f32 %v3353_v46, %v1675_v3 }
 0x181   : > { %v3338_v23 = vpop.f32.mrf.mxu0  ;;  %v1818_v16 = vpop.f32.mrf.mxu1 }
 0x182   : > { %v1678_v44 = vadd.f32 %v3338_v23, %v4076_v15  ;;  %v4127_v55 = vadd.f32 %v1805_v57, %v1673_v40 }
 0x183   : > { %v1649_v17 = vpop.f32.mrf.mxu0  ;;  %v3357_v42 = vpop.f32.mrf.mxu1 }
 0x184   : > { %v1676_v38 = vadd.f32 %v1649_v17, %v4078_v21  ;;  %v4121_v21 = vadd.f32 %v3352_v32, %v1674_v25  ;;  %v4129_v43 = vadd.f32 %v3356_v8, %v1678_v44 }
 0x185   : > { %v3339_v62 = vpop.f32.mrf.mxu0  ;;  %v4102_v7 = vpop.f32.mrf.mxu1 }
 0x186   : > { %v1679_v63 = vadd.f32 %v3339_v62, %v4080_v28  ;;  %v4136_v54 = vadd.f32 %v1818_v16, %v1676_v38 }
 0x187   : > { %v1652_v24 = vpop.f32.mrf.mxu0  ;;  %v3380_v52 = vpop.f32.mrf.mxu1 }
 0x188   : > { %v3031_v30 = vpack.c.bf16 %v3380_v52, %v3380_v52  ;;  %v2465_v26 = vmul.f32 %v3380_v52, %v3380_v52  ;;  %v4132_v48 = vadd.f32 %v1652_v24, %v4082_v18  ;;  %v2426_v60 = vsel %vm2096_vm7, %v3380_v52, 0.0 }
 0x189   : > { %v3362_v13 = vpop.f32.mrf.mxu0  ;;  %v2279_v4 = vpop.f32.mrf.mxu1  ;;  %v4140_v57 = vadd.f32 %v3357_v42, %v1679_v63 }
 0x18a   : > { %2408 = vst.msk [vmem:[%s3591_s12 + $0x8] sm:$0xf] %vm2078_vm6, %v3031_v30  ;;  %v2000_v15 = vadd.f32 %v3362_v13, %v1835_v22  ;;  %v3029_v27 = vpack.c.bf16 %v2279_v4, %v2279_v4  ;;  %v2463_v41 = vmul.f32 %v2279_v4, %v2279_v4  ;;  %v2482_v47 = vsel %vm2096_vm7, %v2465_v26, 0.0 }
 0x18b   : > { %v1935_v49 = vpop.f32.mrf.mxu0  ;;  %v3381_v28 = vpop.f32.mrf.mxu1  ;;  %v2423_v56 = vsel %vm2096_vm7, %v2279_v4, 0.0 }
 0x18c   : > { %v3015_v50 = vpack.c.bf16 %v2000_v15, %v2000_v15  ;;  %2406 = vst.msk [vmem:[%s3591_s12] sm:$0xf] %vm2078_vm6, %v3029_v27  ;;  %v1998_v32 = vadd.f32 %v1935_v49, %v1833_v14  ;;  %v3032_v46 = vpack.c.bf16 %v3381_v28, %v3381_v28  ;;  %v2100_v18 = vsel %vm2096_vm7, %v2000_v15, 0.0 }
 0x18d   : > { %v3363_v53 = vpop.f32.mrf.mxu0  ;;  %v2282_v0 = vpop.f32.mrf.mxu1  ;;  %v2140_v6 = vmul.f32 %v2000_v15, %v2000_v15  ;;  %v2479_v8 = vsel %vm2096_vm7, %v2463_v41, 0.0  ;;  %v2466_v17 = vmul.f32 %v3381_v28, %v3381_v28  ;;  %v2428_v33 = vsel %vm2096_vm7, %v3381_v28, 0.0 }
 0x18e   : > { %2081 = vst.msk [vmem:[%s3581_s25 + $0x8] sm:$0xf] %vm2078_vm6, %v3015_v50  ;;  %v3013_v61 = vpack.c.bf16 %v1998_v32, %v1998_v32  ;;  %2409 = vst.msk [vmem:[%s3591_s12 + $0xc] sm:$0xf] %vm2078_vm6, %v3032_v46  ;;  %v2001_v31 = vadd.f32 %v3363_v53, %v1836_v5  ;;  %v3030_v11 = vpack.c.bf16 %v2282_v0, %v2282_v0  ;;  %v2424_v35 = vsel %vm2096_vm7, %v2282_v0, 0.0 }
 0x18f   : > { %v1938_v12 = vpop.f32.mrf.mxu0  ;;  %v4150_v23 = vpop.f32.mrf.mxu1  ;;  %v2138_v16 = vmul.f32 %v1998_v32, %v1998_v32  ;;  %v2425_v59 = vadd.f32 %v2424_v35, %v2423_v56  ;;  %v2464_v39 = vmul.f32 %v2282_v0, %v2282_v0  ;;  %v2097_v2 = vsel %vm2096_vm7, %v1998_v32, 0.0 }
 0x190   : > { %2079 = vst.msk [vmem:[%s3581_s25] sm:$0xf] %vm2078_vm6, %v3013_v61  ;;  %v1999_v20 = vadd.f32 %v1938_v12, %v1834_v34  ;;  %v3016_v42 = vpack.c.bf16 %v2001_v31, %v2001_v31  ;;  %2407 = vst.msk [vmem:[%s3591_s12 + $0x4] sm:$0xf] %vm2078_vm6, %v3030_v11  ;;  %v3035_v36 = vpack.c.bf16 %v4150_v23, %v4150_v23  ;;  %v2157_v24 = vsel %vm2096_vm7, %v2140_v6, 0.0 }
 0x191   : > { %v3366_v29 = vpop.f32.mrf.mxu0  ;;  %v2295_v9 = vpop.f32.mrf.mxu1  ;;  %v2427_v19 = vadd.f32 %v2426_v60, %v2425_v59  ;;  %v2480_v62 = vsel %vm2096_vm7, %v2464_v39, 0.0  ;;  %v2154_v52 = vsel %vm2096_vm7, %v2138_v16, 0.0  ;;  %v2141_v30 = vmul.f32 %v2001_v31, %v2001_v31 }
 0x192   : > { %v3014_v22 = vpack.c.bf16 %v1999_v20, %v1999_v20  ;;  %v2098_v25 = vsel %vm2096_vm7, %v1999_v20, 0.0  ;;  %2082 = vst.msk [vmem:[%s3581_s25 + $0xc] sm:$0xf] %vm2078_vm6, %v3016_v42  ;;  %v2481_v14 = vadd.f32 %v2480_v62, %v2479_v8  ;;  %v2139_v3 = vmul.f32 %v1999_v20, %v1999_v20  ;;  %2412 = vst.msk [vmem:[%s3591_s12 + $0x18] sm:$0xf] %vm2078_vm6, %v3035_v36 }
 0x193   : > { %v2099_v5 = vadd.f32 %v2098_v25, %v2097_v2  ;;  %v1951_v40 = vpop.f32.mrf.mxu0  ;;  %v4166_v44 = vpop.f32.mrf.mxu1  ;;  %v2004_v34 = vadd.f32 %v3366_v29, %v4110_v1  ;;  %v3033_v38 = vpack.c.bf16 %v2295_v9, %v2295_v9  ;;  %v2484_v27 = vsel %vm2096_vm7, %v2466_v17, 0.0 }
 0x194   : > { %2080 = vst.msk [vmem:[%s3581_s25 + $0x4] sm:$0xf] %vm2078_vm6, %v3014_v22  ;;  %v2483_v63 = vadd.f32 %v2482_v47, %v2481_v14  ;;  %v2155_v13 = vsel %vm2096_vm7, %v2139_v3, 0.0  ;;  %v2429_v28 = vadd.f32 %v2428_v33, %v2427_v19  ;;  %v2102_v50 = vsel %vm2096_vm7, %v2001_v31, 0.0 }
 0x195   : > { %v2101_v26 = vadd.f32 %v2100_v18, %v2099_v5  ;;  %v3367_v4 = vpop.f32.mrf.mxu0  ;;  %v2298_v15 = vpop.f32.mrf.mxu1  ;;  %v2156_v41 = vadd.f32 %v2155_v13, %v2154_v52  ;;  %v3019_v49 = vpack.c.bf16 %v2004_v34, %v2004_v34  ;;  %2410 = vst.msk [vmem:[%s3591_s12 + $0x10] sm:$0xf] %vm2078_vm6, %v3033_v38  ;;  %v2430_v1 = vsel %vm2096_vm7, %v2295_v9, 0.0 }
 0x196   : > { %v2467_v32 = vmul.f32 %v2295_v9, %v2295_v9  ;;  %v2485_v60 = vadd.f32 %v2484_v27, %v2483_v63  ;;  %v2002_v0 = vadd.f32 %v1951_v40, %v4112_v58  ;;  %v4186_v6 = vadd.f32 %v4102_v7, %v4132_v48 }
 0x197   : > { %v1954_v47 = vpop.f32.mrf.mxu0  ;;  %v4179_v46 = vpop.f32.mrf.mxu1  ;;  %v2158_v53 = vadd.f32 %v2157_v24, %v2156_v41  ;;  %2085 = vst.msk [vmem:[%s3581_s25 + $0x18] sm:$0xf] %vm2078_vm6, %v3019_v49  ;;  %v2103_v18 = vadd.f32 %v2102_v50, %v2101_v26  ;;  %v2159_v56 = vsel %vm2096_vm7, %v2141_v30, 0.0  ;;  %v2469_v61 = vmul.f32 %v4150_v23, %v4150_v23 }
 0x198   : > { %v2486_v8 = vsel %vm2096_vm7, %v2467_v32, 0.0  ;;  %v3036_v31 = vpack.c.bf16 %v4166_v44, %v4166_v44  ;;  %v2431_v35 = vadd.f32 %v2430_v1, %v2429_v28  ;;  %v3017_v12 = vpack.c.bf16 %v2002_v0, %v2002_v0 }
 0x199   : > { %v3370_v11 = vpop.f32.mrf.mxu0  ;;  %v2104_v58 = vsel %vm2096_vm7, %v2002_v0, 0.0  ;;  %v2142_v16 = vmul.f32 %v2002_v0, %v2002_v0  ;;  %v2487_v59 = vadd.f32 %v2486_v8, %v2485_v60  ;;  %v2160_v48 = vadd.f32 %v2159_v56, %v2158_v53  ;;  %v2311_v20 = vpop.f32.mrf.mxu1 }
 0x19a   : > { %v2105_v7 = vadd.f32 %v2104_v58, %v2103_v18  ;;  %2413 = vst.msk [vmem:[%s3591_s12 + $0x1c] sm:$0xf] %vm2078_vm6, %v3036_v31  ;;  %v2005_v39 = vadd.f32 %v3367_v4, %v4115_v45  ;;  %2083 = vst.msk [vmem:[%s3581_s25 + $0x10] sm:$0xf] %vm2078_vm6, %v3017_v12  ;;  %v3034_v17 = vpack.c.bf16 %v2298_v15, %v2298_v15  ;;  %v2432_v42 = vsel %vm2096_vm7, %v2298_v15, 0.0 }
 0x19b   : > { %v2161_v2 = vsel %vm2096_vm7, %v2142_v16, 0.0  ;;  %v2468_v36 = vmul.f32 %v2298_v15, %v2298_v15  ;;  %v2434_v29 = vsel %vm2096_vm7, %v4150_v23, 0.0  ;;  %v2470_v19 = vmul.f32 %v4166_v44, %v4166_v44  ;;  %v1967_v22 = vpop.f32.mrf.mxu0  ;;  %v4216_v24 = vpop.f32.mrf.mxu1 }
 0x19c   : > { %v2162_v9 = vadd.f32 %v2161_v2, %v2160_v48  ;;  %v3020_v62 = vpack.c.bf16 %v2005_v39, %v2005_v39  ;;  %v2490_v45 = vsel %vm2096_vm7, %v2469_v61, 0.0  ;;  %2411 = vst.msk [vmem:[%s3591_s12 + $0x14] sm:$0xf] %vm2078_vm6, %v3034_v17  ;;  %v2433_v25 = vadd.f32 %v2432_v42, %v2431_v35 }
 0x19d   : > { %v2488_v33 = vsel %vm2096_vm7, %v2468_v36, 0.0  ;;  %v2003_v14 = vadd.f32 %v1954_v47, %v4117_v10  ;;  %v2108_v5 = vsel %vm2096_vm7, %v2004_v34, 0.0  ;;  %v2144_v3 = vmul.f32 %v2004_v34, %v2004_v34  ;;  %v3371_v4 = vpop.f32.mrf.mxu0  ;;  %v2314_v32 = vpop.f32.mrf.mxu1 }
 0x19e   : > { %2086 = vst.msk [vmem:[%s3581_s25 + $0x1c] sm:$0xf] %vm2078_vm6, %v3020_v62  ;;  %v2489_v23 = vadd.f32 %v2488_v33, %v2487_v59  ;;  %v3039_v40 = vpack.c.bf16 %v4179_v46, %v4179_v46  ;;  %v2436_v52 = vsel %vm2096_vm7, %v4166_v44, 0.0  ;;  %v2435_v38 = vadd.f32 %v2434_v29, %v2433_v25 }
 0x19f   : > { %v3018_v30 = vpack.c.bf16 %v2003_v14, %v2003_v14  ;;  %v2106_v63 = vsel %vm2096_vm7, %v2003_v14, 0.0  ;;  %v2492_v10 = vsel %vm2096_vm7, %v2470_v19, 0.0  ;;  %v2143_v13 = vmul.f32 %v2003_v14, %v2003_v14  ;;  %v1970_v8 = vpop.f32.mrf.mxu0 }
 0x1a0   : > { %v2491_v26 = vadd.f32 %v2490_v45, %v2489_v23  ;;  %v2107_v34 = vadd.f32 %v2106_v63, %v2105_v7  ;;  %2416 = vst.msk [vmem:[%s3591_s12 + $0x28] sm:$0xf] %vm2078_vm6, %v3039_v40  ;;  %v2110_v15 = vsel %vm2096_vm7, %v2005_v39, 0.0  ;;  %v2145_v27 = vmul.f32 %v2005_v39, %v2005_v39  ;;  %v4243_v7 = vpop.f32.mrf.mxu1 }
 0x1a1   : > { %2084 = vst.msk [vmem:[%s3581_s25 + $0x14] sm:$0xf] %vm2078_vm6, %v3018_v30  ;;  %v2008_v44 = vadd.f32 %v3370_v11, %v4121_v21  ;;  %v3037_v41 = vpack.c.bf16 %v2311_v20, %v2311_v20  ;;  %v2163_v28 = vsel %vm2096_vm7, %v2143_v13, 0.0  ;;  %v2437_v50 = vadd.f32 %v2436_v52, %v2435_v38 }
 0x1a2   : > { %v2109_v49 = vadd.f32 %v2108_v5, %v2107_v34  ;;  %v2471_v1 = vmul.f32 %v2311_v20, %v2311_v20  ;;  %v2164_v60 = vadd.f32 %v2163_v28, %v2162_v9  ;;  %v2438_v53 = vsel %vm2096_vm7, %v2311_v20, 0.0  ;;  %v3374_v9 = vpop.f32.mrf.mxu0  ;;  %v2327_v5 = vpop.f32.mrf.mxu1 }
 0x1a3   : > { %v3023_v47 = vpack.c.bf16 %v2008_v44, %v2008_v44  ;;  %2414 = vst.msk [vmem:[%s3591_s12 + $0x20] sm:$0xf] %vm2078_vm6, %v3037_v41  ;;  %v2493_v0 = vadd.f32 %v2492_v10, %v2491_v26  ;;  %v2165_v18 = vsel %vm2096_vm7, %v2144_v3, 0.0  ;;  %v2006_v21 = vadd.f32 %v1967_v22, %v4123_v37 }
 0x1a4   : > { %v2494_v56 = vsel %vm2096_vm7, %v2471_v1, 0.0  ;;  %v2111_v61 = vadd.f32 %v2110_v15, %v2109_v49  ;;  %v2167_v31 = vsel %vm2096_vm7, %v2145_v27, 0.0  ;;  %v2166_v11 = vadd.f32 %v2165_v18, %v2164_v60 }
 0x1a5   : > { %v2473_v35 = vmul.f32 %v4179_v46, %v4179_v46  ;;  %2089 = vst.msk [vmem:[%s3581_s25 + $0x28] sm:$0xf] %vm2078_vm6, %v3023_v47  ;;  %v3040_v12 = vpack.c.bf16 %v4216_v24, %v4216_v24  ;;  %v2439_v58 = vadd.f32 %v2438_v53, %v2437_v50  ;;  %v3021_v16 = vpack.c.bf16 %v2006_v21, %v2006_v21 }
 0x1a6   : > { %v2112_v59 = vsel %vm2096_vm7, %v2006_v21, 0.0  ;;  %v2146_v37 = vmul.f32 %v2006_v21, %v2006_v21  ;;  %v2495_v48 = vadd.f32 %v2494_v56, %v2493_v0  ;;  %v2168_v20 = vadd.f32 %v2167_v31, %v2166_v11 }
 0x1a7   : > { %v2113_v39 = vadd.f32 %v2112_v59, %v2111_v61  ;;  %2417 = vst.msk [vmem:[%s3591_s12 + $0x2c] sm:$0xf] %vm2078_vm6, %v3040_v12  ;;  %v2009_v2 = vadd.f32 %v3371_v4, %v4125_v51  ;;  %2087 = vst.msk [vmem:[%s3581_s25 + $0x20] sm:$0xf] %vm2078_vm6, %v3021_v16  ;;  %v3038_v42 = vpack.c.bf16 %v2314_v32, %v2314_v32  ;;  %v2440_v36 = vsel %vm2096_vm7, %v2314_v32, 0.0 }
 0x1a8   : > { %v2169_v17 = vsel %vm2096_vm7, %v2146_v37, 0.0  ;;  %v2472_v29 = vmul.f32 %v2314_v32, %v2314_v32  ;;  %v2442_v19 = vsel %vm2096_vm7, %v4179_v46, 0.0  ;;  %v2474_v22 = vmul.f32 %v4216_v24, %v4216_v24 }
 0x1a9   : > { %v2170_v62 = vadd.f32 %v2169_v17, %v2168_v20  ;;  %v3024_v45 = vpack.c.bf16 %v2009_v2, %v2009_v2  ;;  %v2498_v51 = vsel %vm2096_vm7, %v2473_v35, 0.0  ;;  %2415 = vst.msk [vmem:[%s3591_s12 + $0x24] sm:$0xf] %vm2078_vm6, %v3038_v42  ;;  %v2441_v25 = vadd.f32 %v2440_v36, %v2439_v58 }
 0x1aa   : > { %v2496_v33 = vsel %vm2096_vm7, %v2472_v29, 0.0  ;;  %v2007_v14 = vadd.f32 %v1970_v8, %v4127_v55  ;;  %v2116_v3 = vsel %vm2096_vm7, %v2008_v44, 0.0  ;;  %v2148_v23 = vmul.f32 %v2008_v44, %v2008_v44  ;;  %v1983_v55 = vpop.f32.mrf.mxu0  ;;  %v3393_v44 = vpop.f32.mrf.mxu1 }
 0x1ab   : > { %2090 = vst.msk [vmem:[%s3581_s25 + $0x2c] sm:$0xf] %vm2078_vm6, %v3024_v45  ;;  %v2497_v46 = vadd.f32 %v2496_v33, %v2495_v48  ;;  %v3043_v40 = vpack.c.bf16 %v4243_v7, %v4243_v7  ;;  %v2444_v52 = vsel %vm2096_vm7, %v4216_v24, 0.0  ;;  %v2443_v38 = vadd.f32 %v2442_v19, %v2441_v25 }
 0x1ac   : > { %v3022_v30 = vpack.c.bf16 %v2007_v14, %v2007_v14  ;;  %v2114_v63 = vsel %vm2096_vm7, %v2007_v14, 0.0  ;;  %v2500_v10 = vsel %vm2096_vm7, %v2474_v22, 0.0  ;;  %v2147_v13 = vmul.f32 %v2007_v14, %v2007_v14  ;;  %v3375_v53 = vpop.f32.mrf.mxu0  ;;  %v2330_v11 = vpop.f32.mrf.mxu1 }
 0x1ad   : > { %v2499_v26 = vadd.f32 %v2498_v51, %v2497_v46  ;;  %v2115_v34 = vadd.f32 %v2114_v63, %v2113_v39  ;;  %2420 = vst.msk [vmem:[%s3591_s12 + $0x38] sm:$0xf] %vm2078_vm6, %v3043_v40  ;;  %v2118_v4 = vsel %vm2096_vm7, %v2009_v2, 0.0  ;;  %v2149_v15 = vmul.f32 %v2009_v2, %v2009_v2 }
 0x1ae   : > { %2088 = vst.msk [vmem:[%s3581_s25 + $0x24] sm:$0xf] %vm2078_vm6, %v3022_v30  ;;  %v2012_v24 = vadd.f32 %v3374_v9, %v4129_v43  ;;  %v3041_v27 = vpack.c.bf16 %v2327_v5, %v2327_v5  ;;  %v2171_v49 = vsel %vm2096_vm7, %v2147_v13, 0.0  ;;  %v2445_v28 = vadd.f32 %v2444_v52, %v2443_v38  ;;  %v1986_v39 = vpop.f32.mrf.mxu0 }
 0x1af   : > { %v2117_v41 = vadd.f32 %v2116_v3, %v2115_v34  ;;  %v2475_v50 = vmul.f32 %v2327_v5, %v2327_v5  ;;  %v2172_v1 = vadd.f32 %v2171_v49, %v2170_v62  ;;  %v2446_v60 = vsel %vm2096_vm7, %v2327_v5, 0.0 }
 0x1b0   : > { %v3027_v32 = vpack.c.bf16 %v2012_v24, %v2012_v24  ;;  %2418 = vst.msk [vmem:[%s3591_s12 + $0x30] sm:$0xf] %vm2078_vm6, %v3041_v27  ;;  %v2501_v47 = vadd.f32 %v2500_v10, %v2499_v26  ;;  %v2173_v0 = vsel %vm2096_vm7, %v2148_v23, 0.0  ;;  %v2010_v18 = vadd.f32 %v1983_v55, %v4136_v54 }
 0x1b1   : > { %v2502_v43 = vsel %vm2096_vm7, %v2475_v50, 0.0  ;;  %v2119_v56 = vadd.f32 %v2118_v4, %v2117_v41  ;;  %v2175_v21 = vsel %vm2096_vm7, %v2149_v15, 0.0  ;;  %v2174_v61 = vadd.f32 %v2173_v0, %v2172_v1 }
 0x1b2   : > { %v2477_v8 = vmul.f32 %v4243_v7, %v4243_v7  ;;  %2093 = vst.msk [vmem:[%s3581_s25 + $0x38] sm:$0xf] %vm2078_vm6, %v3027_v32  ;;  %v3044_v31 = vpack.c.bf16 %v3393_v44, %v3393_v44  ;;  %v2447_v35 = vadd.f32 %v2446_v60, %v2445_v28  ;;  %v3025_v12 = vpack.c.bf16 %v2010_v18, %v2010_v18 }
 0x1b3   : > { %v2120_v58 = vsel %vm2096_vm7, %v2010_v18, 0.0  ;;  %v2150_v16 = vmul.f32 %v2010_v18, %v2010_v18  ;;  %v2503_v59 = vadd.f32 %v2502_v43, %v2501_v47  ;;  %v2176_v37 = vadd.f32 %v2175_v21, %v2174_v61 }
 0x1b4   : > { %v2121_v54 = vadd.f32 %v2120_v58, %v2119_v56  ;;  %2421 = vst.msk [vmem:[%s3591_s12 + $0x3c] sm:$0xf] %vm2078_vm6, %v3044_v31  ;;  %v2013_v48 = vadd.f32 %v3375_v53, %v4140_v57  ;;  %2091 = vst.msk [vmem:[%s3581_s25 + $0x30] sm:$0xf] %vm2078_vm6, %v3025_v12  ;;  %v3042_v2 = vpack.c.bf16 %v2330_v11, %v2330_v11  ;;  %v2448_v17 = vsel %vm2096_vm7, %v2330_v11, 0.0 }
 0x1b5   : > { %v2177_v20 = vsel %vm2096_vm7, %v2150_v16, 0.0  ;;  %v2476_v42 = vmul.f32 %v2330_v11, %v2330_v11  ;;  %v2478_v9 = vmul.f32 %v3393_v44, %v3393_v44  ;;  %v2449_v19 = vadd.f32 %v2448_v17, %v2447_v35  ;;  %v2422_v56 = vld [vmem:[%s3596_s18] sm:$0x1] }
 0x1b6   : > { %v2178_v36 = vadd.f32 %v2177_v20, %v2176_v37  ;;  %v3028_v29 = vpack.c.bf16 %v2013_v48, %v2013_v48  ;;  %2419 = vst.msk [vmem:[%s3591_s12 + $0x34] sm:$0xf] %vm2078_vm6, %v3042_v2  ;;  %v2011_v57 = vadd.f32 %v1986_v39, %v4186_v6  ;;  %v2450_v22 = vsel %vm2096_vm7, %v4243_v7, 0.0  ;;  %v2462_v31 = vld [vmem:[%s3601_s23] sm:$0x1] }
 0x1b7   : > { %v2504_v62 = vsel %vm2096_vm7, %v2476_v42, 0.0  ;;  %v2506_v45 = vsel %vm2096_vm7, %v2477_v8, 0.0  ;;  %v2152_v25 = vmul.f32 %v2012_v24, %v2012_v24  ;;  %v2451_v33 = vadd.f32 %v2450_v22, %v2449_v19  ;;  %v2095_v16 = vld [vmem:[%s3576_s22] sm:$0x1] }
 0x1b8   : > { %2094 = vst.msk [vmem:[%s3581_s25 + $0x3c] sm:$0xf] %vm2078_vm6, %v3028_v29  ;;  %v2505_v51 = vadd.f32 %v2504_v62, %v2503_v59  ;;  %v3026_v14 = vpack.c.bf16 %v2011_v57, %v2011_v57  ;;  %v2122_v5 = vsel %vm2096_vm7, %v2011_v57, 0.0  ;;  %v2452_v3 = vsel %vm2096_vm7, %v3393_v44, 0.0  ;;  %v2137_v20 = vld [vmem:[%s3586_s10] sm:$0x1] }
 0x1b9   : > { %v2123_v46 = vadd.f32 %v2122_v5, %v2121_v54  ;;  %v2151_v40 = vmul.f32 %v2011_v57, %v2011_v57  ;;  %v2124_v6 = vsel %vm2096_vm7, %v2012_v24, 0.0  ;;  %v2508_v52 = vsel %vm2096_vm7, %v2478_v9, 0.0 }
 0x1ba   : > { %v2507_v23 = vadd.f32 %v2506_v45, %v2505_v51  ;;  %v2453_v7 = vadd.f32 %v2452_v3, %v2451_v33  ;;  %2092 = vst.msk [vmem:[%s3581_s25 + $0x34] sm:$0xf] %vm2078_vm6, %v3026_v14  ;;  %v2153_v38 = vmul.f32 %v2013_v48, %v2013_v48  ;;  %v2126_v10 = vsel %vm2096_vm7, %v2013_v48, 0.0 }
 0x1bb   : > { %v2125_v63 = vadd.f32 %v2124_v6, %v2123_v46  ;;  %v2179_v55 = vsel %vm2096_vm7, %v2151_v40, 0.0  ;;  %v2181_v13 = vsel %vm2096_vm7, %v2152_v25, 0.0 }
 0x1bc   : > { %v2509_v30 = vadd.f32 %v2508_v52, %v2507_v23  ;;  %v2454_v26 = vrot.slane %v2453_v7, 4  ;;  %v2180_v34 = vadd.f32 %v2179_v55, %v2178_v36  ;;  %v2183_v44 = vsel %vm2096_vm7, %v2153_v38, 0.0 }
 0x1bd   : > { %v2127_v15 = vadd.f32 %v2126_v10, %v2125_v63 }
 0x1be   : > { %v2510_v4 = vrot.slane %v2509_v30, 4  ;;  %v2455_v24 = vadd.f32 %v2454_v26, %v2453_v7  ;;  %v2182_v27 = vadd.f32 %v2181_v13, %v2180_v34 }
 0x1bf   : > { %v2128_v49 = vrot.slane %v2127_v15, 4 }
 0x1c0   : > { %v2511_v41 = vadd.f32 %v2510_v4, %v2509_v30  ;;  %v2456_v28 = vrot.slane %v2455_v24, 2  ;;  %v2184_v50 = vadd.f32 %v2183_v44, %v2182_v27 }
 0x1c1   : > { %v2129_v32 = vadd.f32 %v2128_v49, %v2127_v15 }
 0x1c2   : > { %v2512_v1 = vrot.slane %v2511_v41, 2  ;;  %v2457_v60 = vadd.f32 %v2456_v28, %v2455_v24  ;;  %v2185_v47 = vrot.slane %v2184_v50, 4 }
 0x1c3   : > { %v2130_v0 = vrot.slane %v2129_v32, 2 }
 0x1c4   : > { %v2513_v53 = vadd.f32 %v2512_v1, %v2511_v41  ;;  %v2458_v43 = vrot.slane %v2457_v60, 1  ;;  %v2186_v18 = vadd.f32 %v2185_v47, %v2184_v50 }
 0x1c5   : > { %v2131_v61 = vadd.f32 %v2130_v0, %v2129_v32 }
 0x1c6   : > { %v2514_v21 = vrot.slane %v2513_v53, 1  ;;  %v2459_v8 = vadd.f32 %v2458_v43, %v2457_v60  ;;  %v2187_v11 = vrot.slane %v2186_v18, 2 }
 0x1c7   : > { %v2132_v12 = vrot.slane %v2131_v61, 1 }
 0x1c8   : > { %v2515_v35 = vadd.f32 %v2514_v21, %v2513_v53  ;;  %v2460_v58 = vadd.f32 %v2459_v8, %v2422_v56  ;;  %v2188_v59 = vadd.f32 %v2187_v11, %v2186_v18 }
 0x1c9   : > { %v2133_v37 = vadd.f32 %v2132_v12, %v2131_v61 }
 0x1ca   : > { %v2516_v54 = vadd.f32 %v2515_v35, %v2462_v31  ;;  %2461 = vst.msk [vmem:[%s3596_s18] sm:$0x1] %vm2135_vm8, %v2460_v58  ;;  %v2189_v48 = vrot.slane %v2188_v59, 1 }
 0x1cb   : > { %v2134_v39 = vadd.f32 %v2133_v37, %v2095_v16 }
 0x1cc   : > { %2517 = vst.msk [vmem:[%s3601_s23] sm:$0x1] %vm2135_vm8, %v2516_v54  ;;  %v2190_v2 = vadd.f32 %v2189_v48, %v2188_v59 }
 0x1cd   : > { %2136 = vst.msk [vmem:[%s3576_s22] sm:$0x1] %vm2135_vm8, %v2134_v39 }
 0x1ce   : > { %v2191_v17 = vadd.f32 %v2190_v2, %v2137_v20 }
 0x1d0   : > { %2192 = vst.msk [vmem:[%s3586_s10] sm:$0x1] %vm2135_vm8, %v2191_v17 }
 0x1d1 PF: > { %s19_s9 = sadd.s32 1, %s3487_s9   ;;  %s4353_s25 = sld [smem:[#allocation3_spill]] }
 0x1d2   : > { %p16_p8 = scmp.ge.s32.totalorder %s19_s9, 6   ;;  %s4354_s12 = sld [smem:[#allocation4_spill]] }
 0x1d3   : > { %s4355_s27 = smov %s3479_s29  ;;  %s4356_s28 = smov %s3483_s30 }
 0x1d4   :  { %18 = sbr.rel (!%p16_p8) target bundleno = 3 (0x3), region = 131 }
 0x1d7   : > { %s4357_s29 = smov %s4353_s25 }
 0x1d8   : > { %s4358_s30 = smov %s4354_s12 }

</bundles_post_ra>
